<compile_context>
chip_gen: v7x
topology: tpu7x:2x2x1
jax: 0.10.0
libtpu: 0.0.40
codegen_flags: <defaults>
</compile_context>

<pallas_src>
import functools
import math

import jax
import jax.numpy as jnp
from jax.experimental import pallas as pl
from jax.experimental.pallas import tpu as pltpu  # noqa: F401  (TPU backend)

# ----------------------------- config (small) --------------------------------
VOCAB = 100
PAD_ID = 1
HIDDEN = 32
NUM_HEADS = 2
HEAD_DIM = HIDDEN // NUM_HEADS
INTERMEDIATE = 64
NUM_LAYERS = 4          # layer0 = part1, layers 1..2 = part2, layer3 = part3
MAX_POS = 40
NUM_LABELS = 2
LINEAR_CHANNEL = 16     # scaled-down stand-in for linear_channel=768
LN_EPS = 1e-5

# MXU operand storage dtype (accumulation + all elementwise stay f32).
MM_DTYPE = jnp.bfloat16


# --------------------------- in-kernel helpers --------------------------------
def _mm(a, w):
    """MXU matmul: activation cast to bf16, weight already bf16, f32 acc."""
    return jnp.dot(a.astype(MM_DTYPE), w, preferred_element_type=jnp.float32)


def _bmm(eq, a, b):
    """Batched (single batch dim) MXU matmul via einsum, f32 accumulation."""
    return jnp.einsum(eq, a.astype(MM_DTYPE), b.astype(MM_DTYPE),
                      preferred_element_type=jnp.float32)


def _ln(x, g, b, eps):
    mu = jnp.mean(x, axis=-1, keepdims=True)
    var = jnp.mean((x - mu) ** 2, axis=-1, keepdims=True)
    return (x - mu) * jax.lax.rsqrt(var + eps) * g + b


def _gelu_tanh(y):
    # tanh-approximate GELU: keeps the transcendental on the EUP slot.
    c = 0.7978845608028654
    return 0.5 * y * (1.0 + jnp.tanh(c * (y + 0.044715 * y * y * y)))


# ------------------------------ fused kernel ----------------------------------
def _forward_kernel(x_ref, bias_ref, emb_g_ref, emb_b_ref,
                    wqkv_ref, bqkv_ref, wo_ref, bo_ref,
                    ln1g_ref, ln1b_ref, wi_ref, bi_ref, wo2_ref, bo2_ref,
                    ln2g_ref, ln2b_ref,
                    m1_ref, lin1w_ref, lin1b_ref, lin2w_ref, lin2b_ref,
                    clsw_ref, clsb_ref, outw_ref, outb_ref,
                    logits_ref, *,
                    batch, seq, num_heads, head_dim, num_layers, eps):
    """Whole RobertabaseLinear1 forward in one VMEM-resident launch."""
    hidden = num_heads * head_dim
    rows = batch * seq
    scale = 1.0 / math.sqrt(head_dim)

    # embedding LayerNorm (embeddings were gathered in the JAX wrapper)
    x = _ln(x_ref[...], emb_g_ref[...], emb_b_ref[...], eps)    # [rows, H] f32
    bias = bias_ref[...]                                        # [nh*B, 1, S]

    for l in range(num_layers):
        # ---- fused QKV projection: one MXU pass, N = 3H ----
        qkv = _mm(x, wqkv_ref[l]) + bqkv_ref[l]                 # [rows, 3H]

        # ---- pack heads onto the leading (batch) axis so attention runs as
        #      ONE batched einsum over all (head, batch) pairs ----
        def head_split(base):
            parts = [qkv[:, base + h * head_dim: base + (h + 1) * head_dim]
                     .reshape(1, batch, seq, head_dim)
                     for h in range(num_heads)]
            return jnp.concatenate(parts, axis=0).reshape(
                num_heads * batch, seq, head_dim)

        q = head_split(0)
        k = head_split(hidden)
        v = head_split(2 * hidden)

        s = _bmm("bqd,bkd->bqk", q, k) * scale + bias           # [nh*B, S, S]
        m = jnp.max(s, axis=-1, keepdims=True)
        p = jnp.exp(s - m)
        p = p * pl.reciprocal(jnp.sum(p, axis=-1, keepdims=True), approx=True)
        ctx = _bmm("bqk,bkd->bqd", p, v)                        # [nh*B, S, d]

        # unpack heads back onto the lane axis: [rows, H] (head-major columns)
        ctx = jnp.concatenate(
            [ctx[h * batch:(h + 1) * batch].reshape(rows, head_dim)
             for h in range(num_heads)], axis=-1)

        # ---- single output projection with K = hidden ----
        attn = _mm(ctx, wo_ref[l]) + bo_ref[l]

        # ---- residual + LayerNorm 1 (fused, no HBM round trip) ----
        h1 = _ln(attn + x, ln1g_ref[l], ln1b_ref[l], eps)

        # ---- FFN (tanh-approx GELU) + residual + LayerNorm 2 ----
        f = _gelu_tanh(_mm(h1, wi_ref[l]) + bi_ref[l])
        f = _mm(f, wo2_ref[l]) + bo2_ref[l]
        x = _ln(f + h1, ln2g_ref[l], ln2b_ref[l], eps)

        if l == 0:
            # "output @ matrix1": matrix1 is a learned Parameter (identity at
            # init) applied AFTER layer-0's output LN, so it cannot be folded
            # into wo2; keep the (tiny) matmul for semantic fidelity.
            x = _mm(x, m1_ref[...])
        if l == num_layers - 2:
            # eye is None branch: linear1 -> linear2, intermediate stays in VMEM
            mid = _mm(x, lin1w_ref[...]) + lin1b_ref[...]
            x = _mm(mid, lin2w_ref[...]) + lin2b_ref[...]

    # ---- classification head on the <s> token (row 0 of each sequence),
    #      fused into the same kernel: dense + tanh -> out_proj ----
    cls = x.reshape(batch, seq, hidden)[:, 0, :]                # [B, H]
    h = jnp.tanh(_mm(cls, clsw_ref[...]) + clsb_ref[...])
    logits_ref[...] = _mm(h, outw_ref[...]) + outb_ref[...]


# ------------------------------ model forward ---------------------------------
def roberta_linear1_forward(params, input_ids, mask):
    """Mirrors RobertabaseLinear1.forward (eval mode, dropout = identity)."""
    B, S = input_ids.shape
    H = HIDDEN
    rows = B * S

    # mask -> additive attention bias, pre-tiled over heads: [nh*B, 1, S]
    m = mask.astype(jnp.float32).reshape(B, 1, S)
    bias = jnp.tile((1.0 - m) * -1e9, (NUM_HEADS, 1, 1))

    # embeddings (RoBERTa position ids from padding mask) — gathers stay in JAX
    tok_mask = (input_ids != PAD_ID).astype(jnp.int32)
    pos_ids = jnp.cumsum(tok_mask, axis=1) * tok_mask + PAD_ID
    emb = (jnp.take(params["word_emb"], input_ids, axis=0)
           + jnp.take(params["pos_emb"], pos_ids, axis=0)
           + params["type_emb"][0])
    x2 = emb.reshape(rows, H)          # 2-D activation slab for the kernel

    kernel = functools.partial(
        _forward_kernel, batch=B, seq=S, num_heads=NUM_HEADS,
        head_dim=HEAD_DIM, num_layers=NUM_LAYERS, eps=LN_EPS)

    P = params
    args = [x2, bias, P["emb_ln_g"], P["emb_ln_b"],
            P["wqkv"], P["bqkv"], P["wo"], P["bo"],
            P["ln1_g"], P["ln1_b"], P["wi"], P["bi"],
            P["wo2"], P["bo2"], P["ln2_g"], P["ln2_b"],
            P["matrix1"], P["lin1_w"], P["lin1_b"], P["lin2_w"], P["lin2_b"],
            P["cls_dense_w"], P["cls_dense_b"], P["cls_out_w"], P["cls_out_b"]]

    # Single launch; every operand is a full-array VMEM block (tiny workload).
    # TODO(synk): at real RoBERTa-base size, split back into per-layer calls
    # with a row-tiled grid over B*S (TM multiple of 8, constant index_maps for
    # weights, dimension_semantics=("parallel",)) so v7x's two TensorCores are
    # used, and set vmem_limit_bytes explicitly for v7x's 64 MiB VMEM budget.
    return pl.pallas_call(
        kernel,
        out_shape=jax.ShapeDtypeStruct((B, NUM_LABELS), jnp.float32),
    )(*args)


# --------------------------- deterministic params ----------------------------
def init_params(key):
    def nrm(k, shape, dtype=MM_DTYPE, scale=0.02):
        # matmul weights are stored pre-cast to bf16 (MM_DTYPE)
        return (scale * jax.random.normal(k, shape, jnp.float32)).astype(dtype)

    def zeros2(n):
        return jnp.zeros((1, n), jnp.float32)

    keys = jax.random.split(key, 12)
    p = {
        "word_emb": nrm(keys[0], (VOCAB, HIDDEN), jnp.float32),
        "pos_emb": nrm(keys[1], (MAX_POS, HIDDEN), jnp.float32),
        "type_emb": nrm(keys[2], (1, HIDDEN), jnp.float32),
        "emb_ln_g": jnp.ones((1, HIDDEN), jnp.float32),
        "emb_ln_b": zeros2(HIDDEN),
        "matrix1": jnp.eye(HIDDEN, dtype=MM_DTYPE),
        "lin1_w": nrm(keys[3], (HIDDEN, LINEAR_CHANNEL)),
        "lin1_b": zeros2(LINEAR_CHANNEL),
        "lin2_w": nrm(keys[4], (LINEAR_CHANNEL, HIDDEN)),
        "lin2_b": zeros2(HIDDEN),
        "cls_dense_w": nrm(keys[5], (HIDDEN, HIDDEN)),
        "cls_dense_b": zeros2(HIDDEN),
        "cls_out_w": nrm(keys[6], (HIDDEN, NUM_LABELS)),
        "cls_out_b": zeros2(NUM_LABELS),
        # ---- stacked per-layer encoder params (leading dim = NUM_LAYERS) ----
        # Q|K|V fused along the output dim: [L, H, 3H] bf16 weight, f32 bias.
        "wqkv": nrm(keys[7], (NUM_LAYERS, HIDDEN, 3 * HIDDEN)),
        "bqkv": jnp.zeros((NUM_LAYERS, 1, 3 * HIDDEN), jnp.float32),
        "wo": nrm(keys[8], (NUM_LAYERS, HIDDEN, HIDDEN)),
        "bo": jnp.zeros((NUM_LAYERS, 1, HIDDEN), jnp.float32),
        "ln1_g": jnp.ones((NUM_LAYERS, 1, HIDDEN), jnp.float32),
        "ln1_b": jnp.zeros((NUM_LAYERS, 1, HIDDEN), jnp.float32),
        "wi": nrm(keys[9], (NUM_LAYERS, HIDDEN, INTERMEDIATE)),
        "bi": jnp.zeros((NUM_LAYERS, 1, INTERMEDIATE), jnp.float32),
        "wo2": nrm(keys[10], (NUM_LAYERS, INTERMEDIATE, HIDDEN)),
        "bo2": jnp.zeros((NUM_LAYERS, 1, HIDDEN), jnp.float32),
        "ln2_g": jnp.ones((NUM_LAYERS, 1, HIDDEN), jnp.float32),
        "ln2_b": jnp.zeros((NUM_LAYERS, 1, HIDDEN), jnp.float32),
    }
    return p


# ----------------------------------- main -------------------------------------
if __name__ == "__main__":
    key = jax.random.PRNGKey(0)
    pkey, ikey = jax.random.split(key)
    params = init_params(pkey)

    B, S = 2, 8
    input_ids = jax.random.randint(ikey, (B, S), 2, VOCAB, dtype=jnp.int32)
    # pad the tail of the second sequence to exercise the attention mask
    input_ids = input_ids.at[1, -2:].set(PAD_ID)
    mask = (input_ids != PAD_ID).astype(jnp.float32)   # [B, S]

    logits = jax.jit(roberta_linear1_forward)(params, input_ids, mask)
    logits = jax.block_until_ready(logits)
    assert logits.shape == (B, NUM_LABELS)
    print("KERNEL_OK")
</pallas_src>

<mosaic_0001>
module attributes {stable_mosaic.version = 11 : i64} {
  func.func @_forward_kernel(%arg0: memref<16x32xf32, #tpu.memory_space<vmem>>, %arg1: memref<4x1x8xf32, #tpu.memory_space<vmem>>, %arg2: memref<1x32xf32, #tpu.memory_space<vmem>>, %arg3: memref<1x32xf32, #tpu.memory_space<vmem>>, %arg4: memref<4x32x96xbf16, #tpu.memory_space<vmem>>, %arg5: memref<4x1x96xf32, #tpu.memory_space<vmem>>, %arg6: memref<4x32x32xbf16, #tpu.memory_space<vmem>>, %arg7: memref<4x1x32xf32, #tpu.memory_space<vmem>>, %arg8: memref<4x1x32xf32, #tpu.memory_space<vmem>>, %arg9: memref<4x1x32xf32, #tpu.memory_space<vmem>>, %arg10: memref<4x32x64xbf16, #tpu.memory_space<vmem>>, %arg11: memref<4x1x64xf32, #tpu.memory_space<vmem>>, %arg12: memref<4x64x32xbf16, #tpu.memory_space<vmem>>, %arg13: memref<4x1x32xf32, #tpu.memory_space<vmem>>, %arg14: memref<4x1x32xf32, #tpu.memory_space<vmem>>, %arg15: memref<4x1x32xf32, #tpu.memory_space<vmem>>, %arg16: memref<32x32xbf16, #tpu.memory_space<vmem>>, %arg17: memref<32x16xbf16, #tpu.memory_space<vmem>>, %arg18: memref<1x16xf32, #tpu.memory_space<vmem>>, %arg19: memref<16x32xbf16, #tpu.memory_space<vmem>>, %arg20: memref<1x32xf32, #tpu.memory_space<vmem>>, %arg21: memref<32x32xbf16, #tpu.memory_space<vmem>>, %arg22: memref<1x32xf32, #tpu.memory_space<vmem>>, %arg23: memref<32x2xbf16, #tpu.memory_space<vmem>>, %arg24: memref<1x2xf32, #tpu.memory_space<vmem>>, %arg25: memref<2x2xf32, #tpu.memory_space<vmem>>) attributes {dimension_semantics = [], scalar_prefetch = 0 : i64, scratch_operands = 0 : i64, tpu.core_type = #tpu.core_type<tc>} {
    %c0 = arith.constant 0 : index
    %c0_0 = arith.constant 0 : index
    %0 = vector.load %arg0[%c0, %c0_0] : memref<16x32xf32, #tpu.memory_space<vmem>>, vector<16x32xf32>
    %c0_1 = arith.constant 0 : index
    %c0_2 = arith.constant 0 : index
    %1 = vector.load %arg2[%c0_1, %c0_2] : memref<1x32xf32, #tpu.memory_space<vmem>>, vector<1x32xf32>
    %c0_3 = arith.constant 0 : index
    %c0_4 = arith.constant 0 : index
    %2 = vector.load %arg3[%c0_3, %c0_4] : memref<1x32xf32, #tpu.memory_space<vmem>>, vector<1x32xf32>
    %cst = arith.constant dense<0.000000e+00> : vector<16xf32>
    %3 = vector.multi_reduction <add>, %0, %cst [1] : vector<16x32xf32> to vector<16xf32>
    %4 = vector.shape_cast %3 : vector<16xf32> to vector<16x1xf32>
    %cst_5 = arith.constant 3.200000e+01 : f32
    %5 = vector.broadcast %cst_5 : f32 to vector<16x1xf32>
    %6 = arith.divf %4, %5 : vector<16x1xf32>
    %7 = vector.broadcast %6 : vector<16x1xf32> to vector<16x32xf32>
    %8 = arith.subf %0, %7 : vector<16x32xf32>
    %9 = arith.mulf %8, %8 : vector<16x32xf32>
    %cst_6 = arith.constant dense<0.000000e+00> : vector<16xf32>
    %10 = vector.multi_reduction <add>, %9, %cst_6 [1] : vector<16x32xf32> to vector<16xf32>
    %11 = vector.shape_cast %10 : vector<16xf32> to vector<16x1xf32>
    %cst_7 = arith.constant 3.200000e+01 : f32
    %12 = vector.broadcast %cst_7 : f32 to vector<16x1xf32>
    %13 = arith.divf %11, %12 : vector<16x1xf32>
    %14 = vector.broadcast %6 : vector<16x1xf32> to vector<16x32xf32>
    %15 = arith.subf %0, %14 : vector<16x32xf32>
    %cst_8 = arith.constant 9.99999974E-6 : f32
    %16 = vector.broadcast %cst_8 : f32 to vector<16x1xf32>
    %17 = arith.addf %13, %16 : vector<16x1xf32>
    %18 = math.rsqrt %17 : vector<16x1xf32>
    %19 = vector.broadcast %18 : vector<16x1xf32> to vector<16x32xf32>
    %20 = arith.mulf %15, %19 : vector<16x32xf32>
    %21 = vector.broadcast %1 : vector<1x32xf32> to vector<16x32xf32>
    %22 = arith.mulf %20, %21 : vector<16x32xf32>
    %23 = vector.broadcast %2 : vector<1x32xf32> to vector<16x32xf32>
    %24 = arith.addf %22, %23 : vector<16x32xf32>
    %c0_9 = arith.constant 0 : index
    %c0_10 = arith.constant 0 : index
    %c0_11 = arith.constant 0 : index
    %25 = vector.load %arg1[%c0_9, %c0_10, %c0_11] : memref<4x1x8xf32, #tpu.memory_space<vmem>>, vector<4x1x8xf32>
    %c0_12 = arith.constant 0 : index
    %c0_13 = arith.constant 0 : index
    %c0_14 = arith.constant 0 : index
    %26 = vector.load %arg4[%c0_12, %c0_13, %c0_14] : memref<4x32x96xbf16, #tpu.memory_space<vmem>>, vector<1x32x96xbf16>
    %27 = vector.shape_cast %26 : vector<1x32x96xbf16> to vector<32x96xbf16>
    %28 = arith.truncf %24 : vector<16x32xf32> to vector<16x32xbf16>
    %cst_15 = arith.constant dense<0.000000e+00> : vector<16x96xf32>
    %29 = tpu.matmul %28, %27, %cst_15 {dimension_numbers = #tpu.dot_dimension_numbers<[1], [0], [0], [1], [0, 0, 1, 1], [], []>} : vector<16x32xbf16>, vector<32x96xbf16>, vector<16x96xf32> -> vector<16x96xf32>
    %c0_16 = arith.constant 0 : index
    %c0_17 = arith.constant 0 : index
    %c0_18 = arith.constant 0 : index
    %30 = vector.load %arg5[%c0_16, %c0_17, %c0_18] : memref<4x1x96xf32, #tpu.memory_space<vmem>>, vector<1x1x96xf32>
    %31 = vector.shape_cast %30 : vector<1x1x96xf32> to vector<1x96xf32>
    %32 = vector.broadcast %31 : vector<1x96xf32> to vector<16x96xf32>
    %33 = arith.addf %29, %32 : vector<16x96xf32>
    %34 = vector.extract_strided_slice %33 {offsets = [0, 0], sizes = [16, 16], strides = [1, 1]} : vector<16x96xf32> to vector<16x16xf32>
    %35 = vector.shape_cast %34 : vector<16x16xf32> to vector<1x2x8x16xf32>
    %36 = vector.extract_strided_slice %33 {offsets = [0, 16], sizes = [16, 16], strides = [1, 1]} : vector<16x96xf32> to vector<16x16xf32>
    %37 = vector.shape_cast %36 : vector<16x16xf32> to vector<1x2x8x16xf32>
    %38 = tpu.concatenate %35, %37 in 0 : vector<1x2x8x16xf32>, vector<1x2x8x16xf32> -> vector<2x2x8x16xf32>
    %39 = vector.shape_cast %38 : vector<2x2x8x16xf32> to vector<4x8x16xf32>
    %40 = vector.extract_strided_slice %33 {offsets = [0, 32], sizes = [16, 16], strides = [1, 1]} : vector<16x96xf32> to vector<16x16xf32>
    %41 = vector.shape_cast %40 : vector<16x16xf32> to vector<1x2x8x16xf32>
    %42 = vector.extract_strided_slice %33 {offsets = [0, 48], sizes = [16, 16], strides = [1, 1]} : vector<16x96xf32> to vector<16x16xf32>
    %43 = vector.shape_cast %42 : vector<16x16xf32> to vector<1x2x8x16xf32>
    %44 = tpu.concatenate %41, %43 in 0 : vector<1x2x8x16xf32>, vector<1x2x8x16xf32> -> vector<2x2x8x16xf32>
    %45 = vector.shape_cast %44 : vector<2x2x8x16xf32> to vector<4x8x16xf32>
    %46 = vector.extract_strided_slice %33 {offsets = [0, 64], sizes = [16, 16], strides = [1, 1]} : vector<16x96xf32> to vector<16x16xf32>
    %47 = vector.shape_cast %46 : vector<16x16xf32> to vector<1x2x8x16xf32>
    %48 = vector.extract_strided_slice %33 {offsets = [0, 80], sizes = [16, 16], strides = [1, 1]} : vector<16x96xf32> to vector<16x16xf32>
    %49 = vector.shape_cast %48 : vector<16x16xf32> to vector<1x2x8x16xf32>
    %50 = tpu.concatenate %47, %49 in 0 : vector<1x2x8x16xf32>, vector<1x2x8x16xf32> -> vector<2x2x8x16xf32>
    %51 = vector.shape_cast %50 : vector<2x2x8x16xf32> to vector<4x8x16xf32>
    %52 = arith.truncf %39 : vector<4x8x16xf32> to vector<4x8x16xbf16>
    %53 = arith.truncf %45 : vector<4x8x16xf32> to vector<4x8x16xbf16>
    "tpu.trace_start"() <{level = 10 : i32, message = "bqd,bkd->bqk"}> : () -> ()
    %cst_19 = arith.constant dense<0.000000e+00> : vector<4x8x8xf32>
    %54 = tpu.matmul %52, %53, %cst_19 {dimension_numbers = #tpu.dot_dimension_numbers<[2], [2], [1], [1], [0, 0, 0, 1, 1, 1], [0], [0]>} : vector<4x8x16xbf16>, vector<4x8x16xbf16>, vector<4x8x8xf32> -> vector<4x8x8xf32>
    "tpu.trace_stop"() : () -> ()
    %cst_20 = arith.constant 2.500000e-01 : f32
    %55 = vector.broadcast %cst_20 : f32 to vector<4x8x8xf32>
    %56 = arith.mulf %54, %55 : vector<4x8x8xf32>
    %57 = vector.broadcast %25 : vector<4x1x8xf32> to vector<4x8x8xf32>
    %58 = arith.addf %56, %57 : vector<4x8x8xf32>
    %cst_21 = arith.constant dense<0xFF800000> : vector<4x8xf32>
    %59 = vector.multi_reduction <maximumf>, %58, %cst_21 [2] : vector<4x8x8xf32> to vector<4x8xf32>
    %60 = vector.shape_cast %59 : vector<4x8xf32> to vector<4x8x1xf32>
    %61 = vector.broadcast %60 : vector<4x8x1xf32> to vector<4x8x8xf32>
    %62 = arith.subf %58, %61 : vector<4x8x8xf32>
    %63 = math.exp %62 : vector<4x8x8xf32>
    %cst_22 = arith.constant dense<0.000000e+00> : vector<4x8xf32>
    %64 = vector.multi_reduction <add>, %63, %cst_22 [2] : vector<4x8x8xf32> to vector<4x8xf32>
    %65 = vector.shape_cast %64 : vector<4x8xf32> to vector<4x8x1xf32>
    %66 = tpu.reciprocal %65 {approx = true} : vector<4x8x1xf32> -> vector<4x8x1xf32>
    %67 = vector.broadcast %66 : vector<4x8x1xf32> to vector<4x8x8xf32>
    %68 = arith.mulf %63, %67 : vector<4x8x8xf32>
    %69 = arith.truncf %68 : vector<4x8x8xf32> to vector<4x8x8xbf16>
    %70 = arith.truncf %51 : vector<4x8x16xf32> to vector<4x8x16xbf16>
    "tpu.trace_start"() <{level = 10 : i32, message = "bqk,bkd->bqd"}> : () -> ()
    %cst_23 = arith.constant dense<0.000000e+00> : vector<4x8x16xf32>
    %71 = tpu.matmul %69, %70, %cst_23 {dimension_numbers = #tpu.dot_dimension_numbers<[2], [1], [1], [2], [0, 0, 0, 1, 1, 2], [0], [0]>} : vector<4x8x8xbf16>, vector<4x8x16xbf16>, vector<4x8x16xf32> -> vector<4x8x16xf32>
    "tpu.trace_stop"() : () -> ()
    %72 = vector.extract_strided_slice %71 {offsets = [0, 0, 0], sizes = [2, 8, 16], strides = [1, 1, 1]} : vector<4x8x16xf32> to vector<2x8x16xf32>
    %73 = vector.shape_cast %72 : vector<2x8x16xf32> to vector<16x16xf32>
    %74 = vector.extract_strided_slice %71 {offsets = [2, 0, 0], sizes = [2, 8, 16], strides = [1, 1, 1]} : vector<4x8x16xf32> to vector<2x8x16xf32>
    %75 = vector.shape_cast %74 : vector<2x8x16xf32> to vector<16x16xf32>
    %76 = tpu.concatenate %73, %75 in 1 : vector<16x16xf32>, vector<16x16xf32> -> vector<16x32xf32>
    %c0_24 = arith.constant 0 : index
    %c0_25 = arith.constant 0 : index
    %c0_26 = arith.constant 0 : index
    %77 = vector.load %arg6[%c0_24, %c0_25, %c0_26] : memref<4x32x32xbf16, #tpu.memory_space<vmem>>, vector<1x32x32xbf16>
    %78 = vector.shape_cast %77 : vector<1x32x32xbf16> to vector<32x32xbf16>
    %79 = arith.truncf %76 : vector<16x32xf32> to vector<16x32xbf16>
    %cst_27 = arith.constant dense<0.000000e+00> : vector<16x32xf32>
    %80 = tpu.matmul %79, %78, %cst_27 {dimension_numbers = #tpu.dot_dimension_numbers<[1], [0], [0], [1], [0, 0, 1, 1], [], []>} : vector<16x32xbf16>, vector<32x32xbf16>, vector<16x32xf32> -> vector<16x32xf32>
    %c0_28 = arith.constant 0 : index
    %c0_29 = arith.constant 0 : index
    %c0_30 = arith.constant 0 : index
    %81 = vector.load %arg7[%c0_28, %c0_29, %c0_30] : memref<4x1x32xf32, #tpu.memory_space<vmem>>, vector<1x1x32xf32>
    %82 = vector.shape_cast %81 : vector<1x1x32xf32> to vector<1x32xf32>
    %83 = vector.broadcast %82 : vector<1x32xf32> to vector<16x32xf32>
    %84 = arith.addf %80, %83 : vector<16x32xf32>
    %85 = arith.addf %84, %24 : vector<16x32xf32>
    %c0_31 = arith.constant 0 : index
    %c0_32 = arith.constant 0 : index
    %c0_33 = arith.constant 0 : index
    %86 = vector.load %arg8[%c0_31, %c0_32, %c0_33] : memref<4x1x32xf32, #tpu.memory_space<vmem>>, vector<1x1x32xf32>
    %87 = vector.shape_cast %86 : vector<1x1x32xf32> to vector<1x32xf32>
    %c0_34 = arith.constant 0 : index
    %c0_35 = arith.constant 0 : index
    %c0_36 = arith.constant 0 : index
    %88 = vector.load %arg9[%c0_34, %c0_35, %c0_36] : memref<4x1x32xf32, #tpu.memory_space<vmem>>, vector<1x1x32xf32>
    %89 = vector.shape_cast %88 : vector<1x1x32xf32> to vector<1x32xf32>
    %cst_37 = arith.constant dense<0.000000e+00> : vector<16xf32>
    %90 = vector.multi_reduction <add>, %85, %cst_37 [1] : vector<16x32xf32> to vector<16xf32>
    %91 = vector.shape_cast %90 : vector<16xf32> to vector<16x1xf32>
    %cst_38 = arith.constant 3.200000e+01 : f32
    %92 = vector.broadcast %cst_38 : f32 to vector<16x1xf32>
    %93 = arith.divf %91, %92 : vector<16x1xf32>
    %94 = vector.broadcast %93 : vector<16x1xf32> to vector<16x32xf32>
    %95 = arith.subf %85, %94 : vector<16x32xf32>
    %96 = arith.mulf %95, %95 : vector<16x32xf32>
    %cst_39 = arith.constant dense<0.000000e+00> : vector<16xf32>
    %97 = vector.multi_reduction <add>, %96, %cst_39 [1] : vector<16x32xf32> to vector<16xf32>
    %98 = vector.shape_cast %97 : vector<16xf32> to vector<16x1xf32>
    %cst_40 = arith.constant 3.200000e+01 : f32
    %99 = vector.broadcast %cst_40 : f32 to vector<16x1xf32>
    %100 = arith.divf %98, %99 : vector<16x1xf32>
    %101 = vector.broadcast %93 : vector<16x1xf32> to vector<16x32xf32>
    %102 = arith.subf %85, %101 : vector<16x32xf32>
    %cst_41 = arith.constant 9.99999974E-6 : f32
    %103 = vector.broadcast %cst_41 : f32 to vector<16x1xf32>
    %104 = arith.addf %100, %103 : vector<16x1xf32>
    %105 = math.rsqrt %104 : vector<16x1xf32>
    %106 = vector.broadcast %105 : vector<16x1xf32> to vector<16x32xf32>
    %107 = arith.mulf %102, %106 : vector<16x32xf32>
    %108 = vector.broadcast %87 : vector<1x32xf32> to vector<16x32xf32>
    %109 = arith.mulf %107, %108 : vector<16x32xf32>
    %110 = vector.broadcast %89 : vector<1x32xf32> to vector<16x32xf32>
    %111 = arith.addf %109, %110 : vector<16x32xf32>
    %c0_42 = arith.constant 0 : index
    %c0_43 = arith.constant 0 : index
    %c0_44 = arith.constant 0 : index
    %112 = vector.load %arg10[%c0_42, %c0_43, %c0_44] : memref<4x32x64xbf16, #tpu.memory_space<vmem>>, vector<1x32x64xbf16>
    %113 = vector.shape_cast %112 : vector<1x32x64xbf16> to vector<32x64xbf16>
    %114 = arith.truncf %111 : vector<16x32xf32> to vector<16x32xbf16>
    %cst_45 = arith.constant dense<0.000000e+00> : vector<16x64xf32>
    %115 = tpu.matmul %114, %113, %cst_45 {dimension_numbers = #tpu.dot_dimension_numbers<[1], [0], [0], [1], [0, 0, 1, 1], [], []>} : vector<16x32xbf16>, vector<32x64xbf16>, vector<16x64xf32> -> vector<16x64xf32>
    %c0_46 = arith.constant 0 : index
    %c0_47 = arith.constant 0 : index
    %c0_48 = arith.constant 0 : index
    %116 = vector.load %arg11[%c0_46, %c0_47, %c0_48] : memref<4x1x64xf32, #tpu.memory_space<vmem>>, vector<1x1x64xf32>
    %117 = vector.shape_cast %116 : vector<1x1x64xf32> to vector<1x64xf32>
    %118 = vector.broadcast %117 : vector<1x64xf32> to vector<16x64xf32>
    %119 = arith.addf %115, %118 : vector<16x64xf32>
    %cst_49 = arith.constant 5.000000e-01 : f32
    %120 = vector.broadcast %cst_49 : f32 to vector<16x64xf32>
    %121 = arith.mulf %120, %119 : vector<16x64xf32>
    %cst_50 = arith.constant 4.471500e-02 : f32
    %122 = vector.broadcast %cst_50 : f32 to vector<16x64xf32>
    %123 = arith.mulf %122, %119 : vector<16x64xf32>
    %124 = arith.mulf %123, %119 : vector<16x64xf32>
    %125 = arith.mulf %124, %119 : vector<16x64xf32>
    %126 = arith.addf %119, %125 : vector<16x64xf32>
    %cst_51 = arith.constant 0.797884583 : f32
    %127 = vector.broadcast %cst_51 : f32 to vector<16x64xf32>
    %128 = arith.mulf %127, %126 : vector<16x64xf32>
    %129 = math.tanh %128 : vector<16x64xf32>
    %cst_52 = arith.constant 1.000000e+00 : f32
    %130 = vector.broadcast %cst_52 : f32 to vector<16x64xf32>
    %131 = arith.addf %130, %129 : vector<16x64xf32>
    %132 = arith.mulf %121, %131 : vector<16x64xf32>
    %c0_53 = arith.constant 0 : index
    %c0_54 = arith.constant 0 : index
    %c0_55 = arith.constant 0 : index
    %133 = vector.load %arg12[%c0_53, %c0_54, %c0_55] : memref<4x64x32xbf16, #tpu.memory_space<vmem>>, vector<1x64x32xbf16>
    %134 = vector.shape_cast %133 : vector<1x64x32xbf16> to vector<64x32xbf16>
    %135 = arith.truncf %132 : vector<16x64xf32> to vector<16x64xbf16>
    %cst_56 = arith.constant dense<0.000000e+00> : vector<16x32xf32>
    %136 = tpu.matmul %135, %134, %cst_56 {dimension_numbers = #tpu.dot_dimension_numbers<[1], [0], [0], [1], [0, 0, 1, 1], [], []>} : vector<16x64xbf16>, vector<64x32xbf16>, vector<16x32xf32> -> vector<16x32xf32>
    %c0_57 = arith.constant 0 : index
    %c0_58 = arith.constant 0 : index
    %c0_59 = arith.constant 0 : index
    %137 = vector.load %arg13[%c0_57, %c0_58, %c0_59] : memref<4x1x32xf32, #tpu.memory_space<vmem>>, vector<1x1x32xf32>
    %138 = vector.shape_cast %137 : vector<1x1x32xf32> to vector<1x32xf32>
    %139 = vector.broadcast %138 : vector<1x32xf32> to vector<16x32xf32>
    %140 = arith.addf %136, %139 : vector<16x32xf32>
    %141 = arith.addf %140, %111 : vector<16x32xf32>
    %c0_60 = arith.constant 0 : index
    %c0_61 = arith.constant 0 : index
    %c0_62 = arith.constant 0 : index
    %142 = vector.load %arg14[%c0_60, %c0_61, %c0_62] : memref<4x1x32xf32, #tpu.memory_space<vmem>>, vector<1x1x32xf32>
    %143 = vector.shape_cast %142 : vector<1x1x32xf32> to vector<1x32xf32>
    %c0_63 = arith.constant 0 : index
    %c0_64 = arith.constant 0 : index
    %c0_65 = arith.constant 0 : index
    %144 = vector.load %arg15[%c0_63, %c0_64, %c0_65] : memref<4x1x32xf32, #tpu.memory_space<vmem>>, vector<1x1x32xf32>
    %145 = vector.shape_cast %144 : vector<1x1x32xf32> to vector<1x32xf32>
    %cst_66 = arith.constant dense<0.000000e+00> : vector<16xf32>
    %146 = vector.multi_reduction <add>, %141, %cst_66 [1] : vector<16x32xf32> to vector<16xf32>
    %147 = vector.shape_cast %146 : vector<16xf32> to vector<16x1xf32>
    %cst_67 = arith.constant 3.200000e+01 : f32
    %148 = vector.broadcast %cst_67 : f32 to vector<16x1xf32>
    %149 = arith.divf %147, %148 : vector<16x1xf32>
    %150 = vector.broadcast %149 : vector<16x1xf32> to vector<16x32xf32>
    %151 = arith.subf %141, %150 : vector<16x32xf32>
    %152 = arith.mulf %151, %151 : vector<16x32xf32>
    %cst_68 = arith.constant dense<0.000000e+00> : vector<16xf32>
    %153 = vector.multi_reduction <add>, %152, %cst_68 [1] : vector<16x32xf32> to vector<16xf32>
    %154 = vector.shape_cast %153 : vector<16xf32> to vector<16x1xf32>
    %cst_69 = arith.constant 3.200000e+01 : f32
    %155 = vector.broadcast %cst_69 : f32 to vector<16x1xf32>
    %156 = arith.divf %154, %155 : vector<16x1xf32>
    %157 = vector.broadcast %149 : vector<16x1xf32> to vector<16x32xf32>
    %158 = arith.subf %141, %157 : vector<16x32xf32>
    %cst_70 = arith.constant 9.99999974E-6 : f32
    %159 = vector.broadcast %cst_70 : f32 to vector<16x1xf32>
    %160 = arith.addf %156, %159 : vector<16x1xf32>
    %161 = math.rsqrt %160 : vector<16x1xf32>
    %162 = vector.broadcast %161 : vector<16x1xf32> to vector<16x32xf32>
    %163 = arith.mulf %158, %162 : vector<16x32xf32>
    %164 = vector.broadcast %143 : vector<1x32xf32> to vector<16x32xf32>
    %165 = arith.mulf %163, %164 : vector<16x32xf32>
    %166 = vector.broadcast %145 : vector<1x32xf32> to vector<16x32xf32>
    %167 = arith.addf %165, %166 : vector<16x32xf32>
    %c0_71 = arith.constant 0 : index
    %c0_72 = arith.constant 0 : index
    %168 = vector.load %arg16[%c0_71, %c0_72] : memref<32x32xbf16, #tpu.memory_space<vmem>>, vector<32x32xbf16>
    %169 = arith.truncf %167 : vector<16x32xf32> to vector<16x32xbf16>
    %cst_73 = arith.constant dense<0.000000e+00> : vector<16x32xf32>
    %170 = tpu.matmul %169, %168, %cst_73 {dimension_numbers = #tpu.dot_dimension_numbers<[1], [0], [0], [1], [0, 0, 1, 1], [], []>} : vector<16x32xbf16>, vector<32x32xbf16>, vector<16x32xf32> -> vector<16x32xf32>
    %c1 = arith.constant 1 : index
    %c0_74 = arith.constant 0 : index
    %c0_75 = arith.constant 0 : index
    %171 = vector.load %arg4[%c1, %c0_74, %c0_75] : memref<4x32x96xbf16, #tpu.memory_space<vmem>>, vector<1x32x96xbf16>
    %172 = vector.shape_cast %171 : vector<1x32x96xbf16> to vector<32x96xbf16>
    %173 = arith.truncf %170 : vector<16x32xf32> to vector<16x32xbf16>
    %cst_76 = arith.constant dense<0.000000e+00> : vector<16x96xf32>
    %174 = tpu.matmul %173, %172, %cst_76 {dimension_numbers = #tpu.dot_dimension_numbers<[1], [0], [0], [1], [0, 0, 1, 1], [], []>} : vector<16x32xbf16>, vector<32x96xbf16>, vector<16x96xf32> -> vector<16x96xf32>
    %c1_77 = arith.constant 1 : index
    %c0_78 = arith.constant 0 : index
    %c0_79 = arith.constant 0 : index
    %175 = vector.load %arg5[%c1_77, %c0_78, %c0_79] : memref<4x1x96xf32, #tpu.memory_space<vmem>>, vector<1x1x96xf32>
    %176 = vector.shape_cast %175 : vector<1x1x96xf32> to vector<1x96xf32>
    %177 = vector.broadcast %176 : vector<1x96xf32> to vector<16x96xf32>
    %178 = arith.addf %174, %177 : vector<16x96xf32>
    %179 = vector.extract_strided_slice %178 {offsets = [0, 0], sizes = [16, 16], strides = [1, 1]} : vector<16x96xf32> to vector<16x16xf32>
    %180 = vector.shape_cast %179 : vector<16x16xf32> to vector<1x2x8x16xf32>
    %181 = vector.extract_strided_slice %178 {offsets = [0, 16], sizes = [16, 16], strides = [1, 1]} : vector<16x96xf32> to vector<16x16xf32>
    %182 = vector.shape_cast %181 : vector<16x16xf32> to vector<1x2x8x16xf32>
    %183 = tpu.concatenate %180, %182 in 0 : vector<1x2x8x16xf32>, vector<1x2x8x16xf32> -> vector<2x2x8x16xf32>
    %184 = vector.shape_cast %183 : vector<2x2x8x16xf32> to vector<4x8x16xf32>
    %185 = vector.extract_strided_slice %178 {offsets = [0, 32], sizes = [16, 16], strides = [1, 1]} : vector<16x96xf32> to vector<16x16xf32>
    %186 = vector.shape_cast %185 : vector<16x16xf32> to vector<1x2x8x16xf32>
    %187 = vector.extract_strided_slice %178 {offsets = [0, 48], sizes = [16, 16], strides = [1, 1]} : vector<16x96xf32> to vector<16x16xf32>
    %188 = vector.shape_cast %187 : vector<16x16xf32> to vector<1x2x8x16xf32>
    %189 = tpu.concatenate %186, %188 in 0 : vector<1x2x8x16xf32>, vector<1x2x8x16xf32> -> vector<2x2x8x16xf32>
    %190 = vector.shape_cast %189 : vector<2x2x8x16xf32> to vector<4x8x16xf32>
    %191 = vector.extract_strided_slice %178 {offsets = [0, 64], sizes = [16, 16], strides = [1, 1]} : vector<16x96xf32> to vector<16x16xf32>
    %192 = vector.shape_cast %191 : vector<16x16xf32> to vector<1x2x8x16xf32>
    %193 = vector.extract_strided_slice %178 {offsets = [0, 80], sizes = [16, 16], strides = [1, 1]} : vector<16x96xf32> to vector<16x16xf32>
    %194 = vector.shape_cast %193 : vector<16x16xf32> to vector<1x2x8x16xf32>
    %195 = tpu.concatenate %192, %194 in 0 : vector<1x2x8x16xf32>, vector<1x2x8x16xf32> -> vector<2x2x8x16xf32>
    %196 = vector.shape_cast %195 : vector<2x2x8x16xf32> to vector<4x8x16xf32>
    %197 = arith.truncf %184 : vector<4x8x16xf32> to vector<4x8x16xbf16>
    %198 = arith.truncf %190 : vector<4x8x16xf32> to vector<4x8x16xbf16>
    "tpu.trace_start"() <{level = 10 : i32, message = "bqd,bkd->bqk"}> : () -> ()
    %cst_80 = arith.constant dense<0.000000e+00> : vector<4x8x8xf32>
    %199 = tpu.matmul %197, %198, %cst_80 {dimension_numbers = #tpu.dot_dimension_numbers<[2], [2], [1], [1], [0, 0, 0, 1, 1, 1], [0], [0]>} : vector<4x8x16xbf16>, vector<4x8x16xbf16>, vector<4x8x8xf32> -> vector<4x8x8xf32>
    "tpu.trace_stop"() : () -> ()
    %cst_81 = arith.constant 2.500000e-01 : f32
    %200 = vector.broadcast %cst_81 : f32 to vector<4x8x8xf32>
    %201 = arith.mulf %199, %200 : vector<4x8x8xf32>
    %202 = vector.broadcast %25 : vector<4x1x8xf32> to vector<4x8x8xf32>
    %203 = arith.addf %201, %202 : vector<4x8x8xf32>
    %cst_82 = arith.constant dense<0xFF800000> : vector<4x8xf32>
    %204 = vector.multi_reduction <maximumf>, %203, %cst_82 [2] : vector<4x8x8xf32> to vector<4x8xf32>
    %205 = vector.shape_cast %204 : vector<4x8xf32> to vector<4x8x1xf32>
    %206 = vector.broadcast %205 : vector<4x8x1xf32> to vector<4x8x8xf32>
    %207 = arith.subf %203, %206 : vector<4x8x8xf32>
    %208 = math.exp %207 : vector<4x8x8xf32>
    %cst_83 = arith.constant dense<0.000000e+00> : vector<4x8xf32>
    %209 = vector.multi_reduction <add>, %208, %cst_83 [2] : vector<4x8x8xf32> to vector<4x8xf32>
    %210 = vector.shape_cast %209 : vector<4x8xf32> to vector<4x8x1xf32>
    %211 = tpu.reciprocal %210 {approx = true} : vector<4x8x1xf32> -> vector<4x8x1xf32>
    %212 = vector.broadcast %211 : vector<4x8x1xf32> to vector<4x8x8xf32>
    %213 = arith.mulf %208, %212 : vector<4x8x8xf32>
    %214 = arith.truncf %213 : vector<4x8x8xf32> to vector<4x8x8xbf16>
    %215 = arith.truncf %196 : vector<4x8x16xf32> to vector<4x8x16xbf16>
    "tpu.trace_start"() <{level = 10 : i32, message = "bqk,bkd->bqd"}> : () -> ()
    %cst_84 = arith.constant dense<0.000000e+00> : vector<4x8x16xf32>
    %216 = tpu.matmul %214, %215, %cst_84 {dimension_numbers = #tpu.dot_dimension_numbers<[2], [1], [1], [2], [0, 0, 0, 1, 1, 2], [0], [0]>} : vector<4x8x8xbf16>, vector<4x8x16xbf16>, vector<4x8x16xf32> -> vector<4x8x16xf32>
    "tpu.trace_stop"() : () -> ()
    %217 = vector.extract_strided_slice %216 {offsets = [0, 0, 0], sizes = [2, 8, 16], strides = [1, 1, 1]} : vector<4x8x16xf32> to vector<2x8x16xf32>
    %218 = vector.shape_cast %217 : vector<2x8x16xf32> to vector<16x16xf32>
    %219 = vector.extract_strided_slice %216 {offsets = [2, 0, 0], sizes = [2, 8, 16], strides = [1, 1, 1]} : vector<4x8x16xf32> to vector<2x8x16xf32>
    %220 = vector.shape_cast %219 : vector<2x8x16xf32> to vector<16x16xf32>
    %221 = tpu.concatenate %218, %220 in 1 : vector<16x16xf32>, vector<16x16xf32> -> vector<16x32xf32>
    %c1_85 = arith.constant 1 : index
    %c0_86 = arith.constant 0 : index
    %c0_87 = arith.constant 0 : index
    %222 = vector.load %arg6[%c1_85, %c0_86, %c0_87] : memref<4x32x32xbf16, #tpu.memory_space<vmem>>, vector<1x32x32xbf16>
    %223 = vector.shape_cast %222 : vector<1x32x32xbf16> to vector<32x32xbf16>
    %224 = arith.truncf %221 : vector<16x32xf32> to vector<16x32xbf16>
    %cst_88 = arith.constant dense<0.000000e+00> : vector<16x32xf32>
    %225 = tpu.matmul %224, %223, %cst_88 {dimension_numbers = #tpu.dot_dimension_numbers<[1], [0], [0], [1], [0, 0, 1, 1], [], []>} : vector<16x32xbf16>, vector<32x32xbf16>, vector<16x32xf32> -> vector<16x32xf32>
    %c1_89 = arith.constant 1 : index
    %c0_90 = arith.constant 0 : index
    %c0_91 = arith.constant 0 : index
    %226 = vector.load %arg7[%c1_89, %c0_90, %c0_91] : memref<4x1x32xf32, #tpu.memory_space<vmem>>, vector<1x1x32xf32>
    %227 = vector.shape_cast %226 : vector<1x1x32xf32> to vector<1x32xf32>
    %228 = vector.broadcast %227 : vector<1x32xf32> to vector<16x32xf32>
    %229 = arith.addf %225, %228 : vector<16x32xf32>
    %230 = arith.addf %229, %170 : vector<16x32xf32>
    %c1_92 = arith.constant 1 : index
    %c0_93 = arith.constant 0 : index
    %c0_94 = arith.constant 0 : index
    %231 = vector.load %arg8[%c1_92, %c0_93, %c0_94] : memref<4x1x32xf32, #tpu.memory_space<vmem>>, vector<1x1x32xf32>
    %232 = vector.shape_cast %231 : vector<1x1x32xf32> to vector<1x32xf32>
    %c1_95 = arith.constant 1 : index
    %c0_96 = arith.constant 0 : index
    %c0_97 = arith.constant 0 : index
    %233 = vector.load %arg9[%c1_95, %c0_96, %c0_97] : memref<4x1x32xf32, #tpu.memory_space<vmem>>, vector<1x1x32xf32>
    %234 = vector.shape_cast %233 : vector<1x1x32xf32> to vector<1x32xf32>
    %cst_98 = arith.constant dense<0.000000e+00> : vector<16xf32>
    %235 = vector.multi_reduction <add>, %230, %cst_98 [1] : vector<16x32xf32> to vector<16xf32>
    %236 = vector.shape_cast %235 : vector<16xf32> to vector<16x1xf32>
    %cst_99 = arith.constant 3.200000e+01 : f32
    %237 = vector.broadcast %cst_99 : f32 to vector<16x1xf32>
    %238 = arith.divf %236, %237 : vector<16x1xf32>
    %239 = vector.broadcast %238 : vector<16x1xf32> to vector<16x32xf32>
    %240 = arith.subf %230, %239 : vector<16x32xf32>
    %241 = arith.mulf %240, %240 : vector<16x32xf32>
    %cst_100 = arith.constant dense<0.000000e+00> : vector<16xf32>
    %242 = vector.multi_reduction <add>, %241, %cst_100 [1] : vector<16x32xf32> to vector<16xf32>
    %243 = vector.shape_cast %242 : vector<16xf32> to vector<16x1xf32>
    %cst_101 = arith.constant 3.200000e+01 : f32
    %244 = vector.broadcast %cst_101 : f32 to vector<16x1xf32>
    %245 = arith.divf %243, %244 : vector<16x1xf32>
    %246 = vector.broadcast %238 : vector<16x1xf32> to vector<16x32xf32>
    %247 = arith.subf %230, %246 : vector<16x32xf32>
    %cst_102 = arith.constant 9.99999974E-6 : f32
    %248 = vector.broadcast %cst_102 : f32 to vector<16x1xf32>
    %249 = arith.addf %245, %248 : vector<16x1xf32>
    %250 = math.rsqrt %249 : vector<16x1xf32>
    %251 = vector.broadcast %250 : vector<16x1xf32> to vector<16x32xf32>
    %252 = arith.mulf %247, %251 : vector<16x32xf32>
    %253 = vector.broadcast %232 : vector<1x32xf32> to vector<16x32xf32>
    %254 = arith.mulf %252, %253 : vector<16x32xf32>
    %255 = vector.broadcast %234 : vector<1x32xf32> to vector<16x32xf32>
    %256 = arith.addf %254, %255 : vector<16x32xf32>
    %c1_103 = arith.constant 1 : index
    %c0_104 = arith.constant 0 : index
    %c0_105 = arith.constant 0 : index
    %257 = vector.load %arg10[%c1_103, %c0_104, %c0_105] : memref<4x32x64xbf16, #tpu.memory_space<vmem>>, vector<1x32x64xbf16>
    %258 = vector.shape_cast %257 : vector<1x32x64xbf16> to vector<32x64xbf16>
    %259 = arith.truncf %256 : vector<16x32xf32> to vector<16x32xbf16>
    %cst_106 = arith.constant dense<0.000000e+00> : vector<16x64xf32>
    %260 = tpu.matmul %259, %258, %cst_106 {dimension_numbers = #tpu.dot_dimension_numbers<[1], [0], [0], [1], [0, 0, 1, 1], [], []>} : vector<16x32xbf16>, vector<32x64xbf16>, vector<16x64xf32> -> vector<16x64xf32>
    %c1_107 = arith.constant 1 : index
    %c0_108 = arith.constant 0 : index
    %c0_109 = arith.constant 0 : index
    %261 = vector.load %arg11[%c1_107, %c0_108, %c0_109] : memref<4x1x64xf32, #tpu.memory_space<vmem>>, vector<1x1x64xf32>
    %262 = vector.shape_cast %261 : vector<1x1x64xf32> to vector<1x64xf32>
    %263 = vector.broadcast %262 : vector<1x64xf32> to vector<16x64xf32>
    %264 = arith.addf %260, %263 : vector<16x64xf32>
    %cst_110 = arith.constant 5.000000e-01 : f32
    %265 = vector.broadcast %cst_110 : f32 to vector<16x64xf32>
    %266 = arith.mulf %265, %264 : vector<16x64xf32>
    %cst_111 = arith.constant 4.471500e-02 : f32
    %267 = vector.broadcast %cst_111 : f32 to vector<16x64xf32>
    %268 = arith.mulf %267, %264 : vector<16x64xf32>
    %269 = arith.mulf %268, %264 : vector<16x64xf32>
    %270 = arith.mulf %269, %264 : vector<16x64xf32>
    %271 = arith.addf %264, %270 : vector<16x64xf32>
    %cst_112 = arith.constant 0.797884583 : f32
    %272 = vector.broadcast %cst_112 : f32 to vector<16x64xf32>
    %273 = arith.mulf %272, %271 : vector<16x64xf32>
    %274 = math.tanh %273 : vector<16x64xf32>
    %cst_113 = arith.constant 1.000000e+00 : f32
    %275 = vector.broadcast %cst_113 : f32 to vector<16x64xf32>
    %276 = arith.addf %275, %274 : vector<16x64xf32>
    %277 = arith.mulf %266, %276 : vector<16x64xf32>
    %c1_114 = arith.constant 1 : index
    %c0_115 = arith.constant 0 : index
    %c0_116 = arith.constant 0 : index
    %278 = vector.load %arg12[%c1_114, %c0_115, %c0_116] : memref<4x64x32xbf16, #tpu.memory_space<vmem>>, vector<1x64x32xbf16>
    %279 = vector.shape_cast %278 : vector<1x64x32xbf16> to vector<64x32xbf16>
    %280 = arith.truncf %277 : vector<16x64xf32> to vector<16x64xbf16>
    %cst_117 = arith.constant dense<0.000000e+00> : vector<16x32xf32>
    %281 = tpu.matmul %280, %279, %cst_117 {dimension_numbers = #tpu.dot_dimension_numbers<[1], [0], [0], [1], [0, 0, 1, 1], [], []>} : vector<16x64xbf16>, vector<64x32xbf16>, vector<16x32xf32> -> vector<16x32xf32>
    %c1_118 = arith.constant 1 : index
    %c0_119 = arith.constant 0 : index
    %c0_120 = arith.constant 0 : index
    %282 = vector.load %arg13[%c1_118, %c0_119, %c0_120] : memref<4x1x32xf32, #tpu.memory_space<vmem>>, vector<1x1x32xf32>
    %283 = vector.shape_cast %282 : vector<1x1x32xf32> to vector<1x32xf32>
    %284 = vector.broadcast %283 : vector<1x32xf32> to vector<16x32xf32>
    %285 = arith.addf %281, %284 : vector<16x32xf32>
    %286 = arith.addf %285, %256 : vector<16x32xf32>
    %c1_121 = arith.constant 1 : index
    %c0_122 = arith.constant 0 : index
    %c0_123 = arith.constant 0 : index
    %287 = vector.load %arg14[%c1_121, %c0_122, %c0_123] : memref<4x1x32xf32, #tpu.memory_space<vmem>>, vector<1x1x32xf32>
    %288 = vector.shape_cast %287 : vector<1x1x32xf32> to vector<1x32xf32>
    %c1_124 = arith.constant 1 : index
    %c0_125 = arith.constant 0 : index
    %c0_126 = arith.constant 0 : index
    %289 = vector.load %arg15[%c1_124, %c0_125, %c0_126] : memref<4x1x32xf32, #tpu.memory_space<vmem>>, vector<1x1x32xf32>
    %290 = vector.shape_cast %289 : vector<1x1x32xf32> to vector<1x32xf32>
    %cst_127 = arith.constant dense<0.000000e+00> : vector<16xf32>
    %291 = vector.multi_reduction <add>, %286, %cst_127 [1] : vector<16x32xf32> to vector<16xf32>
    %292 = vector.shape_cast %291 : vector<16xf32> to vector<16x1xf32>
    %cst_128 = arith.constant 3.200000e+01 : f32
    %293 = vector.broadcast %cst_128 : f32 to vector<16x1xf32>
    %294 = arith.divf %292, %293 : vector<16x1xf32>
    %295 = vector.broadcast %294 : vector<16x1xf32> to vector<16x32xf32>
    %296 = arith.subf %286, %295 : vector<16x32xf32>
    %297 = arith.mulf %296, %296 : vector<16x32xf32>
    %cst_129 = arith.constant dense<0.000000e+00> : vector<16xf32>
    %298 = vector.multi_reduction <add>, %297, %cst_129 [1] : vector<16x32xf32> to vector<16xf32>
    %299 = vector.shape_cast %298 : vector<16xf32> to vector<16x1xf32>
    %cst_130 = arith.constant 3.200000e+01 : f32
    %300 = vector.broadcast %cst_130 : f32 to vector<16x1xf32>
    %301 = arith.divf %299, %300 : vector<16x1xf32>
    %302 = vector.broadcast %294 : vector<16x1xf32> to vector<16x32xf32>
    %303 = arith.subf %286, %302 : vector<16x32xf32>
    %cst_131 = arith.constant 9.99999974E-6 : f32
    %304 = vector.broadcast %cst_131 : f32 to vector<16x1xf32>
    %305 = arith.addf %301, %304 : vector<16x1xf32>
    %306 = math.rsqrt %305 : vector<16x1xf32>
    %307 = vector.broadcast %306 : vector<16x1xf32> to vector<16x32xf32>
    %308 = arith.mulf %303, %307 : vector<16x32xf32>
    %309 = vector.broadcast %288 : vector<1x32xf32> to vector<16x32xf32>
    %310 = arith.mulf %308, %309 : vector<16x32xf32>
    %311 = vector.broadcast %290 : vector<1x32xf32> to vector<16x32xf32>
    %312 = arith.addf %310, %311 : vector<16x32xf32>
    %c2 = arith.constant 2 : index
    %c0_132 = arith.constant 0 : index
    %c0_133 = arith.constant 0 : index
    %313 = vector.load %arg4[%c2, %c0_132, %c0_133] : memref<4x32x96xbf16, #tpu.memory_space<vmem>>, vector<1x32x96xbf16>
    %314 = vector.shape_cast %313 : vector<1x32x96xbf16> to vector<32x96xbf16>
    %315 = arith.truncf %312 : vector<16x32xf32> to vector<16x32xbf16>
    %cst_134 = arith.constant dense<0.000000e+00> : vector<16x96xf32>
    %316 = tpu.matmul %315, %314, %cst_134 {dimension_numbers = #tpu.dot_dimension_numbers<[1], [0], [0], [1], [0, 0, 1, 1], [], []>} : vector<16x32xbf16>, vector<32x96xbf16>, vector<16x96xf32> -> vector<16x96xf32>
    %c2_135 = arith.constant 2 : index
    %c0_136 = arith.constant 0 : index
    %c0_137 = arith.constant 0 : index
    %317 = vector.load %arg5[%c2_135, %c0_136, %c0_137] : memref<4x1x96xf32, #tpu.memory_space<vmem>>, vector<1x1x96xf32>
    %318 = vector.shape_cast %317 : vector<1x1x96xf32> to vector<1x96xf32>
    %319 = vector.broadcast %318 : vector<1x96xf32> to vector<16x96xf32>
    %320 = arith.addf %316, %319 : vector<16x96xf32>
    %321 = vector.extract_strided_slice %320 {offsets = [0, 0], sizes = [16, 16], strides = [1, 1]} : vector<16x96xf32> to vector<16x16xf32>
    %322 = vector.shape_cast %321 : vector<16x16xf32> to vector<1x2x8x16xf32>
    %323 = vector.extract_strided_slice %320 {offsets = [0, 16], sizes = [16, 16], strides = [1, 1]} : vector<16x96xf32> to vector<16x16xf32>
    %324 = vector.shape_cast %323 : vector<16x16xf32> to vector<1x2x8x16xf32>
    %325 = tpu.concatenate %322, %324 in 0 : vector<1x2x8x16xf32>, vector<1x2x8x16xf32> -> vector<2x2x8x16xf32>
    %326 = vector.shape_cast %325 : vector<2x2x8x16xf32> to vector<4x8x16xf32>
    %327 = vector.extract_strided_slice %320 {offsets = [0, 32], sizes = [16, 16], strides = [1, 1]} : vector<16x96xf32> to vector<16x16xf32>
    %328 = vector.shape_cast %327 : vector<16x16xf32> to vector<1x2x8x16xf32>
    %329 = vector.extract_strided_slice %320 {offsets = [0, 48], sizes = [16, 16], strides = [1, 1]} : vector<16x96xf32> to vector<16x16xf32>
    %330 = vector.shape_cast %329 : vector<16x16xf32> to vector<1x2x8x16xf32>
    %331 = tpu.concatenate %328, %330 in 0 : vector<1x2x8x16xf32>, vector<1x2x8x16xf32> -> vector<2x2x8x16xf32>
    %332 = vector.shape_cast %331 : vector<2x2x8x16xf32> to vector<4x8x16xf32>
    %333 = vector.extract_strided_slice %320 {offsets = [0, 64], sizes = [16, 16], strides = [1, 1]} : vector<16x96xf32> to vector<16x16xf32>
    %334 = vector.shape_cast %333 : vector<16x16xf32> to vector<1x2x8x16xf32>
    %335 = vector.extract_strided_slice %320 {offsets = [0, 80], sizes = [16, 16], strides = [1, 1]} : vector<16x96xf32> to vector<16x16xf32>
    %336 = vector.shape_cast %335 : vector<16x16xf32> to vector<1x2x8x16xf32>
    %337 = tpu.concatenate %334, %336 in 0 : vector<1x2x8x16xf32>, vector<1x2x8x16xf32> -> vector<2x2x8x16xf32>
    %338 = vector.shape_cast %337 : vector<2x2x8x16xf32> to vector<4x8x16xf32>
    %339 = arith.truncf %326 : vector<4x8x16xf32> to vector<4x8x16xbf16>
    %340 = arith.truncf %332 : vector<4x8x16xf32> to vector<4x8x16xbf16>
    "tpu.trace_start"() <{level = 10 : i32, message = "bqd,bkd->bqk"}> : () -> ()
    %cst_138 = arith.constant dense<0.000000e+00> : vector<4x8x8xf32>
    %341 = tpu.matmul %339, %340, %cst_138 {dimension_numbers = #tpu.dot_dimension_numbers<[2], [2], [1], [1], [0, 0, 0, 1, 1, 1], [0], [0]>} : vector<4x8x16xbf16>, vector<4x8x16xbf16>, vector<4x8x8xf32> -> vector<4x8x8xf32>
    "tpu.trace_stop"() : () -> ()
    %cst_139 = arith.constant 2.500000e-01 : f32
    %342 = vector.broadcast %cst_139 : f32 to vector<4x8x8xf32>
    %343 = arith.mulf %341, %342 : vector<4x8x8xf32>
    %344 = vector.broadcast %25 : vector<4x1x8xf32> to vector<4x8x8xf32>
    %345 = arith.addf %343, %344 : vector<4x8x8xf32>
    %cst_140 = arith.constant dense<0xFF800000> : vector<4x8xf32>
    %346 = vector.multi_reduction <maximumf>, %345, %cst_140 [2] : vector<4x8x8xf32> to vector<4x8xf32>
    %347 = vector.shape_cast %346 : vector<4x8xf32> to vector<4x8x1xf32>
    %348 = vector.broadcast %347 : vector<4x8x1xf32> to vector<4x8x8xf32>
    %349 = arith.subf %345, %348 : vector<4x8x8xf32>
    %350 = math.exp %349 : vector<4x8x8xf32>
    %cst_141 = arith.constant dense<0.000000e+00> : vector<4x8xf32>
    %351 = vector.multi_reduction <add>, %350, %cst_141 [2] : vector<4x8x8xf32> to vector<4x8xf32>
    %352 = vector.shape_cast %351 : vector<4x8xf32> to vector<4x8x1xf32>
    %353 = tpu.reciprocal %352 {approx = true} : vector<4x8x1xf32> -> vector<4x8x1xf32>
    %354 = vector.broadcast %353 : vector<4x8x1xf32> to vector<4x8x8xf32>
    %355 = arith.mulf %350, %354 : vector<4x8x8xf32>
    %356 = arith.truncf %355 : vector<4x8x8xf32> to vector<4x8x8xbf16>
    %357 = arith.truncf %338 : vector<4x8x16xf32> to vector<4x8x16xbf16>
    "tpu.trace_start"() <{level = 10 : i32, message = "bqk,bkd->bqd"}> : () -> ()
    %cst_142 = arith.constant dense<0.000000e+00> : vector<4x8x16xf32>
    %358 = tpu.matmul %356, %357, %cst_142 {dimension_numbers = #tpu.dot_dimension_numbers<[2], [1], [1], [2], [0, 0, 0, 1, 1, 2], [0], [0]>} : vector<4x8x8xbf16>, vector<4x8x16xbf16>, vector<4x8x16xf32> -> vector<4x8x16xf32>
    "tpu.trace_stop"() : () -> ()
    %359 = vector.extract_strided_slice %358 {offsets = [0, 0, 0], sizes = [2, 8, 16], strides = [1, 1, 1]} : vector<4x8x16xf32> to vector<2x8x16xf32>
    %360 = vector.shape_cast %359 : vector<2x8x16xf32> to vector<16x16xf32>
    %361 = vector.extract_strided_slice %358 {offsets = [2, 0, 0], sizes = [2, 8, 16], strides = [1, 1, 1]} : vector<4x8x16xf32> to vector<2x8x16xf32>
    %362 = vector.shape_cast %361 : vector<2x8x16xf32> to vector<16x16xf32>
    %363 = tpu.concatenate %360, %362 in 1 : vector<16x16xf32>, vector<16x16xf32> -> vector<16x32xf32>
    %c2_143 = arith.constant 2 : index
    %c0_144 = arith.constant 0 : index
    %c0_145 = arith.constant 0 : index
    %364 = vector.load %arg6[%c2_143, %c0_144, %c0_145] : memref<4x32x32xbf16, #tpu.memory_space<vmem>>, vector<1x32x32xbf16>
    %365 = vector.shape_cast %364 : vector<1x32x32xbf16> to vector<32x32xbf16>
    %366 = arith.truncf %363 : vector<16x32xf32> to vector<16x32xbf16>
    %cst_146 = arith.constant dense<0.000000e+00> : vector<16x32xf32>
    %367 = tpu.matmul %366, %365, %cst_146 {dimension_numbers = #tpu.dot_dimension_numbers<[1], [0], [0], [1], [0, 0, 1, 1], [], []>} : vector<16x32xbf16>, vector<32x32xbf16>, vector<16x32xf32> -> vector<16x32xf32>
    %c2_147 = arith.constant 2 : index
    %c0_148 = arith.constant 0 : index
    %c0_149 = arith.constant 0 : index
    %368 = vector.load %arg7[%c2_147, %c0_148, %c0_149] : memref<4x1x32xf32, #tpu.memory_space<vmem>>, vector<1x1x32xf32>
    %369 = vector.shape_cast %368 : vector<1x1x32xf32> to vector<1x32xf32>
    %370 = vector.broadcast %369 : vector<1x32xf32> to vector<16x32xf32>
    %371 = arith.addf %367, %370 : vector<16x32xf32>
    %372 = arith.addf %371, %312 : vector<16x32xf32>
    %c2_150 = arith.constant 2 : index
    %c0_151 = arith.constant 0 : index
    %c0_152 = arith.constant 0 : index
    %373 = vector.load %arg8[%c2_150, %c0_151, %c0_152] : memref<4x1x32xf32, #tpu.memory_space<vmem>>, vector<1x1x32xf32>
    %374 = vector.shape_cast %373 : vector<1x1x32xf32> to vector<1x32xf32>
    %c2_153 = arith.constant 2 : index
    %c0_154 = arith.constant 0 : index
    %c0_155 = arith.constant 0 : index
    %375 = vector.load %arg9[%c2_153, %c0_154, %c0_155] : memref<4x1x32xf32, #tpu.memory_space<vmem>>, vector<1x1x32xf32>
    %376 = vector.shape_cast %375 : vector<1x1x32xf32> to vector<1x32xf32>
    %cst_156 = arith.constant dense<0.000000e+00> : vector<16xf32>
    %377 = vector.multi_reduction <add>, %372, %cst_156 [1] : vector<16x32xf32> to vector<16xf32>
    %378 = vector.shape_cast %377 : vector<16xf32> to vector<16x1xf32>
    %cst_157 = arith.constant 3.200000e+01 : f32
    %379 = vector.broadcast %cst_157 : f32 to vector<16x1xf32>
    %380 = arith.divf %378, %379 : vector<16x1xf32>
    %381 = vector.broadcast %380 : vector<16x1xf32> to vector<16x32xf32>
    %382 = arith.subf %372, %381 : vector<16x32xf32>
    %383 = arith.mulf %382, %382 : vector<16x32xf32>
    %cst_158 = arith.constant dense<0.000000e+00> : vector<16xf32>
    %384 = vector.multi_reduction <add>, %383, %cst_158 [1] : vector<16x32xf32> to vector<16xf32>
    %385 = vector.shape_cast %384 : vector<16xf32> to vector<16x1xf32>
    %cst_159 = arith.constant 3.200000e+01 : f32
    %386 = vector.broadcast %cst_159 : f32 to vector<16x1xf32>
    %387 = arith.divf %385, %386 : vector<16x1xf32>
    %388 = vector.broadcast %380 : vector<16x1xf32> to vector<16x32xf32>
    %389 = arith.subf %372, %388 : vector<16x32xf32>
    %cst_160 = arith.constant 9.99999974E-6 : f32
    %390 = vector.broadcast %cst_160 : f32 to vector<16x1xf32>
    %391 = arith.addf %387, %390 : vector<16x1xf32>
    %392 = math.rsqrt %391 : vector<16x1xf32>
    %393 = vector.broadcast %392 : vector<16x1xf32> to vector<16x32xf32>
    %394 = arith.mulf %389, %393 : vector<16x32xf32>
    %395 = vector.broadcast %374 : vector<1x32xf32> to vector<16x32xf32>
    %396 = arith.mulf %394, %395 : vector<16x32xf32>
    %397 = vector.broadcast %376 : vector<1x32xf32> to vector<16x32xf32>
    %398 = arith.addf %396, %397 : vector<16x32xf32>
    %c2_161 = arith.constant 2 : index
    %c0_162 = arith.constant 0 : index
    %c0_163 = arith.constant 0 : index
    %399 = vector.load %arg10[%c2_161, %c0_162, %c0_163] : memref<4x32x64xbf16, #tpu.memory_space<vmem>>, vector<1x32x64xbf16>
    %400 = vector.shape_cast %399 : vector<1x32x64xbf16> to vector<32x64xbf16>
    %401 = arith.truncf %398 : vector<16x32xf32> to vector<16x32xbf16>
    %cst_164 = arith.constant dense<0.000000e+00> : vector<16x64xf32>
    %402 = tpu.matmul %401, %400, %cst_164 {dimension_numbers = #tpu.dot_dimension_numbers<[1], [0], [0], [1], [0, 0, 1, 1], [], []>} : vector<16x32xbf16>, vector<32x64xbf16>, vector<16x64xf32> -> vector<16x64xf32>
    %c2_165 = arith.constant 2 : index
    %c0_166 = arith.constant 0 : index
    %c0_167 = arith.constant 0 : index
    %403 = vector.load %arg11[%c2_165, %c0_166, %c0_167] : memref<4x1x64xf32, #tpu.memory_space<vmem>>, vector<1x1x64xf32>
    %404 = vector.shape_cast %403 : vector<1x1x64xf32> to vector<1x64xf32>
    %405 = vector.broadcast %404 : vector<1x64xf32> to vector<16x64xf32>
    %406 = arith.addf %402, %405 : vector<16x64xf32>
    %cst_168 = arith.constant 5.000000e-01 : f32
    %407 = vector.broadcast %cst_168 : f32 to vector<16x64xf32>
    %408 = arith.mulf %407, %406 : vector<16x64xf32>
    %cst_169 = arith.constant 4.471500e-02 : f32
    %409 = vector.broadcast %cst_169 : f32 to vector<16x64xf32>
    %410 = arith.mulf %409, %406 : vector<16x64xf32>
    %411 = arith.mulf %410, %406 : vector<16x64xf32>
    %412 = arith.mulf %411, %406 : vector<16x64xf32>
    %413 = arith.addf %406, %412 : vector<16x64xf32>
    %cst_170 = arith.constant 0.797884583 : f32
    %414 = vector.broadcast %cst_170 : f32 to vector<16x64xf32>
    %415 = arith.mulf %414, %413 : vector<16x64xf32>
    %416 = math.tanh %415 : vector<16x64xf32>
    %cst_171 = arith.constant 1.000000e+00 : f32
    %417 = vector.broadcast %cst_171 : f32 to vector<16x64xf32>
    %418 = arith.addf %417, %416 : vector<16x64xf32>
    %419 = arith.mulf %408, %418 : vector<16x64xf32>
    %c2_172 = arith.constant 2 : index
    %c0_173 = arith.constant 0 : index
    %c0_174 = arith.constant 0 : index
    %420 = vector.load %arg12[%c2_172, %c0_173, %c0_174] : memref<4x64x32xbf16, #tpu.memory_space<vmem>>, vector<1x64x32xbf16>
    %421 = vector.shape_cast %420 : vector<1x64x32xbf16> to vector<64x32xbf16>
    %422 = arith.truncf %419 : vector<16x64xf32> to vector<16x64xbf16>
    %cst_175 = arith.constant dense<0.000000e+00> : vector<16x32xf32>
    %423 = tpu.matmul %422, %421, %cst_175 {dimension_numbers = #tpu.dot_dimension_numbers<[1], [0], [0], [1], [0, 0, 1, 1], [], []>} : vector<16x64xbf16>, vector<64x32xbf16>, vector<16x32xf32> -> vector<16x32xf32>
    %c2_176 = arith.constant 2 : index
    %c0_177 = arith.constant 0 : index
    %c0_178 = arith.constant 0 : index
    %424 = vector.load %arg13[%c2_176, %c0_177, %c0_178] : memref<4x1x32xf32, #tpu.memory_space<vmem>>, vector<1x1x32xf32>
    %425 = vector.shape_cast %424 : vector<1x1x32xf32> to vector<1x32xf32>
    %426 = vector.broadcast %425 : vector<1x32xf32> to vector<16x32xf32>
    %427 = arith.addf %423, %426 : vector<16x32xf32>
    %428 = arith.addf %427, %398 : vector<16x32xf32>
    %c2_179 = arith.constant 2 : index
    %c0_180 = arith.constant 0 : index
    %c0_181 = arith.constant 0 : index
    %429 = vector.load %arg14[%c2_179, %c0_180, %c0_181] : memref<4x1x32xf32, #tpu.memory_space<vmem>>, vector<1x1x32xf32>
    %430 = vector.shape_cast %429 : vector<1x1x32xf32> to vector<1x32xf32>
    %c2_182 = arith.constant 2 : index
    %c0_183 = arith.constant 0 : index
    %c0_184 = arith.constant 0 : index
    %431 = vector.load %arg15[%c2_182, %c0_183, %c0_184] : memref<4x1x32xf32, #tpu.memory_space<vmem>>, vector<1x1x32xf32>
    %432 = vector.shape_cast %431 : vector<1x1x32xf32> to vector<1x32xf32>
    %cst_185 = arith.constant dense<0.000000e+00> : vector<16xf32>
    %433 = vector.multi_reduction <add>, %428, %cst_185 [1] : vector<16x32xf32> to vector<16xf32>
    %434 = vector.shape_cast %433 : vector<16xf32> to vector<16x1xf32>
    %cst_186 = arith.constant 3.200000e+01 : f32
    %435 = vector.broadcast %cst_186 : f32 to vector<16x1xf32>
    %436 = arith.divf %434, %435 : vector<16x1xf32>
    %437 = vector.broadcast %436 : vector<16x1xf32> to vector<16x32xf32>
    %438 = arith.subf %428, %437 : vector<16x32xf32>
    %439 = arith.mulf %438, %438 : vector<16x32xf32>
    %cst_187 = arith.constant dense<0.000000e+00> : vector<16xf32>
    %440 = vector.multi_reduction <add>, %439, %cst_187 [1] : vector<16x32xf32> to vector<16xf32>
    %441 = vector.shape_cast %440 : vector<16xf32> to vector<16x1xf32>
    %cst_188 = arith.constant 3.200000e+01 : f32
    %442 = vector.broadcast %cst_188 : f32 to vector<16x1xf32>
    %443 = arith.divf %441, %442 : vector<16x1xf32>
    %444 = vector.broadcast %436 : vector<16x1xf32> to vector<16x32xf32>
    %445 = arith.subf %428, %444 : vector<16x32xf32>
    %cst_189 = arith.constant 9.99999974E-6 : f32
    %446 = vector.broadcast %cst_189 : f32 to vector<16x1xf32>
    %447 = arith.addf %443, %446 : vector<16x1xf32>
    %448 = math.rsqrt %447 : vector<16x1xf32>
    %449 = vector.broadcast %448 : vector<16x1xf32> to vector<16x32xf32>
    %450 = arith.mulf %445, %449 : vector<16x32xf32>
    %451 = vector.broadcast %430 : vector<1x32xf32> to vector<16x32xf32>
    %452 = arith.mulf %450, %451 : vector<16x32xf32>
    %453 = vector.broadcast %432 : vector<1x32xf32> to vector<16x32xf32>
    %454 = arith.addf %452, %453 : vector<16x32xf32>
    %c0_190 = arith.constant 0 : index
    %c0_191 = arith.constant 0 : index
    %455 = vector.load %arg17[%c0_190, %c0_191] : memref<32x16xbf16, #tpu.memory_space<vmem>>, vector<32x16xbf16>
    %456 = arith.truncf %454 : vector<16x32xf32> to vector<16x32xbf16>
    %cst_192 = arith.constant dense<0.000000e+00> : vector<16x16xf32>
    %457 = tpu.matmul %456, %455, %cst_192 {dimension_numbers = #tpu.dot_dimension_numbers<[1], [0], [0], [1], [0, 0, 1, 1], [], []>} : vector<16x32xbf16>, vector<32x16xbf16>, vector<16x16xf32> -> vector<16x16xf32>
    %c0_193 = arith.constant 0 : index
    %c0_194 = arith.constant 0 : index
    %458 = vector.load %arg18[%c0_193, %c0_194] : memref<1x16xf32, #tpu.memory_space<vmem>>, vector<1x16xf32>
    %459 = vector.broadcast %458 : vector<1x16xf32> to vector<16x16xf32>
    %460 = arith.addf %457, %459 : vector<16x16xf32>
    %c0_195 = arith.constant 0 : index
    %c0_196 = arith.constant 0 : index
    %461 = vector.load %arg19[%c0_195, %c0_196] : memref<16x32xbf16, #tpu.memory_space<vmem>>, vector<16x32xbf16>
    %462 = arith.truncf %460 : vector<16x16xf32> to vector<16x16xbf16>
    %cst_197 = arith.constant dense<0.000000e+00> : vector<16x32xf32>
    %463 = tpu.matmul %462, %461, %cst_197 {dimension_numbers = #tpu.dot_dimension_numbers<[1], [0], [0], [1], [0, 0, 1, 1], [], []>} : vector<16x16xbf16>, vector<16x32xbf16>, vector<16x32xf32> -> vector<16x32xf32>
    %c0_198 = arith.constant 0 : index
    %c0_199 = arith.constant 0 : index
    %464 = vector.load %arg20[%c0_198, %c0_199] : memref<1x32xf32, #tpu.memory_space<vmem>>, vector<1x32xf32>
    %465 = vector.broadcast %464 : vector<1x32xf32> to vector<16x32xf32>
    %466 = arith.addf %463, %465 : vector<16x32xf32>
    %c3 = arith.constant 3 : index
    %c0_200 = arith.constant 0 : index
    %c0_201 = arith.constant 0 : index
    %467 = vector.load %arg4[%c3, %c0_200, %c0_201] : memref<4x32x96xbf16, #tpu.memory_space<vmem>>, vector<1x32x96xbf16>
    %468 = vector.shape_cast %467 : vector<1x32x96xbf16> to vector<32x96xbf16>
    %469 = arith.truncf %466 : vector<16x32xf32> to vector<16x32xbf16>
    %cst_202 = arith.constant dense<0.000000e+00> : vector<16x96xf32>
    %470 = tpu.matmul %469, %468, %cst_202 {dimension_numbers = #tpu.dot_dimension_numbers<[1], [0], [0], [1], [0, 0, 1, 1], [], []>} : vector<16x32xbf16>, vector<32x96xbf16>, vector<16x96xf32> -> vector<16x96xf32>
    %c3_203 = arith.constant 3 : index
    %c0_204 = arith.constant 0 : index
    %c0_205 = arith.constant 0 : index
    %471 = vector.load %arg5[%c3_203, %c0_204, %c0_205] : memref<4x1x96xf32, #tpu.memory_space<vmem>>, vector<1x1x96xf32>
    %472 = vector.shape_cast %471 : vector<1x1x96xf32> to vector<1x96xf32>
    %473 = vector.broadcast %472 : vector<1x96xf32> to vector<16x96xf32>
    %474 = arith.addf %470, %473 : vector<16x96xf32>
    %475 = vector.extract_strided_slice %474 {offsets = [0, 0], sizes = [16, 16], strides = [1, 1]} : vector<16x96xf32> to vector<16x16xf32>
    %476 = vector.shape_cast %475 : vector<16x16xf32> to vector<1x2x8x16xf32>
    %477 = vector.extract_strided_slice %474 {offsets = [0, 16], sizes = [16, 16], strides = [1, 1]} : vector<16x96xf32> to vector<16x16xf32>
    %478 = vector.shape_cast %477 : vector<16x16xf32> to vector<1x2x8x16xf32>
    %479 = tpu.concatenate %476, %478 in 0 : vector<1x2x8x16xf32>, vector<1x2x8x16xf32> -> vector<2x2x8x16xf32>
    %480 = vector.shape_cast %479 : vector<2x2x8x16xf32> to vector<4x8x16xf32>
    %481 = vector.extract_strided_slice %474 {offsets = [0, 32], sizes = [16, 16], strides = [1, 1]} : vector<16x96xf32> to vector<16x16xf32>
    %482 = vector.shape_cast %481 : vector<16x16xf32> to vector<1x2x8x16xf32>
    %483 = vector.extract_strided_slice %474 {offsets = [0, 48], sizes = [16, 16], strides = [1, 1]} : vector<16x96xf32> to vector<16x16xf32>
    %484 = vector.shape_cast %483 : vector<16x16xf32> to vector<1x2x8x16xf32>
    %485 = tpu.concatenate %482, %484 in 0 : vector<1x2x8x16xf32>, vector<1x2x8x16xf32> -> vector<2x2x8x16xf32>
    %486 = vector.shape_cast %485 : vector<2x2x8x16xf32> to vector<4x8x16xf32>
    %487 = vector.extract_strided_slice %474 {offsets = [0, 64], sizes = [16, 16], strides = [1, 1]} : vector<16x96xf32> to vector<16x16xf32>
    %488 = vector.shape_cast %487 : vector<16x16xf32> to vector<1x2x8x16xf32>
    %489 = vector.extract_strided_slice %474 {offsets = [0, 80], sizes = [16, 16], strides = [1, 1]} : vector<16x96xf32> to vector<16x16xf32>
    %490 = vector.shape_cast %489 : vector<16x16xf32> to vector<1x2x8x16xf32>
    %491 = tpu.concatenate %488, %490 in 0 : vector<1x2x8x16xf32>, vector<1x2x8x16xf32> -> vector<2x2x8x16xf32>
    %492 = vector.shape_cast %491 : vector<2x2x8x16xf32> to vector<4x8x16xf32>
    %493 = arith.truncf %480 : vector<4x8x16xf32> to vector<4x8x16xbf16>
    %494 = arith.truncf %486 : vector<4x8x16xf32> to vector<4x8x16xbf16>
    "tpu.trace_start"() <{level = 10 : i32, message = "bqd,bkd->bqk"}> : () -> ()
    %cst_206 = arith.constant dense<0.000000e+00> : vector<4x8x8xf32>
    %495 = tpu.matmul %493, %494, %cst_206 {dimension_numbers = #tpu.dot_dimension_numbers<[2], [2], [1], [1], [0, 0, 0, 1, 1, 1], [0], [0]>} : vector<4x8x16xbf16>, vector<4x8x16xbf16>, vector<4x8x8xf32> -> vector<4x8x8xf32>
    "tpu.trace_stop"() : () -> ()
    %cst_207 = arith.constant 2.500000e-01 : f32
    %496 = vector.broadcast %cst_207 : f32 to vector<4x8x8xf32>
    %497 = arith.mulf %495, %496 : vector<4x8x8xf32>
    %498 = vector.broadcast %25 : vector<4x1x8xf32> to vector<4x8x8xf32>
    %499 = arith.addf %497, %498 : vector<4x8x8xf32>
    %cst_208 = arith.constant dense<0xFF800000> : vector<4x8xf32>
    %500 = vector.multi_reduction <maximumf>, %499, %cst_208 [2] : vector<4x8x8xf32> to vector<4x8xf32>
    %501 = vector.shape_cast %500 : vector<4x8xf32> to vector<4x8x1xf32>
    %502 = vector.broadcast %501 : vector<4x8x1xf32> to vector<4x8x8xf32>
    %503 = arith.subf %499, %502 : vector<4x8x8xf32>
    %504 = math.exp %503 : vector<4x8x8xf32>
    %cst_209 = arith.constant dense<0.000000e+00> : vector<4x8xf32>
    %505 = vector.multi_reduction <add>, %504, %cst_209 [2] : vector<4x8x8xf32> to vector<4x8xf32>
    %506 = vector.shape_cast %505 : vector<4x8xf32> to vector<4x8x1xf32>
    %507 = tpu.reciprocal %506 {approx = true} : vector<4x8x1xf32> -> vector<4x8x1xf32>
    %508 = vector.broadcast %507 : vector<4x8x1xf32> to vector<4x8x8xf32>
    %509 = arith.mulf %504, %508 : vector<4x8x8xf32>
    %510 = arith.truncf %509 : vector<4x8x8xf32> to vector<4x8x8xbf16>
    %511 = arith.truncf %492 : vector<4x8x16xf32> to vector<4x8x16xbf16>
    "tpu.trace_start"() <{level = 10 : i32, message = "bqk,bkd->bqd"}> : () -> ()
    %cst_210 = arith.constant dense<0.000000e+00> : vector<4x8x16xf32>
    %512 = tpu.matmul %510, %511, %cst_210 {dimension_numbers = #tpu.dot_dimension_numbers<[2], [1], [1], [2], [0, 0, 0, 1, 1, 2], [0], [0]>} : vector<4x8x8xbf16>, vector<4x8x16xbf16>, vector<4x8x16xf32> -> vector<4x8x16xf32>
    "tpu.trace_stop"() : () -> ()
    %513 = vector.extract_strided_slice %512 {offsets = [0, 0, 0], sizes = [2, 8, 16], strides = [1, 1, 1]} : vector<4x8x16xf32> to vector<2x8x16xf32>
    %514 = vector.shape_cast %513 : vector<2x8x16xf32> to vector<16x16xf32>
    %515 = vector.extract_strided_slice %512 {offsets = [2, 0, 0], sizes = [2, 8, 16], strides = [1, 1, 1]} : vector<4x8x16xf32> to vector<2x8x16xf32>
    %516 = vector.shape_cast %515 : vector<2x8x16xf32> to vector<16x16xf32>
    %517 = tpu.concatenate %514, %516 in 1 : vector<16x16xf32>, vector<16x16xf32> -> vector<16x32xf32>
    %c3_211 = arith.constant 3 : index
    %c0_212 = arith.constant 0 : index
    %c0_213 = arith.constant 0 : index
    %518 = vector.load %arg6[%c3_211, %c0_212, %c0_213] : memref<4x32x32xbf16, #tpu.memory_space<vmem>>, vector<1x32x32xbf16>
    %519 = vector.shape_cast %518 : vector<1x32x32xbf16> to vector<32x32xbf16>
    %520 = arith.truncf %517 : vector<16x32xf32> to vector<16x32xbf16>
    %cst_214 = arith.constant dense<0.000000e+00> : vector<16x32xf32>
    %521 = tpu.matmul %520, %519, %cst_214 {dimension_numbers = #tpu.dot_dimension_numbers<[1], [0], [0], [1], [0, 0, 1, 1], [], []>} : vector<16x32xbf16>, vector<32x32xbf16>, vector<16x32xf32> -> vector<16x32xf32>
    %c3_215 = arith.constant 3 : index
    %c0_216 = arith.constant 0 : index
    %c0_217 = arith.constant 0 : index
    %522 = vector.load %arg7[%c3_215, %c0_216, %c0_217] : memref<4x1x32xf32, #tpu.memory_space<vmem>>, vector<1x1x32xf32>
    %523 = vector.shape_cast %522 : vector<1x1x32xf32> to vector<1x32xf32>
    %524 = vector.broadcast %523 : vector<1x32xf32> to vector<16x32xf32>
    %525 = arith.addf %521, %524 : vector<16x32xf32>
    %526 = arith.addf %525, %466 : vector<16x32xf32>
    %c3_218 = arith.constant 3 : index
    %c0_219 = arith.constant 0 : index
    %c0_220 = arith.constant 0 : index
    %527 = vector.load %arg8[%c3_218, %c0_219, %c0_220] : memref<4x1x32xf32, #tpu.memory_space<vmem>>, vector<1x1x32xf32>
    %528 = vector.shape_cast %527 : vector<1x1x32xf32> to vector<1x32xf32>
    %c3_221 = arith.constant 3 : index
    %c0_222 = arith.constant 0 : index
    %c0_223 = arith.constant 0 : index
    %529 = vector.load %arg9[%c3_221, %c0_222, %c0_223] : memref<4x1x32xf32, #tpu.memory_space<vmem>>, vector<1x1x32xf32>
    %530 = vector.shape_cast %529 : vector<1x1x32xf32> to vector<1x32xf32>
    %cst_224 = arith.constant dense<0.000000e+00> : vector<16xf32>
    %531 = vector.multi_reduction <add>, %526, %cst_224 [1] : vector<16x32xf32> to vector<16xf32>
    %532 = vector.shape_cast %531 : vector<16xf32> to vector<16x1xf32>
    %cst_225 = arith.constant 3.200000e+01 : f32
    %533 = vector.broadcast %cst_225 : f32 to vector<16x1xf32>
    %534 = arith.divf %532, %533 : vector<16x1xf32>
    %535 = vector.broadcast %534 : vector<16x1xf32> to vector<16x32xf32>
    %536 = arith.subf %526, %535 : vector<16x32xf32>
    %537 = arith.mulf %536, %536 : vector<16x32xf32>
    %cst_226 = arith.constant dense<0.000000e+00> : vector<16xf32>
    %538 = vector.multi_reduction <add>, %537, %cst_226 [1] : vector<16x32xf32> to vector<16xf32>
    %539 = vector.shape_cast %538 : vector<16xf32> to vector<16x1xf32>
    %cst_227 = arith.constant 3.200000e+01 : f32
    %540 = vector.broadcast %cst_227 : f32 to vector<16x1xf32>
    %541 = arith.divf %539, %540 : vector<16x1xf32>
    %542 = vector.broadcast %534 : vector<16x1xf32> to vector<16x32xf32>
    %543 = arith.subf %526, %542 : vector<16x32xf32>
    %cst_228 = arith.constant 9.99999974E-6 : f32
    %544 = vector.broadcast %cst_228 : f32 to vector<16x1xf32>
    %545 = arith.addf %541, %544 : vector<16x1xf32>
    %546 = math.rsqrt %545 : vector<16x1xf32>
    %547 = vector.broadcast %546 : vector<16x1xf32> to vector<16x32xf32>
    %548 = arith.mulf %543, %547 : vector<16x32xf32>
    %549 = vector.broadcast %528 : vector<1x32xf32> to vector<16x32xf32>
    %550 = arith.mulf %548, %549 : vector<16x32xf32>
    %551 = vector.broadcast %530 : vector<1x32xf32> to vector<16x32xf32>
    %552 = arith.addf %550, %551 : vector<16x32xf32>
    %c3_229 = arith.constant 3 : index
    %c0_230 = arith.constant 0 : index
    %c0_231 = arith.constant 0 : index
    %553 = vector.load %arg10[%c3_229, %c0_230, %c0_231] : memref<4x32x64xbf16, #tpu.memory_space<vmem>>, vector<1x32x64xbf16>
    %554 = vector.shape_cast %553 : vector<1x32x64xbf16> to vector<32x64xbf16>
    %555 = arith.truncf %552 : vector<16x32xf32> to vector<16x32xbf16>
    %cst_232 = arith.constant dense<0.000000e+00> : vector<16x64xf32>
    %556 = tpu.matmul %555, %554, %cst_232 {dimension_numbers = #tpu.dot_dimension_numbers<[1], [0], [0], [1], [0, 0, 1, 1], [], []>} : vector<16x32xbf16>, vector<32x64xbf16>, vector<16x64xf32> -> vector<16x64xf32>
    %c3_233 = arith.constant 3 : index
    %c0_234 = arith.constant 0 : index
    %c0_235 = arith.constant 0 : index
    %557 = vector.load %arg11[%c3_233, %c0_234, %c0_235] : memref<4x1x64xf32, #tpu.memory_space<vmem>>, vector<1x1x64xf32>
    %558 = vector.shape_cast %557 : vector<1x1x64xf32> to vector<1x64xf32>
    %559 = vector.broadcast %558 : vector<1x64xf32> to vector<16x64xf32>
    %560 = arith.addf %556, %559 : vector<16x64xf32>
    %cst_236 = arith.constant 5.000000e-01 : f32
    %561 = vector.broadcast %cst_236 : f32 to vector<16x64xf32>
    %562 = arith.mulf %561, %560 : vector<16x64xf32>
    %cst_237 = arith.constant 4.471500e-02 : f32
    %563 = vector.broadcast %cst_237 : f32 to vector<16x64xf32>
    %564 = arith.mulf %563, %560 : vector<16x64xf32>
    %565 = arith.mulf %564, %560 : vector<16x64xf32>
    %566 = arith.mulf %565, %560 : vector<16x64xf32>
    %567 = arith.addf %560, %566 : vector<16x64xf32>
    %cst_238 = arith.constant 0.797884583 : f32
    %568 = vector.broadcast %cst_238 : f32 to vector<16x64xf32>
    %569 = arith.mulf %568, %567 : vector<16x64xf32>
    %570 = math.tanh %569 : vector<16x64xf32>
    %cst_239 = arith.constant 1.000000e+00 : f32
    %571 = vector.broadcast %cst_239 : f32 to vector<16x64xf32>
    %572 = arith.addf %571, %570 : vector<16x64xf32>
    %573 = arith.mulf %562, %572 : vector<16x64xf32>
    %c3_240 = arith.constant 3 : index
    %c0_241 = arith.constant 0 : index
    %c0_242 = arith.constant 0 : index
    %574 = vector.load %arg12[%c3_240, %c0_241, %c0_242] : memref<4x64x32xbf16, #tpu.memory_space<vmem>>, vector<1x64x32xbf16>
    %575 = vector.shape_cast %574 : vector<1x64x32xbf16> to vector<64x32xbf16>
    %576 = arith.truncf %573 : vector<16x64xf32> to vector<16x64xbf16>
    %cst_243 = arith.constant dense<0.000000e+00> : vector<16x32xf32>
    %577 = tpu.matmul %576, %575, %cst_243 {dimension_numbers = #tpu.dot_dimension_numbers<[1], [0], [0], [1], [0, 0, 1, 1], [], []>} : vector<16x64xbf16>, vector<64x32xbf16>, vector<16x32xf32> -> vector<16x32xf32>
    %c3_244 = arith.constant 3 : index
    %c0_245 = arith.constant 0 : index
    %c0_246 = arith.constant 0 : index
    %578 = vector.load %arg13[%c3_244, %c0_245, %c0_246] : memref<4x1x32xf32, #tpu.memory_space<vmem>>, vector<1x1x32xf32>
    %579 = vector.shape_cast %578 : vector<1x1x32xf32> to vector<1x32xf32>
    %580 = vector.broadcast %579 : vector<1x32xf32> to vector<16x32xf32>
    %581 = arith.addf %577, %580 : vector<16x32xf32>
    %582 = arith.addf %581, %552 : vector<16x32xf32>
    %c3_247 = arith.constant 3 : index
    %c0_248 = arith.constant 0 : index
    %c0_249 = arith.constant 0 : index
    %583 = vector.load %arg14[%c3_247, %c0_248, %c0_249] : memref<4x1x32xf32, #tpu.memory_space<vmem>>, vector<1x1x32xf32>
    %584 = vector.shape_cast %583 : vector<1x1x32xf32> to vector<1x32xf32>
    %c3_250 = arith.constant 3 : index
    %c0_251 = arith.constant 0 : index
    %c0_252 = arith.constant 0 : index
    %585 = vector.load %arg15[%c3_250, %c0_251, %c0_252] : memref<4x1x32xf32, #tpu.memory_space<vmem>>, vector<1x1x32xf32>
    %586 = vector.shape_cast %585 : vector<1x1x32xf32> to vector<1x32xf32>
    %cst_253 = arith.constant dense<0.000000e+00> : vector<16xf32>
    %587 = vector.multi_reduction <add>, %582, %cst_253 [1] : vector<16x32xf32> to vector<16xf32>
    %588 = vector.shape_cast %587 : vector<16xf32> to vector<16x1xf32>
    %cst_254 = arith.constant 3.200000e+01 : f32
    %589 = vector.broadcast %cst_254 : f32 to vector<16x1xf32>
    %590 = arith.divf %588, %589 : vector<16x1xf32>
    %591 = vector.broadcast %590 : vector<16x1xf32> to vector<16x32xf32>
    %592 = arith.subf %582, %591 : vector<16x32xf32>
    %593 = arith.mulf %592, %592 : vector<16x32xf32>
    %cst_255 = arith.constant dense<0.000000e+00> : vector<16xf32>
    %594 = vector.multi_reduction <add>, %593, %cst_255 [1] : vector<16x32xf32> to vector<16xf32>
    %595 = vector.shape_cast %594 : vector<16xf32> to vector<16x1xf32>
    %cst_256 = arith.constant 3.200000e+01 : f32
    %596 = vector.broadcast %cst_256 : f32 to vector<16x1xf32>
    %597 = arith.divf %595, %596 : vector<16x1xf32>
    %598 = vector.broadcast %590 : vector<16x1xf32> to vector<16x32xf32>
    %599 = arith.subf %582, %598 : vector<16x32xf32>
    %cst_257 = arith.constant 9.99999974E-6 : f32
    %600 = vector.broadcast %cst_257 : f32 to vector<16x1xf32>
    %601 = arith.addf %597, %600 : vector<16x1xf32>
    %602 = math.rsqrt %601 : vector<16x1xf32>
    %603 = vector.broadcast %602 : vector<16x1xf32> to vector<16x32xf32>
    %604 = arith.mulf %599, %603 : vector<16x32xf32>
    %605 = vector.broadcast %584 : vector<1x32xf32> to vector<16x32xf32>
    %606 = arith.mulf %604, %605 : vector<16x32xf32>
    %607 = vector.broadcast %586 : vector<1x32xf32> to vector<16x32xf32>
    %608 = arith.addf %606, %607 : vector<16x32xf32>
    %609 = vector.shape_cast %608 : vector<16x32xf32> to vector<2x8x32xf32>
    %610 = vector.extract_strided_slice %609 {offsets = [0, 0, 0], sizes = [2, 1, 32], strides = [1, 1, 1]} : vector<2x8x32xf32> to vector<2x1x32xf32>
    %611 = vector.shape_cast %610 : vector<2x1x32xf32> to vector<2x32xf32>
    %c0_258 = arith.constant 0 : index
    %c0_259 = arith.constant 0 : index
    %612 = vector.load %arg21[%c0_258, %c0_259] : memref<32x32xbf16, #tpu.memory_space<vmem>>, vector<32x32xbf16>
    %613 = arith.truncf %611 : vector<2x32xf32> to vector<2x32xbf16>
    %cst_260 = arith.constant dense<0.000000e+00> : vector<2x32xf32>
    %614 = tpu.matmul %613, %612, %cst_260 {dimension_numbers = #tpu.dot_dimension_numbers<[1], [0], [0], [1], [0, 0, 1, 1], [], []>} : vector<2x32xbf16>, vector<32x32xbf16>, vector<2x32xf32> -> vector<2x32xf32>
    %c0_261 = arith.constant 0 : index
    %c0_262 = arith.constant 0 : index
    %615 = vector.load %arg22[%c0_261, %c0_262] : memref<1x32xf32, #tpu.memory_space<vmem>>, vector<1x32xf32>
    %616 = vector.broadcast %615 : vector<1x32xf32> to vector<2x32xf32>
    %617 = arith.addf %614, %616 : vector<2x32xf32>
    %618 = math.tanh %617 : vector<2x32xf32>
    %c0_263 = arith.constant 0 : index
    %c0_264 = arith.constant 0 : index
    %619 = vector.load %arg23[%c0_263, %c0_264] : memref<32x2xbf16, #tpu.memory_space<vmem>>, vector<32x2xbf16>
    %620 = arith.truncf %618 : vector<2x32xf32> to vector<2x32xbf16>
    %cst_265 = arith.constant dense<0.000000e+00> : vector<2x2xf32>
    %621 = tpu.matmul %620, %619, %cst_265 {dimension_numbers = #tpu.dot_dimension_numbers<[1], [0], [0], [1], [0, 0, 1, 1], [], []>} : vector<2x32xbf16>, vector<32x2xbf16>, vector<2x2xf32> -> vector<2x2xf32>
    %c0_266 = arith.constant 0 : index
    %c0_267 = arith.constant 0 : index
    %622 = vector.load %arg24[%c0_266, %c0_267] : memref<1x2xf32, #tpu.memory_space<vmem>>, vector<1x2xf32>
    %623 = vector.broadcast %622 : vector<1x2xf32> to vector<2x2xf32>
    %624 = arith.addf %621, %623 : vector<2x2xf32>
    %c0_268 = arith.constant 0 : index
    %c0_269 = arith.constant 0 : index
    %625 = vector.load %arg25[%c0_268, %c0_269] : memref<2x2xf32, #tpu.memory_space<vmem>>, vector<2x2xf32>
    tpu.vector_store %arg25[%c0_268, %c0_269], %624 {strides = array<i32>} : memref<2x2xf32, #tpu.memory_space<vmem>>, vector<2x2xf32>,
    return
  }
}

</mosaic_0001>

<bundles_post_ra>
// kernel: roberta_linear1_forward.1
= control target key start
LH: loop header
LB: loop body
LE: loop exit
PB: predicated region body
PF: predicated region fallthrough
CT: control target
= control target key end

     0   :  { %s5933_s0 = inlined_call_operand.vmem [shape: f32[16,32], index: 0, kind: input, shape index: {}]   ;;  %s5934_s1 = inlined_call_operand.vmem [shape: f32[4,1,8], index: 1, kind: input, shape index: {}]   ;;  %s5935_s2 = inlined_call_operand.vmem [shape: f32[1,32], index: 2, kind: input, shape index: {}]   ;;  %s5936_s3 = inlined_call_operand.vmem [shape: f32[1,32], index: 3, kind: input, shape index: {}]   ;;  %s5937_s4 = inlined_call_operand.vmem [shape: bf16[4,32,96], index: 4, kind: input, shape index: {}]   ;;  %s5938_s5 = inlined_call_operand.vmem [shape: f32[4,1,96], index: 5, kind: input, shape index: {}]   ;;  %s5939_s6 = inlined_call_operand.vmem [shape: bf16[4,32,32], index: 6, kind: input, shape index: {}]   ;;  %s5940_s7 = inlined_call_operand.vmem [shape: f32[4,1,32], index: 7, kind: input, shape index: {}]   ;;  %s5941_s8 = inlined_call_operand.vmem [shape: f32[4,1,32], index: 8, kind: input, shape index: {}]   ;;  %s5942_s9 = inlined_call_operand.vmem [shape: f32[4,1,32], index: 9, kind: input, shape index: {}]   ;;  %s5943_s10 = inlined_call_operand.vmem [shape: bf16[4,32,64], index: 10, kind: input, shape index: {}]   ;;  %s5944_s11 = inlined_call_operand.vmem [shape: f32[4,1,64], index: 11, kind: input, shape index: {}]   ;;  %s5945_s12 = inlined_call_operand.vmem [shape: bf16[4,64,32], index: 12, kind: input, shape index: {}]   ;;  %s5946_s13 = inlined_call_operand.vmem [shape: f32[4,1,32], index: 13, kind: input, shape index: {}]   ;;  %s5947_s14 = inlined_call_operand.vmem [shape: f32[4,1,32], index: 14, kind: input, shape index: {}]   ;;  %s5948_s15 = inlined_call_operand.vmem [shape: f32[4,1,32], index: 15, kind: input, shape index: {}]   ;;  %s5949_s16 = inlined_call_operand.vmem [shape: bf16[32,32], index: 16, kind: input, shape index: {}]   ;;  %s5950_s17 = inlined_call_operand.vmem [shape: bf16[32,16], index: 17, kind: input, shape index: {}]   ;;  %s5951_s18 = inlined_call_operand.vmem [shape: f32[1,16], index: 18, kind: input, shape index: {}]   ;;  %s5952_s19 = inlined_call_operand.vmem [shape: bf16[16,32], index: 19, kind: input, shape index: {}]   ;;  %s5953_s20 = inlined_call_operand.vmem [shape: f32[1,32], index: 20, kind: input, shape index: {}]   ;;  %s5954_s21 = inlined_call_operand.vmem [shape: bf16[32,32], index: 21, kind: input, shape index: {}]   ;;  %s5955_s22 = inlined_call_operand.vmem [shape: f32[1,32], index: 22, kind: input, shape index: {}]   ;;  %s5956_s23 = inlined_call_operand.vmem [shape: bf16[32,2], index: 23, kind: input, shape index: {}]   ;;  %s5957_s24 = inlined_call_operand.vmem [shape: f32[1,2], index: 24, kind: input, shape index: {}]   ;;  %s5958_s25 = inlined_call_operand.hbm [shape: f32[2,2], index: 25, kind: output, shape index: {}]  }
   0x1   :  { %5976 = sst [smem:[#allocation5_spill]] %s5933_s0 }
   0x2   :  { %5977 = sst [smem:[#allocation6_spill]] %s5934_s1 }
   0x3   :  { %5978 = sst [smem:[#allocation7_spill]] %s5935_s2 }
   0x4   :  { %5979 = sst [smem:[#allocation8_spill]] %s5936_s3 }
   0x5   :  { %5980 = sst [smem:[#allocation9_spill]] %s5937_s4 }
   0x6   :  { %5981 = sst [smem:[#allocation10_spill]] %s5938_s5 }
   0x7   :  { %5982 = sst [smem:[#allocation11_spill]] %s5939_s6 }
   0x8   :  { %5983 = sst [smem:[#allocation12_spill]] %s5940_s7 }
   0x9   :  { %5984 = sst [smem:[#allocation13_spill]] %s5941_s8 }
   0xa   :  { %5985 = sst [smem:[#allocation14_spill]] %s5942_s9 }
   0xb   :  { %5986 = sst [smem:[#allocation15_spill]] %s5955_s22 }
   0xc   :  { %5987 = sst [smem:[#allocation16_spill]] %s5957_s24 }
   0xd   :  { %5988 = sst [smem:[#allocation17_spill]] %s5958_s25 }
   0xe   :  { %s5989_s6 = sld [smem:[#allocation5_spill]]  ;;  %vm86_vm0 = vcmask 261120  }
  0x14   :  { %v82_v0 = vld [vmem:[%s5989_s6] sm:$0xff]  ;;  %v83_v1 = vld [vmem:[%s5989_s6 + $0x8] sm:$0xff] }
  0x15   :  { %v87_v2 = vsel %vm86_vm0, %v82_v0, 0.0  ;;  %v90_v3 = vsel %vm86_vm0, %v83_v1, 0.0 }
  0x16   :  { %88 = vadd.xlane.f32.xlu0 %v87_v2 }
  0x1a   :  { %91 = vadd.xlane.f32.xlu0 %v90_v3 }
  0x1b   :  { %30 = vsyncpa [#allocation3], 0  ;;  %s5990_s1 = sld [smem:[#allocation9_spill]]  ;;  %v4981_v15 = vmov 0.0   ;;  %vm4982_vm1 = vmmov 0   ;;  %s5991_s9 = sld [smem:[#allocation7_spill]] }
  0x1c   :  { %4365 = vmatprep.subr.bf16.mxu0 %v4981_v15  ;;  %4369 = vmatprep.mubr.msk.bf16.mxu0 %vm4982_vm1, %v4981_v15  ;;  %s5992_s29 = sld [smem:[#allocation8_spill]]  ;;  %s5993_s30 = sld [smem:[#allocation10_spill]]  ;;  %vm217_vm2 = vcmask 130048   ;;  %vm443_vm3 = vcmask 64512   ;;  %vm497_vm4 = vcmask 1043456   ;;  %vm935_vm5 = vcmask 523264  }
  0x1d   :  { %4373 = vmatprep.subr.bf16.mxu1 %v4981_v15  ;;  %4375 = vmatprep.mubr.msk.bf16.mxu1 %vm4982_vm1, %v4981_v15  ;;  %s5973_s7 = smov 96   ;;  %s5971_s3 = smov 112   ;;  %vm3861_vm6 = vcmask 1041409   ;;  %vm3987_vm7 = vcmask 9216  }
  0x1e   :  { %s5994_s27 = sld [smem:[#allocation6_spill]]  ;;  %s5995_s8 = sld [smem:[#allocation11_spill]] }
  0x1f   :  { %s5967_s5 = smov 16   ;;  %s5996_s2 = sld [smem:[#allocation12_spill]] }
  0x20   :  { %s5997_s6 = sld [smem:[#allocation13_spill]]  ;;  %s5998_s28 = sld [smem:[#allocation14_spill]] }
  0x21   :  { %v4786_v14 = vld [vmem:[%s5990_s1] sm:$0xff]   ;;  %v4787_v16 = vld [vmem:[%s5990_s1 + $0x8] sm:$0xff]   ;;  %s6002_s4 = smov 16  }
  0x22   :  { %4366 = vmatpush3.bf16.msra.mxu0 %v4786_v14  ;;  %v4003_v25 = vld [vmem:[%s5991_s9] ss:$0 sm:$0xff]  ;;  %s5969_s9 = smov 64  }
  0x23   :  { %4367 = vmatprep.subr.bf16.mxu0 %v4981_v15  ;;  %v4004_v29 = vld [vmem:[%s5992_s29] ss:$0 sm:$0xff] }
  0x24   :  { %v4005_v34 = vld [vmem:[%s5993_s30] ss:$0 sm:$0xff] }
  0x25   :  { %v5200_v58 = vld [vmem:[%s5994_s27] ss:$0 sm:$0xff] }
  0x26   :  { %4368 = vmatpush3.bf16.msra.mxu0 %v4787_v16 }
  0x27   :  { %4379 = vmatprep.subr.bf16.mxu0 %v4981_v15 }
  0xa3   :  { %v89_v4 = vpop.xlane.xlu0 %88 }
  0xa4   :  { %v94_v5 = vmul.f32 0.03125, %v89_v4 }
  0xa6   :  { %v96_v6 = vsub.f32 %v82_v0, %v94_v5 }
  0xa7   :  { %v92_v7 = vpop.xlane.xlu0 %91 }
  0xa8   :  { %v95_v8 = vmul.f32 0.03125, %v92_v7  ;;  %v98_v9 = vmul.f32 %v96_v6, %v96_v6 }
  0xaa   :  { %v97_v10 = vsub.f32 %v83_v1, %v95_v8  ;;  %v100_v11 = vsel %vm86_vm0, %v98_v9, 0.0  ;;  %v5206_v1 = vld [vmem:[%s5994_s27 + $0x1] ss:$0 sm:$0xff] }
  0xab   :  { %101 = vadd.xlane.f32.xlu1 %v100_v11  ;;  %v5215_v11 = vld [vmem:[%s5994_s27 + $0x2] ss:$0 sm:$0xff] }
  0xac   :  { %v99_v12 = vmul.f32 %v97_v10, %v97_v10 }
  0xae   :  { %v103_v13 = vsel %vm86_vm0, %v99_v12, 0.0 }
  0xaf   :  { %104 = vadd.xlane.f32.xlu1 %v103_v13 }
 0x138   :  { %v102_v17 = vpop.xlane.xlu1 %101 }
 0x139   :  { %v106_v18 = vmul.f32 0.03125, %v102_v17 }
 0x13b   :  { %v108_v19 = vadd.f32 1e-05, %v106_v18 }
 0x13c   :  { %v105_v20 = vpop.xlane.xlu1 %104 }
 0x13d   :  { %4835 = vrsqrt.f32 %v108_v19  ;;  %v107_v21 = vmul.f32 0.03125, %v105_v20  ;;  %v5220_v19 = vld [vmem:[%s5994_s27 + $0x3] ss:$0 sm:$0xff] }
 0x13f   :  { %v109_v22 = vadd.f32 1e-05, %v107_v21 }
 0x141   :  { %4837 = vrsqrt.f32 %v109_v22 }
 0x147   :  { %v4836_v23 = vpop.eup %4835 }
 0x148   :  { %v112_v24 = vmul.f32 %v4836_v23, %v96_v6 }
 0x14a   :  { %v120_v28 = vmul.f32 %v4003_v25, %v112_v24 }
 0x14b   :  { %v4838_v26 = vpop.eup %4837 }
 0x14c   :  { %v113_v27 = vmul.f32 %v4838_v26, %v97_v10  ;;  %v5148_v31 = vadd.f32 %v4004_v29, %v120_v28 }
 0x14e   :  { %v121_v30 = vmul.f32 %v4003_v25, %v113_v27 }
 0x150   :  { %v5150_v32 = vadd.f32 %v4004_v29, %v121_v30 }
 0x152   :  { %v138_v33 = vpack.c.bf16 %v5150_v32, %v5148_v31 }
 0x154   :  { %4370 = vmatmul.mubr.msk.bf16.vlgmr.msra.gmra.mrb[0].mxu0 %vm86_vm0, %v138_v33 }
 0x155   :  { %4381 = vmatprep.mubr.msk.bf16.mxu0 %vm4982_vm1, %v4981_v15 }
 0x227   :  { %v195_v35 = vpop.f32.mrb[0].mxu0 }
 0x228   :  { %v196_v36 = vadd.f32 %v4005_v34, %v195_v35  ;;  %v4371_v37 = vpop.f32.mrb[1].mxu0 }
 0x229   :  { %v198_v38 = vpop.f32.mrb[2].mxu0 }
 0x22a   :  { %v210_v39 = vpack.c.bf16 %v196_v36, %v196_v36  ;;  %v199_v40 = vadd.f32 %v4005_v34, %v198_v38  ;;  %v4372_v41 = vpop.f32.mrb[3].mxu0 }
 0x22c   :  { %v4746_v42 = vpack.i.bf16 %v199_v40, %v196_v36  ;;  %215 = vrot.lane.b32.xlu1 %v210_v39, %s5973_s7  ;;  %v5161_v43 = vpack.c.bf16 %v199_v40, %v199_v40 }
 0x22e   :  { %4747 = vrot.lane.b32.xlu0 %v4746_v42, %s5971_s3  ;;  %s6003_s3 = sld [smem:[#allocation15_spill]] }
 0x230   :  { %265 = vrot.lane.b32.xlu1 %v5161_v43, %s5973_s7 }
 0x29e   :  { %v216_v44 = vpop.permute.xlu1 %215 }
 0x29f   :  { %v222_v45 = vsel %vm217_vm2, %v216_v44, 0 }
 0x2a0   :  { %4374 = vmatpush3.bf16.xpose.msra.mxu1 %v222_v45  ;;  %v4748_v46 = vpop.permute.xlu0 %4747 }
 0x2a1   :  { %v4750_v47 = vunpack.i.h.bf16 %v4748_v46  ;;  %v4749_v48 = vunpack.i.l.bf16 %v4748_v46  ;;  %4385 = vmatprep.subr.bf16.mxu1 %v4981_v15 }
 0x2a2   :  { %v266_v49 = vpop.permute.xlu1 %265 }
 0x2a3   :  { %v271_v50 = vsel %vm217_vm2, %v266_v49, 0  ;;  %v5169_v51 = vpack.c.bf16 %v4750_v47, %v4750_v47  ;;  %v5171_v52 = vpack.c.bf16 %v4749_v48, %v4749_v48 }
 0x2a4   :  { %4380 = vmatpush3.bf16.xpose.msra.mxu0 %v271_v50 }
 0x2a5   :  { %363 = vrot.lane.b32.xlu0 %v5169_v51, %s5973_s7  ;;  %314 = vrot.lane.b32.xlu1 %v5171_v52, %s5973_s7  ;;  %s6001_s7 = smov 64  }
 0x2a6   :  { %4391 = vmatprep.subr.bf16.mxu0 %v4981_v15 }
 0x2a7   :  { %4376 = vmatmul.mubr.msk.bf16.vlgmr.msra.gmra.mrb[0].mxu1 %vm217_vm2, %v210_v39 }
 0x2a8   :  { %4387 = vmatprep.mubr.msk.bf16.mxu1 %vm4982_vm1, %v4981_v15 }
 0x2ab   :  { %4382 = vmatmul.mubr.msk.bf16.vlgmr.msra.gmra.mrb[4].mxu0 %vm217_vm2, %v5161_v43 }
 0x2ac   :  { %4393 = vmatprep.mubr.msk.bf16.mxu0 %vm4982_vm1, %v4981_v15 }
 0x317   :  { %v364_v53 = vpop.permute.xlu0 %363  ;;  %v315_v54 = vpop.permute.xlu1 %314 }
 0x318   :  { %v369_v55 = vsel %vm217_vm2, %v364_v53, 0  ;;  %v320_v56 = vsel %vm217_vm2, %v315_v54, 0 }
 0x319   :  { %4386 = vmatpush3.bf16.xpose.msra.mxu1 %v320_v56  ;;  %4392 = vmatpush3.bf16.xpose.msra.mxu0 %v369_v55 }
 0x31a   :  { %4397 = vmatprep.subr.bf16.mxu1 %v4981_v15  ;;  %4403 = vmatprep.subr.bf16.mxu0 %v4981_v15 }
 0x320   :  { %4388 = vmatmul.mubr.msk.bf16.vlgmr.msra.gmra.mrb[4].mxu1 %vm217_vm2, %v5171_v52  ;;  %4394 = vmatmul.mubr.msk.bf16.vlgmr.msra.gmra.mrb[8].mxu0 %vm217_vm2, %v5169_v51 }
 0x321   :  { %4399 = vmatprep.mubr.msk.bf16.mxu1 %vm4982_vm1, %v4981_v15  ;;  %4405 = vmatprep.mubr.msk.bf16.mxu0 %vm4982_vm1, %v4981_v15 }
 0x37a   :  { %v258_v57 = vpop.f32.mrb[0].mxu1 }
 0x37b   :  { %v411_v59 = vmul.f32 0.25, %v258_v57  ;;  %v4377_v60 = vpop.f32.mrb[1].mxu1 }
 0x37c   :  { %v261_v61 = vpop.f32.mrb[2].mxu1 }
 0x37d   :  { %v4378_v62 = vpop.f32.mrb[3].mxu1  ;;  %v439_v63 = vadd.f32 %v5200_v58, %v411_v59 }
 0x37e   :  { %v307_v0 = vpop.f32.mrb[4].mxu0 }
 0x37f   :  { %v412_v2 = vmul.f32 0.25, %v307_v0  ;;  %v4383_v3 = vpop.f32.mrb[5].mxu0  ;;  %v444_v4 = vsel %vm443_vm3, %v439_v63, -inf }
 0x380   :  { %445 = vmax.xlane.f32.xlu1 %v444_v4  ;;  %v310_v5 = vpop.f32.mrb[6].mxu0 }
 0x381   :  { %v4384_v6 = vpop.f32.mrb[7].mxu0  ;;  %v440_v7 = vadd.f32 %v5206_v1, %v412_v2 }
 0x383   :  { %v447_v8 = vsel %vm443_vm3, %v440_v7, -inf }
 0x384   :  { %448 = vmax.xlane.f32.xlu0 %v447_v8 }
 0x391   :  { %492 = vrot.lane.b32.xlu1 %v210_v39, %s5969_s9 }
 0x3f3   :  { %v356_v9 = vpop.f32.mrb[4].mxu1  ;;  %v405_v10 = vpop.f32.mrb[8].mxu0 }
 0x3f4   :  { %v413_v12 = vmul.f32 0.25, %v356_v9  ;;  %v414_v13 = vmul.f32 0.25, %v405_v10  ;;  %v4389_v14 = vpop.f32.mrb[5].mxu1  ;;  %v4395_v16 = vpop.f32.mrb[9].mxu0 }
 0x3f5   :  { %v359_v17 = vpop.f32.mrb[6].mxu1  ;;  %v408_v18 = vpop.f32.mrb[10].mxu0 }
 0x3f6   :  { %v4390_v20 = vpop.f32.mrb[7].mxu1  ;;  %v4396_v21 = vpop.f32.mrb[11].mxu0  ;;  %v441_v22 = vadd.f32 %v5215_v11, %v413_v12  ;;  %v442_v24 = vadd.f32 %v5220_v19, %v414_v13  ;;  %v4788_v13 = vld [vmem:[%s5995_s8] sm:$0xff]   ;;  %v4789_v17 = vld [vmem:[%s5995_s8 + $0x8] sm:$0xff]  }
 0x3f8   :  { %v450_v23 = vsel %vm443_vm3, %v441_v22, -inf  ;;  %v453_v25 = vsel %vm443_vm3, %v442_v24, -inf }
 0x3f9   :  { %451 = vmax.xlane.f32.xlu0 %v450_v23 }
 0x3fd   :  { %454 = vmax.xlane.f32.xlu0 %v453_v25 }
 0x40d   :  { %v446_v26 = vpop.xlane.xlu1 %445 }
 0x40e   :  { %v456_v27 = vsub.f32 %v439_v63, %v446_v26 }
 0x410   :  { %v460_v28 = vmul.f32 1.442695, %v456_v27 }
 0x411   :  { %v493_v29 = vpop.permute.xlu1 %492  ;;  %v449_v30 = vpop.xlane.xlu0 %448 }
 0x412   :  { %4839 = vpow2.f32 %v460_v28  ;;  %v499_v33 = vsel %vm497_vm4, %v493_v29, 0  ;;  %v457_v34 = vsub.f32 %v440_v7, %v449_v30 }
 0x413   :  { %4398 = vmatpush3.bf16.msra.mxu1 %v499_v33 }
 0x414   :  { %v462_v35 = vmul.f32 1.442695, %v457_v34  ;;  %4409 = vmatprep.subr.bf16.mxu1 %v4981_v15 }
 0x416   :  { %4841 = vpow2.f32 %v462_v35 }
 0x41c   :  { %v4840_v36 = vpop.eup %4839 }
 0x41d   :  { %v468_v37 = vsel %vm443_vm3, %v4840_v36, 0.0 }
 0x41e   :  { %469 = vadd.xlane.f32.xlu1 %v468_v37 }
 0x420   :  { %v4842_v38 = vpop.eup %4841 }
 0x421   :  { %v471_v39 = vsel %vm443_vm3, %v4842_v38, 0.0 }
 0x422   :  { %472 = vadd.xlane.f32.xlu0 %v471_v39 }
 0x486   :  { %v452_v40 = vpop.xlane.xlu0 %451 }
 0x487   :  { %v458_v41 = vsub.f32 %v441_v22, %v452_v40  ;;  %v4021_v40 = vld [vmem:[%s5996_s2] ss:$0 sm:$0xff] }
 0x489   :  { %v464_v42 = vmul.f32 1.442695, %v458_v41 }
 0x48a   :  { %v455_v44 = vpop.xlane.xlu0 %454 }
 0x48b   :  { %4843 = vpow2.f32 %v464_v42  ;;  %v459_v45 = vsub.f32 %v442_v24, %v455_v44 }
 0x48d   :  { %v466_v46 = vmul.f32 1.442695, %v459_v45 }
 0x48f   :  { %4845 = vpow2.f32 %v466_v46 }
 0x495   :  { %v4844_v47 = vpop.eup %4843 }
 0x496   :  { %v474_v48 = vsel %vm443_vm3, %v4844_v47, 0.0 }
 0x497   :  { %475 = vadd.xlane.f32.xlu1 %v474_v48 }
 0x499   :  { %v4846_v49 = vpop.eup %4845 }
 0x49a   :  { %v477_v50 = vsel %vm443_vm3, %v4846_v49, 0.0 }
 0x49b   :  { %478 = vadd.xlane.f32.xlu0 %v477_v50 }
 0x4a8   :  { %589 = vrot.lane.b32.xlu1 %v5171_v52, %s5969_s9 }
 0x4ab   :  { %v470_v53 = vpop.xlane.xlu1 %469 }
 0x4ac   :  { %4847 = vrcp.f32 %v470_v53  ;;  %637 = vrot.lane.b32.xlu1 %v5169_v51, %s5969_s9 }
 0x4af   :  { %v473_v57 = vpop.xlane.xlu0 %472 }
 0x4b0   :  { %4849 = vrcp.f32 %v473_v57 }
 0x4b1   :  { %541 = vrot.lane.b32.xlu0 %v5161_v43, %s5969_s9 }
 0x4b6   :  { %v4848_v54 = vpop.eup %4847 }
 0x4b7   :  { %v484_v55 = vmul.f32 %v4848_v54, %v4840_v36 }
 0x4b9   :  { %v488_v56 = vpack.c.bf16 %v484_v55, %v484_v55 }
 0x4ba   :  { %v4850_v52 = vpop.eup %4849 }
 0x4bb   :  { %4400 = vmatmul.mubr.msk.bf16.vlgmr.msra.gmra.mrb[8].mxu1 %vm443_vm3, %v488_v56  ;;  %v485_v43 = vmul.f32 %v4850_v52, %v4842_v38 }
 0x4bc   :  { %4411 = vmatprep.mubr.msk.bf16.mxu1 %vm4982_vm1, %v4981_v15 }
 0x4bd   :  { %v489_v3 = vpack.c.bf16 %v485_v43, %v485_v43  ;;  %v4791_v43 = vld [vmem:[%s5943_s10 + $0x8] sm:$0xff]  }
 0x524   :  { %v476_v59 = vpop.xlane.xlu1 %475 }
 0x525   :  { %4851 = vrcp.f32 %v476_v59 }
 0x528   :  { %v590_v60 = vpop.permute.xlu1 %589  ;;  %v479_v61 = vpop.xlane.xlu0 %478 }
 0x529   :  { %v595_v51 = vsel %vm497_vm4, %v590_v60, 0  ;;  %4853 = vrcp.f32 %v479_v61 }
 0x52a   :  { %4410 = vmatpush3.bf16.msra.mxu1 %v595_v51 }
 0x52b   :  { %4421 = vmatprep.subr.bf16.mxu1 %v4981_v15 }
 0x52c   :  { %v542_v62 = vpop.permute.xlu0 %541  ;;  %v638_v0 = vpop.permute.xlu1 %637 }
 0x52d   :  { %v547_v63 = vsel %vm497_vm4, %v542_v62, 0  ;;  %v643_v5 = vsel %vm497_vm4, %v638_v0, 0 }
 0x52e   :  { %4404 = vmatpush3.bf16.msra.mxu0 %v547_v63 }
 0x52f   :  { %v4852_v2 = vpop.eup %4851  ;;  %4415 = vmatprep.subr.bf16.mxu0 %v4981_v15 }
 0x530   :  { %v486_v4 = vmul.f32 %v4852_v2, %v4844_v47 }
 0x531   :  { %4406 = vmatmul.mubr.msk.bf16.vlgmr.msra.gmra.mrb[12].mxu0 %vm443_vm3, %v489_v3 }
 0x532   :  { %4416 = vmatpush3.bf16.msra.mxu0 %v643_v5  ;;  %v490_v6 = vpack.c.bf16 %v486_v4, %v486_v4  ;;  %4417 = vmatprep.mubr.msk.bf16.mxu0 %vm4982_vm1, %v4981_v15 }
 0x533   :  { %v4854_v7 = vpop.eup %4853  ;;  %4429 = vmatprep.subr.bf16.mxu0 %v4981_v15 }
 0x534   :  { %v487_v8 = vmul.f32 %v4854_v7, %v4846_v49  ;;  %4412 = vmatmul.mubr.msk.bf16.vlgmr.msra.gmra.mrb[12].mxu1 %vm443_vm3, %v490_v6  ;;  %v4025_v7 = vld [vmem:[%s5997_s6] ss:$0 sm:$0xff] }
 0x535   :  { %4425 = vmatprep.mubr.msk.bf16.mxu1 %vm4982_vm1, %v4981_v15  ;;  %4422 = vmatpush3.bf16.msra.mxu1 %v4788_v13 }
 0x536   :  { %v491_v9 = vpack.c.bf16 %v487_v8, %v487_v8  ;;  %4423 = vmatprep.subr.bf16.mxu1 %v4981_v15 }
 0x539   :  { %4418 = vmatmul.mubr.msk.bf16.vlgmr.msra.gmra.mrb[16].mxu0 %vm443_vm3, %v491_v9  ;;  %4424 = vmatpush3.bf16.msra.mxu1 %v4789_v17 }
 0x53a   :  { %4433 = vmatprep.mubr.msk.bf16.mxu0 %vm4982_vm1, %v4981_v15  ;;  %4437 = vmatprep.subr.bf16.mxu1 %v4981_v15 }
 0x58e   :  { %v535_v10 = vpop.f32.mrb[8].mxu1 }
 0x58f   :  { %v4401_v12 = vpop.f32.mrb[9].mxu1 }
 0x590   :  { %v538_v14 = vpop.f32.mrb[10].mxu1  ;;  %v4026_v12 = vld [vmem:[%s5998_s28] ss:$0 sm:$0xff] }
 0x591   :  { %v4402_v16 = vpop.f32.mrb[11].mxu1 }
 0x604   :  { %v583_v18 = vpop.f32.mrb[12].mxu0 }
 0x605   :  { %v4407_v20 = vpop.f32.mrb[13].mxu0 }
 0x606   :  { %v586_v21 = vpop.f32.mrb[14].mxu0  ;;  %v4793_v20 = vld [vmem:[%s5945_s12 + $0x8] sm:$0xff]  }
 0x607   :  { %v4408_v22 = vpop.f32.mrb[15].mxu0  ;;  %v631_v23 = vpop.f32.mrb[12].mxu1  ;;  %v4794_v21 = vld [vmem:[%s5945_s12 + $0x10] sm:$0xff]  }
 0x608   :  { %v4413_v24 = vpop.f32.mrb[13].mxu1  ;;  %v4795_v22 = vld [vmem:[%s5945_s12 + $0x18] sm:$0xff]  }
 0x609   :  { %v634_v25 = vpop.f32.mrb[14].mxu1 }
 0x60a   :  { %v4414_v26 = vpop.f32.mrb[15].mxu1 }
 0x60c   :  { %v679_v27 = vpop.f32.mrb[16].mxu0 }
 0x60d   :  { %v4751_v28 = vpack.i.bf16 %v679_v27, %v631_v23  ;;  %v4419_v29 = vpop.f32.mrb[17].mxu0  ;;  %v4027_v23 = vld [vmem:[%s5944_s11] ss:$0 sm:$0xff] }
 0x60e   :  { %v682_v30 = vpop.f32.mrb[18].mxu0 }
 0x60f   :  { %4752 = vrot.lane.b32.xlu1 %v4751_v28, %s5967_s5  ;;  %v4420_v33 = vpop.f32.mrb[19].mxu0  ;;  %s5999_s5 = smov 96  }
 0x681   :  { %v4753_v34 = vpop.permute.xlu1 %4752 }
 0x682   :  { %v4755_v35 = vunpack.i.h.bf16 %v4753_v34  ;;  %v4754_v36 = vunpack.i.l.bf16 %v4753_v34 }
 0x684   :  { %v694_v37 = vsel %vm217_vm2, %v583_v18, %v4755_v35  ;;  %v693_v38 = vsel %vm217_vm2, %v535_v10, %v4754_v36  ;;  %v4792_v18 = vld [vmem:[%s5945_s12] sm:$0xff]  }
 0x685   :  { %v699_v39 = vpack.c.bf16 %v694_v37, %v693_v38 }
 0x687   :  { %4426 = vmatmul.mubr.msk.bf16.vlgmr.msra.gmra.mrb[16].mxu1 %vm86_vm0, %v699_v39 }
 0x688   :  { %4445 = vmatprep.mubr.msk.bf16.mxu1 %vm4982_vm1, %v4981_v15  ;;  %4438 = vmatpush3.bf16.msra.mxu1 %v4792_v18 }
 0x689   :  { %4439 = vmatprep.subr.bf16.mxu1 %v4981_v15 }
 0x68c   :  { %4440 = vmatpush3.bf16.msra.mxu1 %v4793_v20  ;;  %v4037_v20 = vld [vmem:[%s5947_s14] ss:$0 sm:$0xff] }
 0x68d   :  { %4441 = vmatprep.subr.bf16.mxu1 %v4981_v15 }
 0x690   :  { %4442 = vmatpush3.bf16.msra.mxu1 %v4794_v21 }
 0x691   :  { %4443 = vmatprep.subr.bf16.mxu1 %v4981_v15 }
 0x694   :  { %4444 = vmatpush3.bf16.msra.mxu1 %v4795_v22 }
 0x695   :  { %4465 = vmatprep.subr.bf16.mxu1 %v4981_v15 }
 0x75a   :  { %v756_v41 = vpop.f32.mrb[16].mxu1 }
 0x75b   :  { %v757_v42 = vadd.f32 %v4021_v40, %v756_v41  ;;  %v4427_v44 = vpop.f32.mrb[17].mxu1 }
 0x75c   :  { %v759_v45 = vpop.f32.mrb[18].mxu1 }
 0x75d   :  { %v760_v46 = vadd.f32 %v4021_v40, %v759_v45  ;;  %v4428_v47 = vpop.f32.mrb[19].mxu1  ;;  %v763_v48 = vadd.f32 %v757_v42, %v5148_v31 }
 0x75f   :  { %v767_v49 = vsel %vm86_vm0, %v763_v48, 0.0  ;;  %v764_v50 = vadd.f32 %v760_v46, %v5150_v32  ;;  %v4790_v32 = vld [vmem:[%s5943_s10] sm:$0xff]  }
 0x760   :  { %768 = vadd.xlane.f32.xlu0 %v767_v49  ;;  %4430 = vmatpush3.bf16.msra.mxu0 %v4790_v32 }
 0x761   :  { %v770_v53 = vsel %vm86_vm0, %v764_v50, 0.0  ;;  %4431 = vmatprep.subr.bf16.mxu0 %v4981_v15 }
 0x762   :  { %771 = vadd.xlane.f32.xlu1 %v770_v53 }
 0x764   :  { %4432 = vmatpush3.bf16.msra.mxu0 %v4791_v43 }
 0x765   :  { %4449 = vmatprep.subr.bf16.mxu0 %v4981_v15 }
 0x7ed   :  { %v769_v54 = vpop.xlane.xlu0 %768 }
 0x7ee   :  { %v773_v55 = vmul.f32 0.03125, %v769_v54  ;;  %v4031_v54 = vld [vmem:[%s5946_s13] ss:$0 sm:$0xff] }
 0x7ef   :  { %v772_v56 = vpop.xlane.xlu1 %771 }
 0x7f0   :  { %v775_v57 = vsub.f32 %v763_v48, %v773_v55  ;;  %v774_v59 = vmul.f32 0.03125, %v772_v56 }
 0x7f2   :  { %v776_v52 = vsub.f32 %v764_v50, %v774_v59  ;;  %v777_v60 = vmul.f32 %v775_v57, %v775_v57 }
 0x7f4   :  { %v779_v61 = vsel %vm86_vm0, %v777_v60, 0.0  ;;  %v778_v51 = vmul.f32 %v776_v52, %v776_v52 }
 0x7f5   :  { %780 = vadd.xlane.f32.xlu0 %v779_v61 }
 0x7f6   :  { %v782_v31 = vsel %vm86_vm0, %v778_v51, 0.0 }
 0x7f9   :  { %783 = vadd.xlane.f32.xlu0 %v782_v31 }
 0x882   :  { %v781_v62 = vpop.xlane.xlu0 %780 }
 0x883   :  { %v785_v63 = vmul.f32 0.03125, %v781_v62 }
 0x885   :  { %v787_v0 = vadd.f32 1e-05, %v785_v63 }
 0x886   :  { %v784_v2 = vpop.xlane.xlu0 %783 }
 0x887   :  { %4855 = vrsqrt.f32 %v787_v0  ;;  %v786_v3 = vmul.f32 0.03125, %v784_v2 }
 0x889   :  { %v788_v4 = vadd.f32 1e-05, %v786_v3 }
 0x88b   :  { %4857 = vrsqrt.f32 %v788_v4 }
 0x891   :  { %v4856_v5 = vpop.eup %4855 }
 0x892   :  { %v791_v6 = vmul.f32 %v4856_v5, %v775_v57 }
 0x894   :  { %v799_v9 = vmul.f32 %v4025_v7, %v791_v6 }
 0x895   :  { %v4858_v8 = vpop.eup %4857 }
 0x896   :  { %v792_v10 = vmul.f32 %v4858_v8, %v776_v52  ;;  %v807_v14 = vadd.f32 %v4026_v12, %v799_v9  ;;  %v4796_v8 = vld [vmem:[%s5949_s16] sm:$0xff]   ;;  %v4797_v9 = vld [vmem:[%s5949_s16 + $0x8] sm:$0xff]   ;;  %s6000_s16 = smov 112  }
 0x898   :  { %v800_v13 = vmul.f32 %v4025_v7, %v792_v10 }
 0x89a   :  { %v808_v16 = vadd.f32 %v4026_v12, %v800_v13 }
 0x89c   :  { %v813_v17 = vpack.c.bf16 %v808_v16, %v807_v14 }
 0x89e   :  { %4434 = vmatmul.mubr.msk.bf16.vlgmr.msra.gmra.mrb[20].mxu0 %vm86_vm0, %v813_v17 }
 0x89f   :  { %4453 = vmatprep.mubr.msk.bf16.mxu0 %vm4982_vm1, %v4981_v15  ;;  %4450 = vmatpush3.bf16.msra.mxu0 %v4796_v8 }
 0x8a0   :  { %4451 = vmatprep.subr.bf16.mxu0 %v4981_v15 }
 0x8a3   :  { %4452 = vmatpush3.bf16.msra.mxu0 %v4797_v9 }
 0x8a4   :  { %4457 = vmatprep.subr.bf16.mxu0 %v4981_v15 }
 0x971   :  { %v870_v24 = vpop.f32.mrb[20].mxu0 }
 0x972   :  { %v871_v25 = vadd.f32 %v4027_v23, %v870_v24  ;;  %v4435_v26 = vpop.f32.mrb[21].mxu0 }
 0x973   :  { %v873_v27 = vpop.f32.mrb[22].mxu0 }
 0x974   :  { %v879_v28 = vmul.f32 0.044715, %v871_v25  ;;  %v874_v29 = vadd.f32 %v4027_v23, %v873_v27  ;;  %v4436_v30 = vpop.f32.mrb[23].mxu0  ;;  %v877_v46 = vmul.f32 0.5, %v871_v25 }
 0x976   :  { %v881_v33 = vmul.f32 %v879_v28, %v871_v25  ;;  %v880_v34 = vmul.f32 0.044715, %v874_v29  ;;  %v878_v47 = vmul.f32 0.5, %v874_v29 }
 0x978   :  { %v883_v35 = vmul.f32 %v881_v33, %v871_v25  ;;  %v882_v36 = vmul.f32 %v880_v34, %v874_v29  ;;  %v4799_v33 = vld [vmem:[%s5990_s1 + $0x18] sm:$0xff]  }
 0x97a   :  { %v885_v37 = vadd.f32 %v883_v35, %v871_v25  ;;  %v884_v38 = vmul.f32 %v882_v36, %v874_v29  ;;  %v4038_v25 = vld [vmem:[%s5948_s15] ss:$0 sm:$0xff] }
 0x97c   :  { %v887_v39 = vmul.f32 0.7978846, %v885_v37  ;;  %v886_v40 = vadd.f32 %v884_v38, %v874_v29  ;;  %v4798_v29 = vld [vmem:[%s5990_s1 + $0x10] sm:$0xff]  }
 0x97e   :  { %4859 = vtanh.f32 %v887_v39  ;;  %v888_v41 = vmul.f32 0.7978846, %v886_v40  ;;  %v4047_v39 = vld [vmem:[%s5993_s30 + $0x1] ss:$0 sm:$0xff] }
 0x980   :  { %4861 = vtanh.f32 %v888_v41 }
 0x988   :  { %v4860_v42 = vpop.eup %4859 }
 0x989   :  { %v891_v44 = vadd.f32 1.0, %v4860_v42 }
 0x98a   :  { %v4862_v45 = vpop.eup %4861 }
 0x98b   :  { %v892_v48 = vadd.f32 1.0, %v4862_v45  ;;  %v893_v49 = vmul.f32 %v891_v44, %v877_v46 }
 0x98d   :  { %v894_v50 = vmul.f32 %v892_v48, %v878_v47 }
 0x98f   :  { %v903_v53 = vpack.c.bf16 %v894_v50, %v893_v49 }
 0x991   :  { %4446 = vmatmul.mubr.msk.bf16.vlgmr.msra.gmra.mrb[20].mxu1 %vm935_vm5, %v903_v53 }
 0x992   :  { %4467 = vmatprep.mubr.msk.bf16.mxu1 %vm4982_vm1, %v4981_v15 }
 0xa64   :  { %v973_v55 = vpop.f32.mrb[20].mxu1 }
 0xa65   :  { %v974_v56 = vadd.f32 %v4031_v54, %v973_v55  ;;  %v4447_v57 = vpop.f32.mrb[21].mxu1 }
 0xa66   :  { %v976_v59 = vpop.f32.mrb[22].mxu1 }
 0xa67   :  { %v977_v52 = vadd.f32 %v4031_v54, %v976_v59  ;;  %v4448_v60 = vpop.f32.mrb[23].mxu1  ;;  %v980_v61 = vadd.f32 %v974_v56, %v807_v14 }
 0xa69   :  { %v984_v51 = vsel %vm86_vm0, %v980_v61, 0.0  ;;  %v981_v31 = vadd.f32 %v977_v52, %v808_v16 }
 0xa6a   :  { %985 = vadd.xlane.f32.xlu0 %v984_v51 }
 0xa6b   :  { %v987_v32 = vsel %vm86_vm0, %v981_v31, 0.0 }
 0xa6c   :  { %988 = vadd.xlane.f32.xlu1 %v987_v32 }
 0xaf7   :  { %v986_v43 = vpop.xlane.xlu0 %985 }
 0xaf8   :  { %v990_v62 = vmul.f32 0.03125, %v986_v43 }
 0xaf9   :  { %v989_v63 = vpop.xlane.xlu1 %988 }
 0xafa   :  { %v992_v0 = vsub.f32 %v980_v61, %v990_v62  ;;  %v991_v2 = vmul.f32 0.03125, %v989_v63 }
 0xafc   :  { %v993_v3 = vsub.f32 %v981_v31, %v991_v2  ;;  %v994_v4 = vmul.f32 %v992_v0, %v992_v0 }
 0xafe   :  { %v996_v5 = vsel %vm86_vm0, %v994_v4, 0.0  ;;  %v995_v6 = vmul.f32 %v993_v3, %v993_v3 }
 0xaff   :  { %997 = vadd.xlane.f32.xlu0 %v996_v5 }
 0xb00   :  { %v999_v7 = vsel %vm86_vm0, %v995_v6, 0.0 }
 0xb01   :  { %1000 = vadd.xlane.f32.xlu1 %v999_v7 }
 0xb8c   :  { %v998_v10 = vpop.xlane.xlu0 %997 }
 0xb8d   :  { %v1002_v12 = vmul.f32 0.03125, %v998_v10 }
 0xb8e   :  { %v1001_v13 = vpop.xlane.xlu1 %1000 }
 0xb8f   :  { %v1004_v14 = vadd.f32 1e-05, %v1002_v12  ;;  %v1003_v16 = vmul.f32 0.03125, %v1001_v13 }
 0xb91   :  { %4863 = vrsqrt.f32 %v1004_v14  ;;  %v1005_v17 = vadd.f32 1e-05, %v1003_v16 }
 0xb93   :  { %4865 = vrsqrt.f32 %v1005_v17 }
 0xb9b   :  { %v4864_v18 = vpop.eup %4863 }
 0xb9c   :  { %v1008_v21 = vmul.f32 %v4864_v18, %v992_v0 }
 0xb9d   :  { %v4866_v22 = vpop.eup %4865 }
 0xb9e   :  { %v1016_v23 = vmul.f32 %v4037_v20, %v1008_v21  ;;  %v1009_v24 = vmul.f32 %v4866_v22, %v993_v3 }
 0xba0   :  { %v1017_v26 = vmul.f32 %v4037_v20, %v1009_v24  ;;  %v1024_v27 = vadd.f32 %v4038_v25, %v1016_v23 }
 0xba2   :  { %v1025_v28 = vadd.f32 %v4038_v25, %v1017_v26 }
 0xba4   :  { %v1030_v30 = vpack.c.bf16 %v1025_v28, %v1024_v27 }
 0xba6   :  { %4454 = vmatmul.mubr.msk.bf16.vlgmr.msra.gmra.mrb[24].mxu0 %vm86_vm0, %v1030_v30 }
 0xba7   :  { %4458 = vmatpush3.bf16.msra.mxu0 %v4798_v29  ;;  %4461 = vmatprep.mubr.msk.bf16.mxu0 %vm4982_vm1, %v4981_v15 }
 0xba8   :  { %4459 = vmatprep.subr.bf16.mxu0 %v4981_v15 }
 0xbab   :  { %4460 = vmatpush3.bf16.msra.mxu0 %v4799_v33 }
 0xbac   :  { %4471 = vmatprep.subr.bf16.mxu0 %v4981_v15 }
 0xc79   :  { %v5350_v34 = vpop.f32.mrb[24].mxu0 }
 0xc7a   :  { %v4455_v35 = vpop.f32.mrb[25].mxu0 }
 0xc7b   :  { %v5352_v36 = vpop.f32.mrb[26].mxu0 }
 0xc7c   :  { %v1092_v37 = vpack.c.bf16 %v5352_v36, %v5350_v34  ;;  %v4456_v38 = vpop.f32.mrb[27].mxu0 }
 0xc7e   :  { %4462 = vmatmul.mubr.msk.bf16.vlgmr.msra.gmra.mrb[28].mxu0 %vm86_vm0, %v1092_v37 }
 0xc7f   :  { %4473 = vmatprep.mubr.msk.bf16.mxu0 %vm4982_vm1, %v4981_v15 }
 0xd51   :  { %v1150_v40 = vpop.f32.mrb[28].mxu0 }
 0xd52   :  { %v1151_v41 = vadd.f32 %v4047_v39, %v1150_v40  ;;  %v4463_v42 = vpop.f32.mrb[29].mxu0 }
 0xd53   :  { %v1153_v44 = vpop.f32.mrb[30].mxu0 }
 0xd54   :  { %v1165_v45 = vpack.c.bf16 %v1151_v41, %v1151_v41  ;;  %v1154_v46 = vadd.f32 %v4047_v39, %v1153_v44  ;;  %v4464_v47 = vpop.f32.mrb[31].mxu0 }
 0xd56   :  { %v4756_v48 = vpack.i.bf16 %v1154_v46, %v1151_v41  ;;  %1170 = vrot.lane.b32.xlu1 %v1165_v45, %s5999_s5  ;;  %v5363_v49 = vpack.c.bf16 %v1154_v46, %v1154_v46 }
 0xd58   :  { %4757 = vrot.lane.b32.xlu0 %v4756_v48, %s6000_s16 }
 0xd5a   :  { %1219 = vrot.lane.b32.xlu1 %v5363_v49, %s5999_s5 }
 0xdc8   :  { %v1171_v50 = vpop.permute.xlu1 %1170 }
 0xdc9   :  { %v1176_v53 = vsel %vm217_vm2, %v1171_v50, 0 }
 0xdca   :  { %4466 = vmatpush3.bf16.xpose.msra.mxu1 %v1176_v53  ;;  %v4758_v54 = vpop.permute.xlu0 %4757 }
 0xdcb   :  { %v4760_v55 = vunpack.i.h.bf16 %v4758_v54  ;;  %v4759_v56 = vunpack.i.l.bf16 %v4758_v54  ;;  %4477 = vmatprep.subr.bf16.mxu1 %v4981_v15 }
 0xdcc   :  { %v1220_v57 = vpop.permute.xlu1 %1219 }
 0xdcd   :  { %v5370_v59 = vpack.c.bf16 %v4760_v55, %v4760_v55  ;;  %v5372_v52 = vpack.c.bf16 %v4759_v56, %v4759_v56  ;;  %v1225_v60 = vsel %vm217_vm2, %v1220_v57, 0 }
 0xdce   :  { %4472 = vmatpush3.bf16.xpose.msra.mxu0 %v1225_v60 }
 0xdcf   :  { %1317 = vrot.lane.b32.xlu0 %v5370_v59, %s5999_s5  ;;  %1268 = vrot.lane.b32.xlu1 %v5372_v52, %s5999_s5 }
 0xdd0   :  { %4483 = vmatprep.subr.bf16.mxu0 %v4981_v15 }
 0xdd1   :  { %4468 = vmatmul.mubr.msk.bf16.vlgmr.msra.gmra.mrb[24].mxu1 %vm217_vm2, %v1165_v45 }
 0xdd2   :  { %4479 = vmatprep.mubr.msk.bf16.mxu1 %vm4982_vm1, %v4981_v15 }
 0xdd5   :  { %4474 = vmatmul.mubr.msk.bf16.vlgmr.msra.gmra.mrb[32].mxu0 %vm217_vm2, %v5363_v49 }
 0xdd6   :  { %4485 = vmatprep.mubr.msk.bf16.mxu0 %vm4982_vm1, %v4981_v15 }
 0xe41   :  { %v1318_v61 = vpop.permute.xlu0 %1317  ;;  %v1269_v51 = vpop.permute.xlu1 %1268 }
 0xe42   :  { %v1323_v31 = vsel %vm217_vm2, %v1318_v61, 0  ;;  %v1274_v32 = vsel %vm217_vm2, %v1269_v51, 0 }
 0xe43   :  { %4478 = vmatpush3.bf16.xpose.msra.mxu1 %v1274_v32  ;;  %4484 = vmatpush3.bf16.xpose.msra.mxu0 %v1323_v31 }
 0xe44   :  { %4489 = vmatprep.subr.bf16.mxu1 %v4981_v15  ;;  %4495 = vmatprep.subr.bf16.mxu0 %v4981_v15 }
 0xe4a   :  { %4480 = vmatmul.mubr.msk.bf16.vlgmr.msra.gmra.mrb[28].mxu1 %vm217_vm2, %v5372_v52  ;;  %4486 = vmatmul.mubr.msk.bf16.vlgmr.msra.gmra.mrb[36].mxu0 %vm217_vm2, %v5370_v59 }
 0xe4b   :  { %4491 = vmatprep.mubr.msk.bf16.mxu1 %vm4982_vm1, %v4981_v15  ;;  %4497 = vmatprep.mubr.msk.bf16.mxu0 %vm4982_vm1, %v4981_v15 }
 0xea4   :  { %v1212_v43 = vpop.f32.mrb[24].mxu1 }
 0xea5   :  { %v1365_v62 = vmul.f32 0.25, %v1212_v43  ;;  %v4469_v63 = vpop.f32.mrb[25].mxu1 }
 0xea6   :  { %v1215_v0 = vpop.f32.mrb[26].mxu1 }
 0xea7   :  { %v4470_v2 = vpop.f32.mrb[27].mxu1  ;;  %v1369_v3 = vadd.f32 %v5200_v58, %v1365_v62 }
 0xea8   :  { %v1261_v4 = vpop.f32.mrb[32].mxu0 }
 0xea9   :  { %v1366_v5 = vmul.f32 0.25, %v1261_v4  ;;  %v4475_v6 = vpop.f32.mrb[33].mxu0  ;;  %v1373_v7 = vsel %vm443_vm3, %v1369_v3, -inf }
 0xeaa   :  { %1374 = vmax.xlane.f32.xlu1 %v1373_v7  ;;  %v1264_v8 = vpop.f32.mrb[34].mxu0 }
 0xeab   :  { %v4476_v9 = vpop.f32.mrb[35].mxu0  ;;  %v1370_v10 = vadd.f32 %v5206_v1, %v1366_v5 }
 0xead   :  { %v1376_v12 = vsel %vm443_vm3, %v1370_v10, -inf }
 0xeae   :  { %1377 = vmax.xlane.f32.xlu0 %v1376_v12  ;;  %v4800_v12 = vld [vmem:[%s5995_s8 + $0x10] sm:$0xff]  }
 0xebb   :  { %1421 = vrot.lane.b32.xlu1 %v1165_v45, %s6001_s7 }
 0xf1d   :  { %v1310_v13 = vpop.f32.mrb[28].mxu1  ;;  %v1359_v14 = vpop.f32.mrb[36].mxu0 }
 0xf1e   :  { %v1367_v16 = vmul.f32 0.25, %v1310_v13  ;;  %v1368_v17 = vmul.f32 0.25, %v1359_v14  ;;  %v4481_v58 = vpop.f32.mrb[29].mxu1  ;;  %v4487_v18 = vpop.f32.mrb[37].mxu0 }
 0xf1f   :  { %v1313_v20 = vpop.f32.mrb[30].mxu1  ;;  %v1362_v21 = vpop.f32.mrb[38].mxu0 }
 0xf20   :  { %v4482_v22 = vpop.f32.mrb[31].mxu1  ;;  %v4488_v23 = vpop.f32.mrb[39].mxu0  ;;  %v1371_v24 = vadd.f32 %v5215_v11, %v1367_v16  ;;  %v1372_v1 = vadd.f32 %v5220_v19, %v1368_v17  ;;  %v4801_v16 = vld [vmem:[%s5995_s8 + $0x18] sm:$0xff]  }
 0xf22   :  { %v1379_v25 = vsel %vm443_vm3, %v1371_v24, -inf  ;;  %v1382_v26 = vsel %vm443_vm3, %v1372_v1, -inf }
 0xf23   :  { %1380 = vmax.xlane.f32.xlu0 %v1379_v25 }
 0xf27   :  { %1383 = vmax.xlane.f32.xlu0 %v1382_v26 }
 0xf37   :  { %v1375_v27 = vpop.xlane.xlu1 %1374 }
 0xf38   :  { %v1385_v28 = vsub.f32 %v1369_v3, %v1375_v27 }
 0xf3a   :  { %v1389_v29 = vmul.f32 1.442695, %v1385_v28 }
 0xf3b   :  { %v1422_v30 = vpop.permute.xlu1 %1421  ;;  %v1378_v33 = vpop.xlane.xlu0 %1377 }
 0xf3c   :  { %4867 = vpow2.f32 %v1389_v29  ;;  %v1427_v35 = vsel %vm497_vm4, %v1422_v30, 0  ;;  %v1386_v37 = vsub.f32 %v1370_v10, %v1378_v33 }
 0xf3d   :  { %4490 = vmatpush3.bf16.msra.mxu1 %v1427_v35 }
 0xf3e   :  { %v1391_v38 = vmul.f32 1.442695, %v1386_v37  ;;  %4501 = vmatprep.subr.bf16.mxu1 %v4981_v15 }
 0xf40   :  { %4869 = vpow2.f32 %v1391_v38 }
 0xf46   :  { %v4868_v11 = vpop.eup %4867 }
 0xf47   :  { %v1397_v19 = vsel %vm443_vm3, %v4868_v11, 0.0 }
 0xf48   :  { %1398 = vadd.xlane.f32.xlu1 %v1397_v19 }
 0xf4a   :  { %v4870_v39 = vpop.eup %4869 }
 0xf4b   :  { %v1400_v40 = vsel %vm443_vm3, %v4870_v39, 0.0 }
 0xf4c   :  { %1401 = vadd.xlane.f32.xlu0 %v1400_v40 }
 0xfb0   :  { %v1381_v41 = vpop.xlane.xlu0 %1380 }
 0xfb1   :  { %v1387_v42 = vsub.f32 %v1371_v24, %v1381_v41 }
 0xfb3   :  { %v1393_v44 = vmul.f32 1.442695, %v1387_v42 }
 0xfb4   :  { %v1384_v45 = vpop.xlane.xlu0 %1383 }
 0xfb5   :  { %4871 = vpow2.f32 %v1393_v44  ;;  %v1388_v46 = vsub.f32 %v1372_v1, %v1384_v45 }
 0xfb7   :  { %v1395_v47 = vmul.f32 1.442695, %v1388_v46 }
 0xfb9   :  { %4873 = vpow2.f32 %v1395_v47 }
 0xfbf   :  { %v4872_v48 = vpop.eup %4871 }
 0xfc0   :  { %v1403_v50 = vsel %vm443_vm3, %v4872_v48, 0.0 }
 0xfc1   :  { %1404 = vadd.xlane.f32.xlu1 %v1403_v50 }
 0xfc3   :  { %v4874_v53 = vpop.eup %4873 }
 0xfc4   :  { %v1406_v54 = vsel %vm443_vm3, %v4874_v53, 0.0 }
 0xfc5   :  { %1407 = vadd.xlane.f32.xlu0 %v1406_v54 }
 0xfd2   :  { %1517 = vrot.lane.b32.xlu1 %v5372_v52, %s6001_s7 }
 0xfd5   :  { %v1399_v55 = vpop.xlane.xlu1 %1398 }
 0xfd6   :  { %4875 = vrcp.f32 %v1399_v55  ;;  %1565 = vrot.lane.b32.xlu1 %v5370_v59, %s6001_s7 }
 0xfd9   :  { %v1402_v61 = vpop.xlane.xlu0 %1401 }
 0xfda   :  { %4877 = vrcp.f32 %v1402_v61 }
 0xfdb   :  { %1469 = vrot.lane.b32.xlu0 %v5363_v49, %s6001_s7 }
 0xfe0   :  { %v4876_v56 = vpop.eup %4875 }
 0xfe1   :  { %v1413_v57 = vmul.f32 %v4876_v56, %v4868_v11  ;;  %v4064_v11 = vld [vmem:[%s5996_s2 + $0x1] ss:$0 sm:$0xff] }
 0xfe3   :  { %v1417_v60 = vpack.c.bf16 %v1413_v57, %v1413_v57 }
 0xfe4   :  { %v4878_v52 = vpop.eup %4877 }
 0xfe5   :  { %4492 = vmatmul.mubr.msk.bf16.vlgmr.msra.gmra.mrb[32].mxu1 %vm443_vm3, %v1417_v60  ;;  %v1414_v49 = vmul.f32 %v4878_v52, %v4870_v39  ;;  %v4803_v52 = vld [vmem:[%s5943_s10 + $0x18] sm:$0xff]  }
 0xfe6   :  { %4503 = vmatprep.mubr.msk.bf16.mxu1 %vm4982_vm1, %v4981_v15 }
 0xfe7   :  { %v1418_v2 = vpack.c.bf16 %v1414_v49, %v1414_v49 }
0x104e   :  { %v1405_v51 = vpop.xlane.xlu1 %1404 }
0x104f   :  { %4879 = vrcp.f32 %v1405_v51 }
0x1052   :  { %v1518_v31 = vpop.permute.xlu1 %1517  ;;  %v1408_v32 = vpop.xlane.xlu0 %1407 }
0x1053   :  { %v1523_v59 = vsel %vm497_vm4, %v1518_v31, 0  ;;  %4881 = vrcp.f32 %v1408_v32 }
0x1054   :  { %4502 = vmatpush3.bf16.msra.mxu1 %v1523_v59 }
0x1055   :  { %4513 = vmatprep.subr.bf16.mxu1 %v4981_v15 }
0x1056   :  { %v1470_v43 = vpop.permute.xlu0 %1469  ;;  %v1566_v63 = vpop.permute.xlu1 %1565 }
0x1057   :  { %v1475_v62 = vsel %vm497_vm4, %v1470_v43, 0  ;;  %v1571_v4 = vsel %vm497_vm4, %v1566_v63, 0 }
0x1058   :  { %4496 = vmatpush3.bf16.msra.mxu0 %v1475_v62 }
0x1059   :  { %v4880_v0 = vpop.eup %4879  ;;  %4507 = vmatprep.subr.bf16.mxu0 %v4981_v15 }
0x105a   :  { %v1415_v3 = vmul.f32 %v4880_v0, %v4872_v48 }
0x105b   :  { %4498 = vmatmul.mubr.msk.bf16.vlgmr.msra.gmra.mrb[40].mxu0 %vm443_vm3, %v1418_v2  ;;  %v4070_v2 = vld [vmem:[%s5997_s6 + $0x1] ss:$0 sm:$0xff] }
0x105c   :  { %4508 = vmatpush3.bf16.msra.mxu0 %v1571_v4  ;;  %v1419_v5 = vpack.c.bf16 %v1415_v3, %v1415_v3  ;;  %4509 = vmatprep.mubr.msk.bf16.mxu0 %vm4982_vm1, %v4981_v15 }
0x105d   :  { %v4882_v6 = vpop.eup %4881  ;;  %4521 = vmatprep.subr.bf16.mxu0 %v4981_v15 }
0x105e   :  { %v1416_v7 = vmul.f32 %v4882_v6, %v4874_v53  ;;  %4504 = vmatmul.mubr.msk.bf16.vlgmr.msra.gmra.mrb[36].mxu1 %vm443_vm3, %v1419_v5  ;;  %v4071_v6 = vld [vmem:[%s5998_s28 + $0x1] ss:$0 sm:$0xff] }
0x105f   :  { %4517 = vmatprep.mubr.msk.bf16.mxu1 %vm4982_vm1, %v4981_v15  ;;  %4514 = vmatpush3.bf16.msra.mxu1 %v4800_v12  ;;  %v4804_v12 = vld [vmem:[%s5945_s12 + $0x20] sm:$0xff]  }
0x1060   :  { %v1420_v8 = vpack.c.bf16 %v1416_v7, %v1416_v7  ;;  %4515 = vmatprep.subr.bf16.mxu1 %v4981_v15 }
0x1063   :  { %4510 = vmatmul.mubr.msk.bf16.vlgmr.msra.gmra.mrb[44].mxu0 %vm443_vm3, %v1420_v8  ;;  %4516 = vmatpush3.bf16.msra.mxu1 %v4801_v16  ;;  %v4807_v16 = vld [vmem:[%s5945_s12 + $0x38] sm:$0xff]  }
0x1064   :  { %4525 = vmatprep.mubr.msk.bf16.mxu0 %vm4982_vm1, %v4981_v15  ;;  %4529 = vmatprep.subr.bf16.mxu1 %v4981_v15 }
0x10b8   :  { %v1463_v9 = vpop.f32.mrb[32].mxu1 }
0x10b9   :  { %v4493_v10 = vpop.f32.mrb[33].mxu1 }
0x10ba   :  { %v1466_v13 = vpop.f32.mrb[34].mxu1 }
0x10bb   :  { %v4494_v14 = vpop.f32.mrb[35].mxu1  ;;  %v4805_v13 = vld [vmem:[%s5945_s12 + $0x28] sm:$0xff]  }
0x10bc   :  { %v4806_v14 = vld [vmem:[%s5945_s12 + $0x30] sm:$0xff]  }
0x112e   :  { %v1511_v17 = vpop.f32.mrb[40].mxu0 }
0x112f   :  { %v4499_v58 = vpop.f32.mrb[41].mxu0 }
0x1130   :  { %v1514_v18 = vpop.f32.mrb[42].mxu0 }
0x1131   :  { %v4500_v20 = vpop.f32.mrb[43].mxu0  ;;  %v1559_v21 = vpop.f32.mrb[36].mxu1 }
0x1132   :  { %v4505_v22 = vpop.f32.mrb[37].mxu1 }
0x1133   :  { %v1562_v23 = vpop.f32.mrb[38].mxu1 }
0x1134   :  { %v4506_v24 = vpop.f32.mrb[39].mxu1 }
0x1136   :  { %v1607_v25 = vpop.f32.mrb[44].mxu0 }
0x1137   :  { %v4761_v1 = vpack.i.bf16 %v1607_v25, %v1559_v21  ;;  %v4511_v26 = vpop.f32.mrb[45].mxu0 }
0x1138   :  { %v1610_v27 = vpop.f32.mrb[46].mxu0 }
0x1139   :  { %4762 = vrot.lane.b32.xlu1 %v4761_v1, %s6002_s4  ;;  %v4512_v28 = vpop.f32.mrb[47].mxu0 }
0x11ab   :  { %v4763_v29 = vpop.permute.xlu1 %4762 }
0x11ac   :  { %v4765_v30 = vunpack.i.h.bf16 %v4763_v29  ;;  %v4764_v33 = vunpack.i.l.bf16 %v4763_v29 }
0x11ae   :  { %v1622_v35 = vsel %vm217_vm2, %v1511_v17, %v4765_v30  ;;  %v1621_v37 = vsel %vm217_vm2, %v1463_v9, %v4764_v33  ;;  %v4077_v17 = vld [vmem:[%s5944_s11 + $0x1] ss:$0 sm:$0xff] }
0x11af   :  { %v1628_v38 = vpack.c.bf16 %v1622_v35, %v1621_v37 }
0x11b1   :  { %4518 = vmatmul.mubr.msk.bf16.vlgmr.msra.gmra.mrb[40].mxu1 %vm86_vm0, %v1628_v38 }
0x11b2   :  { %4537 = vmatprep.mubr.msk.bf16.mxu1 %vm4982_vm1, %v4981_v15  ;;  %4530 = vmatpush3.bf16.msra.mxu1 %v4804_v12 }
0x11b3   :  { %4531 = vmatprep.subr.bf16.mxu1 %v4981_v15 }
0x11b6   :  { %4532 = vmatpush3.bf16.msra.mxu1 %v4805_v13 }
0x11b7   :  { %4533 = vmatprep.subr.bf16.mxu1 %v4981_v15 }
0x11ba   :  { %4534 = vmatpush3.bf16.msra.mxu1 %v4806_v14  ;;  %v4099_v14 = vld [vmem:[%s5948_s15 + $0x1] ss:$0 sm:$0xff] }
0x11bb   :  { %4535 = vmatprep.subr.bf16.mxu1 %v4981_v15 }
0x11be   :  { %4536 = vmatpush3.bf16.msra.mxu1 %v4807_v16 }
0x11bf   :  { %4555 = vmatprep.subr.bf16.mxu1 %v4981_v15 }
0x1284   :  { %v1686_v19 = vpop.f32.mrb[40].mxu1 }
0x1285   :  { %v1687_v39 = vadd.f32 %v4064_v11, %v1686_v19  ;;  %v4519_v40 = vpop.f32.mrb[41].mxu1 }
0x1286   :  { %v1689_v41 = vpop.f32.mrb[42].mxu1 }
0x1287   :  { %v1690_v42 = vadd.f32 %v4064_v11, %v1689_v41  ;;  %v4520_v44 = vpop.f32.mrb[43].mxu1  ;;  %v1693_v45 = vadd.f32 %v1687_v39, %v5350_v34 }
0x1289   :  { %v1699_v46 = vsel %vm86_vm0, %v1693_v45, 0.0  ;;  %v1694_v47 = vadd.f32 %v1690_v42, %v5352_v36  ;;  %v4802_v36 = vld [vmem:[%s5943_s10 + $0x10] sm:$0xff]  }
0x128a   :  { %1700 = vadd.xlane.f32.xlu0 %v1699_v46  ;;  %4522 = vmatpush3.bf16.msra.mxu0 %v4802_v36 }
0x128b   :  { %v1702_v48 = vsel %vm86_vm0, %v1694_v47, 0.0  ;;  %4523 = vmatprep.subr.bf16.mxu0 %v4981_v15 }
0x128c   :  { %1703 = vadd.xlane.f32.xlu1 %v1702_v48 }
0x128e   :  { %4524 = vmatpush3.bf16.msra.mxu0 %v4803_v52 }
0x128f   :  { %4541 = vmatprep.subr.bf16.mxu0 %v4981_v15 }
0x1317   :  { %v1701_v50 = vpop.xlane.xlu0 %1700 }
0x1318   :  { %v1705_v53 = vmul.f32 0.03125, %v1701_v50 }
0x1319   :  { %v1704_v54 = vpop.xlane.xlu1 %1703 }
0x131a   :  { %v1707_v55 = vsub.f32 %v1693_v45, %v1705_v53  ;;  %v1706_v56 = vmul.f32 0.03125, %v1704_v54  ;;  %v4090_v45 = vld [vmem:[%s5946_s13 + $0x1] ss:$0 sm:$0xff] }
0x131c   :  { %v1708_v57 = vsub.f32 %v1694_v47, %v1706_v56  ;;  %v1709_v60 = vmul.f32 %v1707_v55, %v1707_v55 }
0x131e   :  { %v1711_v61 = vsel %vm86_vm0, %v1709_v60, 0.0  ;;  %v1710_v51 = vmul.f32 %v1708_v57, %v1708_v57 }
0x131f   :  { %1712 = vadd.xlane.f32.xlu0 %v1711_v61 }
0x1320   :  { %v1714_v34 = vsel %vm86_vm0, %v1710_v51, 0.0 }
0x1323   :  { %1715 = vadd.xlane.f32.xlu0 %v1714_v34 }
0x13ac   :  { %v1713_v31 = vpop.xlane.xlu0 %1712 }
0x13ad   :  { %v1717_v32 = vmul.f32 0.03125, %v1713_v31 }
0x13af   :  { %v1719_v59 = vadd.f32 1e-05, %v1717_v32 }
0x13b0   :  { %v1716_v49 = vpop.xlane.xlu0 %1715 }
0x13b1   :  { %4883 = vrsqrt.f32 %v1719_v59  ;;  %v1718_v43 = vmul.f32 0.03125, %v1716_v49 }
0x13b3   :  { %v1720_v62 = vadd.f32 1e-05, %v1718_v43 }
0x13b5   :  { %4885 = vrsqrt.f32 %v1720_v62  ;;  %v4808_v62 = vld [vmem:[%s5990_s1 + $0x20] sm:$0xff]  }
0x13bb   :  { %v4884_v63 = vpop.eup %4883 }
0x13bc   :  { %v1723_v0 = vmul.f32 %v4884_v63, %v1707_v55  ;;  %v4809_v63 = vld [vmem:[%s5990_s1 + $0x28] sm:$0xff]  }
0x13be   :  { %v1731_v4 = vmul.f32 %v4070_v2, %v1723_v0 }
0x13bf   :  { %v4886_v3 = vpop.eup %4885 }
0x13c0   :  { %v1724_v5 = vmul.f32 %v4886_v3, %v1708_v57  ;;  %v1739_v8 = vadd.f32 %v4071_v6, %v1731_v4 }
0x13c2   :  { %v1732_v7 = vmul.f32 %v4070_v2, %v1724_v5 }
0x13c4   :  { %v1740_v9 = vadd.f32 %v4071_v6, %v1732_v7 }
0x13c6   :  { %v1746_v10 = vpack.c.bf16 %v1740_v9, %v1739_v8 }
0x13c8   :  { %4526 = vmatmul.mubr.msk.bf16.vlgmr.msra.gmra.mrb[48].mxu0 %vm86_vm0, %v1746_v10 }
0x13c9   :  { %4545 = vmatprep.mubr.msk.bf16.mxu0 %vm4982_vm1, %v4981_v15  ;;  %4542 = vmatpush3.bf16.msra.mxu0 %v4808_v62 }
0x13ca   :  { %4543 = vmatprep.subr.bf16.mxu0 %v4981_v15 }
0x13cd   :  { %4544 = vmatpush3.bf16.msra.mxu0 %v4809_v63 }
0x13ce   :  { %4549 = vmatprep.subr.bf16.mxu0 %v4981_v15 }
0x149b   :  { %v1804_v58 = vpop.f32.mrb[48].mxu0 }
0x149c   :  { %v1805_v18 = vadd.f32 %v4077_v17, %v1804_v58  ;;  %v4527_v20 = vpop.f32.mrb[49].mxu0 }
0x149d   :  { %v1807_v21 = vpop.f32.mrb[50].mxu0  ;;  %v4105_v20 = vld [vmem:[%s5993_s30 + $0x2] ss:$0 sm:$0xff] }
0x149e   :  { %v1813_v22 = vmul.f32 0.044715, %v1805_v18  ;;  %v1808_v23 = vadd.f32 %v4077_v17, %v1807_v21  ;;  %v4528_v24 = vpop.f32.mrb[51].mxu0  ;;  %v1811_v19 = vmul.f32 0.5, %v1805_v18 }
0x14a0   :  { %v1815_v25 = vmul.f32 %v1813_v22, %v1805_v18  ;;  %v1814_v1 = vmul.f32 0.044715, %v1808_v23  ;;  %v1812_v39 = vmul.f32 0.5, %v1808_v23 }
0x14a2   :  { %v1817_v26 = vmul.f32 %v1815_v25, %v1805_v18  ;;  %v1816_v27 = vmul.f32 %v1814_v1, %v1808_v23 }
0x14a4   :  { %v1819_v28 = vadd.f32 %v1817_v26, %v1805_v18  ;;  %v1818_v29 = vmul.f32 %v1816_v27, %v1808_v23 }
0x14a6   :  { %v1821_v30 = vmul.f32 0.7978846, %v1819_v28  ;;  %v1820_v33 = vadd.f32 %v1818_v29, %v1808_v23 }
0x14a8   :  { %4887 = vtanh.f32 %v1821_v30  ;;  %v1822_v35 = vmul.f32 0.7978846, %v1820_v33 }
0x14aa   :  { %4889 = vtanh.f32 %v1822_v35 }
0x14b2   :  { %v4888_v37 = vpop.eup %4887 }
0x14b3   :  { %v1825_v38 = vadd.f32 1.0, %v4888_v37 }
0x14b4   :  { %v4890_v11 = vpop.eup %4889 }
0x14b5   :  { %v1826_v40 = vadd.f32 1.0, %v4890_v11  ;;  %v1827_v41 = vmul.f32 %v1825_v38, %v1811_v19 }
0x14b7   :  { %v1828_v42 = vmul.f32 %v1826_v40, %v1812_v39 }
0x14b9   :  { %v1838_v44 = vpack.c.bf16 %v1828_v42, %v1827_v41 }
0x14bb   :  { %4538 = vmatmul.mubr.msk.bf16.vlgmr.msra.gmra.mrb[44].mxu1 %vm935_vm5, %v1838_v44 }
0x14bc   :  { %4557 = vmatprep.mubr.msk.bf16.mxu1 %vm4982_vm1, %v4981_v15 }
0x158e   :  { %v1908_v46 = vpop.f32.mrb[44].mxu1 }
0x158f   :  { %v1909_v47 = vadd.f32 %v4090_v45, %v1908_v46  ;;  %v4539_v48 = vpop.f32.mrb[45].mxu1 }
0x1590   :  { %v1911_v50 = vpop.f32.mrb[46].mxu1 }
0x1591   :  { %v1912_v53 = vadd.f32 %v4090_v45, %v1911_v50  ;;  %v4540_v54 = vpop.f32.mrb[47].mxu1  ;;  %v1915_v55 = vadd.f32 %v1909_v47, %v1739_v8  ;;  %v4098_v8 = vld [vmem:[%s5947_s14 + $0x1] ss:$0 sm:$0xff] }
0x1593   :  { %v1921_v56 = vsel %vm86_vm0, %v1915_v55, 0.0  ;;  %v1916_v57 = vadd.f32 %v1912_v53, %v1740_v9  ;;  %v5573_v53 = vld [vmem:[%s5994_s27] ss:$0 sm:$0xff] }
0x1594   :  { %1922 = vadd.xlane.f32.xlu0 %v1921_v56 }
0x1595   :  { %v1924_v60 = vsel %vm86_vm0, %v1916_v57, 0.0 }
0x1596   :  { %1925 = vadd.xlane.f32.xlu1 %v1924_v60 }
0x1621   :  { %v1923_v61 = vpop.xlane.xlu0 %1922 }
0x1622   :  { %v1927_v51 = vmul.f32 0.03125, %v1923_v61 }
0x1623   :  { %v1926_v34 = vpop.xlane.xlu1 %1925 }
0x1624   :  { %v1929_v36 = vsub.f32 %v1915_v55, %v1927_v51  ;;  %v1928_v52 = vmul.f32 0.03125, %v1926_v34  ;;  %v5580_v34 = vld [vmem:[%s5994_s27 + $0x1] ss:$0 sm:$0xff] }
0x1626   :  { %v1930_v31 = vsub.f32 %v1916_v57, %v1928_v52  ;;  %v1931_v32 = vmul.f32 %v1929_v36, %v1929_v36 }
0x1628   :  { %v1933_v59 = vsel %vm86_vm0, %v1931_v32, 0.0  ;;  %v1932_v49 = vmul.f32 %v1930_v31, %v1930_v31 }
0x1629   :  { %1934 = vadd.xlane.f32.xlu0 %v1933_v59 }
0x162a   :  { %v1936_v43 = vsel %vm86_vm0, %v1932_v49, 0.0 }
0x162b   :  { %1937 = vadd.xlane.f32.xlu1 %v1936_v43 }
0x16b6   :  { %v1935_v0 = vpop.xlane.xlu0 %1934 }
0x16b7   :  { %v1939_v2 = vmul.f32 0.03125, %v1935_v0 }
0x16b8   :  { %v1938_v3 = vpop.xlane.xlu1 %1937 }
0x16b9   :  { %v1941_v4 = vadd.f32 1e-05, %v1939_v2  ;;  %v1940_v5 = vmul.f32 0.03125, %v1938_v3 }
0x16bb   :  { %4891 = vrsqrt.f32 %v1941_v4  ;;  %v1942_v6 = vadd.f32 1e-05, %v1940_v5  ;;  %v5588_v4 = vld [vmem:[%s5994_s27 + $0x2] ss:$0 sm:$0xff] }
0x16bd   :  { %4893 = vrsqrt.f32 %v1942_v6 }
0x16c5   :  { %v4892_v7 = vpop.eup %4891 }
0x16c6   :  { %v1945_v9 = vmul.f32 %v4892_v7, %v1929_v36  ;;  %v5595_v7 = vld [vmem:[%s5994_s27 + $0x3] ss:$0 sm:$0xff]  ;;  %s6004_s27 = sld [smem:[#allocation16_spill]] }
0x16c7   :  { %v4894_v10 = vpop.eup %4893 }
0x16c8   :  { %v1953_v12 = vmul.f32 %v4098_v8, %v1945_v9  ;;  %v1946_v13 = vmul.f32 %v4894_v10, %v1930_v31 }
0x16ca   :  { %v1954_v16 = vmul.f32 %v4098_v8, %v1946_v13  ;;  %v5521_v17 = vadd.f32 %v4099_v14, %v1953_v12 }
0x16cc   :  { %v5523_v58 = vadd.f32 %v4099_v14, %v1954_v16 }
0x16ce   :  { %v1968_v18 = vpack.c.bf16 %v5523_v58, %v5521_v17 }
0x16d0   :  { %4546 = vmatmul.mubr.msk.bf16.vlgmr.msra.gmra.mrb[52].mxu0 %vm86_vm0, %v1968_v18 }
0x16d1   :  { %4551 = vmatprep.mubr.msk.bf16.mxu0 %vm4982_vm1, %v4981_v15 }
0x17a3   :  { %v2026_v21 = vpop.f32.mrb[52].mxu0 }
0x17a4   :  { %v2027_v22 = vadd.f32 %v4105_v20, %v2026_v21  ;;  %v4547_v23 = vpop.f32.mrb[53].mxu0 }
0x17a5   :  { %v2029_v24 = vpop.f32.mrb[54].mxu0 }
0x17a6   :  { %v2041_v25 = vpack.c.bf16 %v2027_v22, %v2027_v22  ;;  %v2030_v1 = vadd.f32 %v4105_v20, %v2029_v24  ;;  %v4548_v26 = vpop.f32.mrb[55].mxu0 }
0x17a8   :  { %v4766_v27 = vpack.i.bf16 %v2030_v1, %v2027_v22  ;;  %2046 = vrot.lane.b32.xlu1 %v2041_v25, %s5999_s5  ;;  %v5534_v28 = vpack.c.bf16 %v2030_v1, %v2030_v1 }
0x17aa   :  { %4767 = vrot.lane.b32.xlu0 %v4766_v27, %s6000_s16 }
0x17ac   :  { %2095 = vrot.lane.b32.xlu1 %v5534_v28, %s5999_s5 }
0x181a   :  { %v2047_v29 = vpop.permute.xlu1 %2046 }
0x181b   :  { %v2052_v30 = vsel %vm217_vm2, %v2047_v29, 0 }
0x181c   :  { %4550 = vmatpush3.bf16.xpose.msra.mxu0 %v2052_v30  ;;  %v4768_v33 = vpop.permute.xlu0 %4767 }
0x181d   :  { %v4770_v35 = vunpack.i.h.bf16 %v4768_v33  ;;  %v4769_v37 = vunpack.i.l.bf16 %v4768_v33  ;;  %4561 = vmatprep.subr.bf16.mxu0 %v4981_v15 }
0x181e   :  { %v2096_v38 = vpop.permute.xlu1 %2095 }
0x181f   :  { %v5541_v11 = vpack.c.bf16 %v4770_v35, %v4770_v35  ;;  %v5543_v19 = vpack.c.bf16 %v4769_v37, %v4769_v37  ;;  %v2101_v39 = vsel %vm217_vm2, %v2096_v38, 0 }
0x1820   :  { %4556 = vmatpush3.bf16.xpose.msra.mxu1 %v2101_v39 }
0x1821   :  { %2193 = vrot.lane.b32.xlu0 %v5541_v11, %s5999_s5  ;;  %2144 = vrot.lane.b32.xlu1 %v5543_v19, %s5999_s5 }
0x1822   :  { %4567 = vmatprep.subr.bf16.mxu1 %v4981_v15 }
0x1823   :  { %4552 = vmatmul.mubr.msk.bf16.vlgmr.msra.gmra.mrb[56].mxu0 %vm217_vm2, %v2041_v25 }
0x1824   :  { %4563 = vmatprep.mubr.msk.bf16.mxu0 %vm4982_vm1, %v4981_v15 }
0x1827   :  { %4558 = vmatmul.mubr.msk.bf16.vlgmr.msra.gmra.mrb[48].mxu1 %vm217_vm2, %v5534_v28 }
0x1828   :  { %4569 = vmatprep.mubr.msk.bf16.mxu1 %vm4982_vm1, %v4981_v15 }
0x1893   :  { %v2194_v40 = vpop.permute.xlu0 %2193  ;;  %v2145_v41 = vpop.permute.xlu1 %2144 }
0x1894   :  { %v2199_v42 = vsel %vm217_vm2, %v2194_v40, 0  ;;  %v2150_v44 = vsel %vm217_vm2, %v2145_v41, 0 }
0x1895   :  { %4562 = vmatpush3.bf16.xpose.msra.mxu0 %v2150_v44  ;;  %4568 = vmatpush3.bf16.xpose.msra.mxu1 %v2199_v42 }
0x1896   :  { %4573 = vmatprep.subr.bf16.mxu0 %v4981_v15  ;;  %4579 = vmatprep.subr.bf16.mxu1 %v4981_v15 }
0x189c   :  { %4564 = vmatmul.mubr.msk.bf16.vlgmr.msra.gmra.mrb[60].mxu0 %vm217_vm2, %v5543_v19  ;;  %4570 = vmatmul.mubr.msk.bf16.vlgmr.msra.gmra.mrb[52].mxu1 %vm217_vm2, %v5541_v11 }
0x189d   :  { %4575 = vmatprep.mubr.msk.bf16.mxu0 %vm4982_vm1, %v4981_v15  ;;  %4581 = vmatprep.mubr.msk.bf16.mxu1 %vm4982_vm1, %v4981_v15 }
0x18f6   :  { %v2088_v45 = vpop.f32.mrb[56].mxu0 }
0x18f7   :  { %v2241_v46 = vmul.f32 0.25, %v2088_v45  ;;  %v4553_v47 = vpop.f32.mrb[57].mxu0 }
0x18f8   :  { %v2091_v48 = vpop.f32.mrb[58].mxu0 }
0x18f9   :  { %v4554_v50 = vpop.f32.mrb[59].mxu0  ;;  %v2245_v54 = vadd.f32 %v5573_v53, %v2241_v46 }
0x18fa   :  { %v2137_v55 = vpop.f32.mrb[48].mxu1 }
0x18fb   :  { %v2242_v56 = vmul.f32 0.25, %v2137_v55  ;;  %v4559_v57 = vpop.f32.mrb[49].mxu1  ;;  %v2249_v60 = vsel %vm443_vm3, %v2245_v54, -inf }
0x18fc   :  { %v2140_v61 = vpop.f32.mrb[50].mxu1  ;;  %2250 = vmax.xlane.f32.xlu1 %v2249_v60 }
0x18fd   :  { %v4560_v51 = vpop.f32.mrb[51].mxu1  ;;  %v2246_v36 = vadd.f32 %v5580_v34, %v2242_v56 }
0x18ff   :  { %v2252_v52 = vsel %vm443_vm3, %v2246_v36, -inf }
0x1900   :  { %2253 = vmax.xlane.f32.xlu0 %v2252_v52 }
0x190d   :  { %2297 = vrot.lane.b32.xlu1 %v2041_v25, %s6001_s7 }
0x196f   :  { %v2186_v31 = vpop.f32.mrb[60].mxu0  ;;  %v2235_v32 = vpop.f32.mrb[52].mxu1 }
0x1970   :  { %v2243_v59 = vmul.f32 0.25, %v2186_v31  ;;  %v2244_v49 = vmul.f32 0.25, %v2235_v32  ;;  %v4565_v43 = vpop.f32.mrb[61].mxu0  ;;  %v4571_v62 = vpop.f32.mrb[53].mxu1 }
0x1971   :  { %v2189_v63 = vpop.f32.mrb[62].mxu0  ;;  %v2238_v0 = vpop.f32.mrb[54].mxu1 }
0x1972   :  { %v4566_v2 = vpop.f32.mrb[63].mxu0  ;;  %v4572_v3 = vpop.f32.mrb[55].mxu1  ;;  %v2247_v5 = vadd.f32 %v5588_v4, %v2243_v59  ;;  %v2248_v8 = vadd.f32 %v5595_v7, %v2244_v49  ;;  %v4810_v49 = vld [vmem:[%s5995_s8 + $0x20] sm:$0xff]   ;;  %v4811_v63 = vld [vmem:[%s5995_s8 + $0x28] sm:$0xff]  }
0x1974   :  { %v2255_v6 = vsel %vm443_vm3, %v2247_v5, -inf  ;;  %v2258_v9 = vsel %vm443_vm3, %v2248_v8, -inf }
0x1975   :  { %2256 = vmax.xlane.f32.xlu0 %v2255_v6 }
0x1979   :  { %2259 = vmax.xlane.f32.xlu0 %v2258_v9 }
0x1989   :  { %v2251_v10 = vpop.xlane.xlu1 %2250 }
0x198a   :  { %v2261_v12 = vsub.f32 %v2245_v54, %v2251_v10 }
0x198c   :  { %v2265_v13 = vmul.f32 1.442695, %v2261_v12 }
0x198d   :  { %v2254_v14 = vpop.xlane.xlu0 %2253  ;;  %v2298_v16 = vpop.permute.xlu1 %2297 }
0x198e   :  { %4895 = vpow2.f32 %v2265_v13  ;;  %v2262_v18 = vsub.f32 %v2246_v36, %v2254_v14  ;;  %v2303_v20 = vsel %vm497_vm4, %v2298_v16, 0 }
0x198f   :  { %4574 = vmatpush3.bf16.msra.mxu0 %v2303_v20 }
0x1990   :  { %v2267_v21 = vmul.f32 1.442695, %v2262_v18  ;;  %4585 = vmatprep.subr.bf16.mxu0 %v4981_v15 }
0x1992   :  { %4897 = vpow2.f32 %v2267_v21 }
0x1998   :  { %v4896_v22 = vpop.eup %4895 }
0x1999   :  { %v2273_v23 = vsel %vm443_vm3, %v4896_v22, 0.0 }
0x199a   :  { %2274 = vadd.xlane.f32.xlu1 %v2273_v23 }
0x199c   :  { %v4898_v24 = vpop.eup %4897 }
0x199d   :  { %v2276_v25 = vsel %vm443_vm3, %v4898_v24, 0.0 }
0x199e   :  { %2277 = vadd.xlane.f32.xlu0 %v2276_v25 }
0x1a02   :  { %v2257_v1 = vpop.xlane.xlu0 %2256 }
0x1a03   :  { %v2263_v26 = vsub.f32 %v2247_v5, %v2257_v1  ;;  %v4122_v1 = vld [vmem:[%s5996_s2 + $0x2] ss:$0 sm:$0xff] }
0x1a05   :  { %v2269_v27 = vmul.f32 1.442695, %v2263_v26 }
0x1a06   :  { %v2260_v29 = vpop.xlane.xlu0 %2259 }
0x1a07   :  { %4899 = vpow2.f32 %v2269_v27  ;;  %v2264_v30 = vsub.f32 %v2248_v8, %v2260_v29 }
0x1a09   :  { %v2271_v33 = vmul.f32 1.442695, %v2264_v30 }
0x1a0b   :  { %4901 = vpow2.f32 %v2271_v33 }
0x1a11   :  { %v4900_v35 = vpop.eup %4899 }
0x1a12   :  { %v2279_v37 = vsel %vm443_vm3, %v4900_v35, 0.0 }
0x1a13   :  { %2280 = vadd.xlane.f32.xlu1 %v2279_v37 }
0x1a15   :  { %v4902_v38 = vpop.eup %4901 }
0x1a16   :  { %v2282_v39 = vsel %vm443_vm3, %v4902_v38, 0.0 }
0x1a17   :  { %2283 = vadd.xlane.f32.xlu0 %v2282_v39 }
0x1a24   :  { %2393 = vrot.lane.b32.xlu1 %v5543_v19, %s6001_s7 }
0x1a27   :  { %v2275_v40 = vpop.xlane.xlu1 %2274 }
0x1a28   :  { %4903 = vrcp.f32 %v2275_v40  ;;  %2441 = vrot.lane.b32.xlu1 %v5541_v11, %s6001_s7 }
0x1a2b   :  { %v2278_v45 = vpop.xlane.xlu0 %2277 }
0x1a2c   :  { %4905 = vrcp.f32 %v2278_v45 }
0x1a2d   :  { %2345 = vrot.lane.b32.xlu0 %v5534_v28, %s6001_s7 }
0x1a32   :  { %v4904_v41 = vpop.eup %4903 }
0x1a33   :  { %v2289_v42 = vmul.f32 %v4904_v41, %v4896_v22 }
0x1a35   :  { %v2293_v44 = vpack.c.bf16 %v2289_v42, %v2289_v42 }
0x1a36   :  { %v4906_v19 = vpop.eup %4905 }
0x1a37   :  { %4576 = vmatmul.mubr.msk.bf16.vlgmr.msra.gmra.mrb[64].mxu0 %vm443_vm3, %v2293_v44  ;;  %v2290_v28 = vmul.f32 %v4906_v19, %v4898_v24 }
0x1a38   :  { %4587 = vmatprep.mubr.msk.bf16.mxu0 %vm4982_vm1, %v4981_v15 }
0x1a39   :  { %v2294_v57 = vpack.c.bf16 %v2290_v28, %v2290_v28  ;;  %v4813_v28 = vld [vmem:[%s5943_s10 + $0x28] sm:$0xff]  }
0x1aa0   :  { %v2281_v46 = vpop.xlane.xlu1 %2280 }
0x1aa1   :  { %4907 = vrcp.f32 %v2281_v46 }
0x1aa4   :  { %v2394_v47 = vpop.permute.xlu1 %2393  ;;  %v2284_v48 = vpop.xlane.xlu0 %2283 }
0x1aa5   :  { %v2399_v11 = vsel %vm497_vm4, %v2394_v47, 0  ;;  %4909 = vrcp.f32 %v2284_v48 }
0x1aa6   :  { %4586 = vmatpush3.bf16.msra.mxu0 %v2399_v11 }
0x1aa7   :  { %4597 = vmatprep.subr.bf16.mxu0 %v4981_v15 }
0x1aa8   :  { %v2346_v50 = vpop.permute.xlu0 %2345  ;;  %v2442_v55 = vpop.permute.xlu1 %2441 }
0x1aa9   :  { %v2351_v54 = vsel %vm497_vm4, %v2346_v50, 0  ;;  %v2447_v61 = vsel %vm497_vm4, %v2442_v55, 0 }
0x1aaa   :  { %4580 = vmatpush3.bf16.msra.mxu1 %v2351_v54 }
0x1aab   :  { %v4908_v56 = vpop.eup %4907  ;;  %4591 = vmatprep.subr.bf16.mxu1 %v4981_v15 }
0x1aac   :  { %v2291_v60 = vmul.f32 %v4908_v56, %v4900_v35 }
0x1aad   :  { %4582 = vmatmul.mubr.msk.bf16.vlgmr.msra.gmra.mrb[56].mxu1 %vm443_vm3, %v2294_v57 }
0x1aae   :  { %4592 = vmatpush3.bf16.msra.mxu1 %v2447_v61  ;;  %v2295_v51 = vpack.c.bf16 %v2291_v60, %v2291_v60  ;;  %4593 = vmatprep.mubr.msk.bf16.mxu1 %vm4982_vm1, %v4981_v15 }
0x1aaf   :  { %v4910_v36 = vpop.eup %4909  ;;  %4605 = vmatprep.subr.bf16.mxu1 %v4981_v15 }
0x1ab0   :  { %v2292_v52 = vmul.f32 %v4910_v36, %v4902_v38  ;;  %4588 = vmatmul.mubr.msk.bf16.vlgmr.msra.gmra.mrb[68].mxu0 %vm443_vm3, %v2295_v51  ;;  %v4128_v36 = vld [vmem:[%s5997_s6 + $0x2] ss:$0 sm:$0xff] }
0x1ab1   :  { %4601 = vmatprep.mubr.msk.bf16.mxu0 %vm4982_vm1, %v4981_v15  ;;  %4598 = vmatpush3.bf16.msra.mxu0 %v4810_v49 }
0x1ab2   :  { %v2296_v31 = vpack.c.bf16 %v2292_v52, %v2292_v52  ;;  %4599 = vmatprep.subr.bf16.mxu0 %v4981_v15 }
0x1ab5   :  { %4594 = vmatmul.mubr.msk.bf16.vlgmr.msra.gmra.mrb[60].mxu1 %vm443_vm3, %v2296_v31  ;;  %4600 = vmatpush3.bf16.msra.mxu0 %v4811_v63 }
0x1ab6   :  { %4609 = vmatprep.mubr.msk.bf16.mxu1 %vm4982_vm1, %v4981_v15  ;;  %4613 = vmatprep.subr.bf16.mxu0 %v4981_v15 }
0x1b0a   :  { %v2339_v32 = vpop.f32.mrb[64].mxu0 }
0x1b0b   :  { %v4577_v59 = vpop.f32.mrb[65].mxu0 }
0x1b0c   :  { %v2342_v43 = vpop.f32.mrb[66].mxu0  ;;  %v4129_v59 = vld [vmem:[%s5998_s28 + $0x2] ss:$0 sm:$0xff] }
0x1b0d   :  { %v4578_v62 = vpop.f32.mrb[67].mxu0 }
0x1b80   :  { %v2387_v0 = vpop.f32.mrb[56].mxu1 }
0x1b81   :  { %v4583_v2 = vpop.f32.mrb[57].mxu1 }
0x1b82   :  { %v2390_v3 = vpop.f32.mrb[58].mxu1  ;;  %v4815_v2 = vld [vmem:[%s5945_s12 + $0x48] sm:$0xff]  }
0x1b83   :  { %v4584_v5 = vpop.f32.mrb[59].mxu1  ;;  %v2435_v6 = vpop.f32.mrb[68].mxu0  ;;  %v4816_v3 = vld [vmem:[%s5945_s12 + $0x50] sm:$0xff]  }
0x1b84   :  { %v4589_v8 = vpop.f32.mrb[69].mxu0  ;;  %v4817_v5 = vld [vmem:[%s5945_s12 + $0x58] sm:$0xff]  }
0x1b85   :  { %v2438_v9 = vpop.f32.mrb[70].mxu0 }
0x1b86   :  { %v4590_v10 = vpop.f32.mrb[71].mxu0 }
0x1b88   :  { %v2483_v12 = vpop.f32.mrb[60].mxu1 }
0x1b89   :  { %v4771_v13 = vpack.i.bf16 %v2483_v12, %v2435_v6  ;;  %v4595_v14 = vpop.f32.mrb[61].mxu1  ;;  %v4135_v6 = vld [vmem:[%s5944_s11 + $0x2] ss:$0 sm:$0xff] }
0x1b8a   :  { %v2486_v16 = vpop.f32.mrb[62].mxu1 }
0x1b8b   :  { %v4596_v18 = vpop.f32.mrb[63].mxu1  ;;  %4772 = vrot.lane.b32.xlu1 %v4771_v13, %s6002_s4 }
0x1bfd   :  { %v4773_v20 = vpop.permute.xlu1 %4772 }
0x1bfe   :  { %v4775_v21 = vunpack.i.h.bf16 %v4773_v20  ;;  %v4774_v22 = vunpack.i.l.bf16 %v4773_v20 }
0x1c00   :  { %v2498_v23 = vsel %vm217_vm2, %v2387_v0, %v4775_v21  ;;  %v2497_v24 = vsel %vm217_vm2, %v2339_v32, %v4774_v22  ;;  %v4814_v0 = vld [vmem:[%s5945_s12 + $0x40] sm:$0xff]  }
0x1c01   :  { %v2504_v25 = vpack.c.bf16 %v2498_v23, %v2497_v24 }
0x1c03   :  { %4602 = vmatmul.mubr.msk.bf16.vlgmr.msra.gmra.mrb[72].mxu0 %vm86_vm0, %v2504_v25 }
0x1c04   :  { %4621 = vmatprep.mubr.msk.bf16.mxu0 %vm4982_vm1, %v4981_v15  ;;  %4614 = vmatpush3.bf16.msra.mxu0 %v4814_v0 }
0x1c05   :  { %4615 = vmatprep.subr.bf16.mxu0 %v4981_v15 }
0x1c08   :  { %4616 = vmatpush3.bf16.msra.mxu0 %v4815_v2  ;;  %v4156_v2 = vld [vmem:[%s5947_s14 + $0x2] ss:$0 sm:$0xff] }
0x1c09   :  { %4617 = vmatprep.subr.bf16.mxu0 %v4981_v15 }
0x1c0c   :  { %4618 = vmatpush3.bf16.msra.mxu0 %v4816_v3 }
0x1c0d   :  { %4619 = vmatprep.subr.bf16.mxu0 %v4981_v15 }
0x1c10   :  { %4620 = vmatpush3.bf16.msra.mxu0 %v4817_v5 }
0x1c11   :  { %4639 = vmatprep.subr.bf16.mxu0 %v4981_v15 }
0x1cd6   :  { %v2562_v26 = vpop.f32.mrb[72].mxu0 }
0x1cd7   :  { %v2563_v27 = vadd.f32 %v4122_v1, %v2562_v26  ;;  %v4603_v29 = vpop.f32.mrb[73].mxu0 }
0x1cd8   :  { %v2565_v30 = vpop.f32.mrb[74].mxu0 }
0x1cd9   :  { %v2566_v33 = vadd.f32 %v4122_v1, %v2565_v30  ;;  %v4604_v35 = vpop.f32.mrb[75].mxu0  ;;  %v2569_v37 = vadd.f32 %v2563_v27, %v5521_v17 }
0x1cdb   :  { %v2575_v38 = vsel %vm86_vm0, %v2569_v37, 0.0  ;;  %v2570_v39 = vadd.f32 %v2566_v33, %v5523_v58  ;;  %v4812_v58 = vld [vmem:[%s5943_s10 + $0x20] sm:$0xff]  }
0x1cdc   :  { %2576 = vadd.xlane.f32.xlu0 %v2575_v38  ;;  %4606 = vmatpush3.bf16.msra.mxu1 %v4812_v58 }
0x1cdd   :  { %v2578_v40 = vsel %vm86_vm0, %v2570_v39, 0.0  ;;  %4607 = vmatprep.subr.bf16.mxu1 %v4981_v15 }
0x1cde   :  { %2579 = vadd.xlane.f32.xlu1 %v2578_v40 }
0x1ce0   :  { %4608 = vmatpush3.bf16.msra.mxu1 %v4813_v28 }
0x1ce1   :  { %4625 = vmatprep.subr.bf16.mxu1 %v4981_v15 }
0x1d69   :  { %v2577_v41 = vpop.xlane.xlu0 %2576 }
0x1d6a   :  { %v2581_v42 = vmul.f32 0.03125, %v2577_v41  ;;  %v4148_v41 = vld [vmem:[%s5946_s13 + $0x2] ss:$0 sm:$0xff] }
0x1d6b   :  { %v2580_v44 = vpop.xlane.xlu1 %2579 }
0x1d6c   :  { %v2583_v45 = vsub.f32 %v2569_v37, %v2581_v42  ;;  %v2582_v46 = vmul.f32 0.03125, %v2580_v44 }
0x1d6e   :  { %v2584_v19 = vsub.f32 %v2570_v39, %v2582_v46  ;;  %v2585_v47 = vmul.f32 %v2583_v45, %v2583_v45 }
0x1d70   :  { %v2587_v48 = vsel %vm86_vm0, %v2585_v47, 0.0  ;;  %v2586_v11 = vmul.f32 %v2584_v19, %v2584_v19 }
0x1d71   :  { %2588 = vadd.xlane.f32.xlu0 %v2587_v48 }
0x1d72   :  { %v2590_v17 = vsel %vm86_vm0, %v2586_v11, 0.0 }
0x1d75   :  { %2591 = vadd.xlane.f32.xlu0 %v2590_v17 }
0x1dfe   :  { %v2589_v50 = vpop.xlane.xlu0 %2588 }
0x1dff   :  { %v2593_v54 = vmul.f32 0.03125, %v2589_v50 }
0x1e01   :  { %v2595_v55 = vadd.f32 1e-05, %v2593_v54 }
0x1e02   :  { %v2592_v56 = vpop.xlane.xlu0 %2591 }
0x1e03   :  { %4911 = vrsqrt.f32 %v2595_v55  ;;  %v2594_v57 = vmul.f32 0.03125, %v2592_v56 }
0x1e05   :  { %v2596_v60 = vadd.f32 1e-05, %v2594_v57 }
0x1e07   :  { %4913 = vrsqrt.f32 %v2596_v60 }
0x1e0d   :  { %v4912_v61 = vpop.eup %4911 }
0x1e0e   :  { %v2599_v51 = vmul.f32 %v4912_v61, %v2583_v45 }
0x1e10   :  { %v2607_v31 = vmul.f32 %v4128_v36, %v2599_v51 }
0x1e11   :  { %v4914_v52 = vpop.eup %4913 }
0x1e12   :  { %v2600_v32 = vmul.f32 %v4914_v52, %v2584_v19  ;;  %v2615_v43 = vadd.f32 %v4129_v59, %v2607_v31  ;;  %v4818_v52 = vld [vmem:[%s5950_s17] sm:$0xff]   ;;  %v4819_v31 = vld [vmem:[%s5950_s17 + $0x8] sm:$0xff]  }
0x1e14   :  { %v2608_v49 = vmul.f32 %v4128_v36, %v2600_v32 }
0x1e16   :  { %v2616_v62 = vadd.f32 %v4129_v59, %v2608_v49 }
0x1e18   :  { %v2622_v63 = vpack.c.bf16 %v2616_v62, %v2615_v43 }
0x1e1a   :  { %4610 = vmatmul.mubr.msk.bf16.vlgmr.msra.gmra.mrb[64].mxu1 %vm86_vm0, %v2622_v63 }
0x1e1b   :  { %4629 = vmatprep.mubr.msk.bf16.mxu1 %vm4982_vm1, %v4981_v15  ;;  %4626 = vmatpush3.bf16.msra.mxu1 %v4818_v52 }
0x1e1c   :  { %4627 = vmatprep.subr.bf16.mxu1 %v4981_v15 }
0x1e1f   :  { %4628 = vmatpush3.bf16.msra.mxu1 %v4819_v31 }
0x1e20   :  { %4633 = vmatprep.subr.bf16.mxu1 %v4981_v15 }
0x1eed   :  { %v2680_v8 = vpop.f32.mrb[64].mxu1 }
0x1eee   :  { %v2681_v9 = vadd.f32 %v4135_v6, %v2680_v8  ;;  %v4611_v10 = vpop.f32.mrb[65].mxu1 }
0x1eef   :  { %v2683_v12 = vpop.f32.mrb[66].mxu1 }
0x1ef0   :  { %v2689_v13 = vmul.f32 0.044715, %v2681_v9  ;;  %v2684_v14 = vadd.f32 %v4135_v6, %v2683_v12  ;;  %v4612_v16 = vpop.f32.mrb[67].mxu1  ;;  %v2687_v33 = vmul.f32 0.5, %v2681_v9 }
0x1ef1   :  { %v4820_v16 = vld [vmem:[%s5952_s19] sm:$0xff]  }
0x1ef2   :  { %v2691_v18 = vmul.f32 %v2689_v13, %v2681_v9  ;;  %v2690_v20 = vmul.f32 0.044715, %v2684_v14  ;;  %v2688_v35 = vmul.f32 0.5, %v2684_v14 }
0x1ef4   :  { %v2693_v21 = vmul.f32 %v2691_v18, %v2681_v9  ;;  %v2692_v22 = vmul.f32 %v2690_v20, %v2684_v14  ;;  %v4158_v18 = vld [vmem:[%s5951_s18] ss:$0 sm:$0xff] }
0x1ef6   :  { %v2695_v23 = vadd.f32 %v2693_v21, %v2681_v9  ;;  %v2694_v24 = vmul.f32 %v2692_v22, %v2684_v14  ;;  %v4157_v9 = vld [vmem:[%s5948_s15 + $0x2] ss:$0 sm:$0xff] }
0x1ef8   :  { %v2697_v25 = vmul.f32 0.7978846, %v2695_v23  ;;  %v2696_v1 = vadd.f32 %v2694_v24, %v2684_v14 }
0x1efa   :  { %4915 = vtanh.f32 %v2697_v25  ;;  %v2698_v26 = vmul.f32 0.7978846, %v2696_v1 }
0x1efc   :  { %4917 = vtanh.f32 %v2698_v26  ;;  %v4821_v26 = vld [vmem:[%s5990_s1 + $0x30] sm:$0xff]  }
0x1f04   :  { %v4916_v27 = vpop.eup %4915 }
0x1f05   :  { %v2701_v29 = vadd.f32 1.0, %v4916_v27  ;;  %v4822_v27 = vld [vmem:[%s5990_s1 + $0x38] sm:$0xff]  }
0x1f06   :  { %v4918_v30 = vpop.eup %4917 }
0x1f07   :  { %v2702_v37 = vadd.f32 1.0, %v4918_v30  ;;  %v2703_v38 = vmul.f32 %v2701_v29, %v2687_v33  ;;  %v4162_v29 = vld [vmem:[%s5953_s20] ss:$0 sm:$0xff] }
0x1f09   :  { %v2704_v39 = vmul.f32 %v2702_v37, %v2688_v35 }
0x1f0b   :  { %v2714_v40 = vpack.c.bf16 %v2704_v39, %v2703_v38 }
0x1f0d   :  { %4622 = vmatmul.mubr.msk.bf16.vlgmr.msra.gmra.mrb[76].mxu0 %vm935_vm5, %v2714_v40 }
0x1f0e   :  { %4643 = vmatprep.mubr.msk.bf16.mxu0 %vm4982_vm1, %v4981_v15  ;;  %4640 = vmatpush3.bf16.msra.mxu0 %v4821_v26 }
0x1f0f   :  { %4641 = vmatprep.subr.bf16.mxu0 %v4981_v15 }
0x1f12   :  { %4642 = vmatpush3.bf16.msra.mxu0 %v4822_v27 }
0x1f13   :  { %4653 = vmatprep.subr.bf16.mxu0 %v4981_v15 }
0x1fe0   :  { %v2784_v42 = vpop.f32.mrb[76].mxu0 }
0x1fe1   :  { %v2785_v44 = vadd.f32 %v4148_v41, %v2784_v42  ;;  %v4623_v45 = vpop.f32.mrb[77].mxu0 }
0x1fe2   :  { %v2787_v46 = vpop.f32.mrb[78].mxu0 }
0x1fe3   :  { %v2788_v19 = vadd.f32 %v4148_v41, %v2787_v46  ;;  %v4624_v47 = vpop.f32.mrb[79].mxu0  ;;  %v2791_v48 = vadd.f32 %v2785_v44, %v2615_v43  ;;  %v4170_v41 = vld [vmem:[%s5993_s30 + $0x3] ss:$0 sm:$0xff] }
0x1fe5   :  { %v2797_v11 = vsel %vm86_vm0, %v2791_v48, 0.0  ;;  %v2792_v17 = vadd.f32 %v2788_v19, %v2616_v62 }
0x1fe6   :  { %2798 = vadd.xlane.f32.xlu0 %v2797_v11 }
0x1fe7   :  { %v2800_v58 = vsel %vm86_vm0, %v2792_v17, 0.0 }
0x1fe8   :  { %2801 = vadd.xlane.f32.xlu1 %v2800_v58 }
0x2073   :  { %v2799_v28 = vpop.xlane.xlu0 %2798 }
0x2074   :  { %v2803_v50 = vmul.f32 0.03125, %v2799_v28 }
0x2075   :  { %v2802_v54 = vpop.xlane.xlu1 %2801 }
0x2076   :  { %v2805_v55 = vsub.f32 %v2791_v48, %v2803_v50  ;;  %v2804_v56 = vmul.f32 0.03125, %v2802_v54 }
0x2078   :  { %v2806_v57 = vsub.f32 %v2792_v17, %v2804_v56  ;;  %v2807_v60 = vmul.f32 %v2805_v55, %v2805_v55 }
0x207a   :  { %v2809_v61 = vsel %vm86_vm0, %v2807_v60, 0.0  ;;  %v2808_v51 = vmul.f32 %v2806_v57, %v2806_v57 }
0x207b   :  { %2810 = vadd.xlane.f32.xlu0 %v2809_v61 }
0x207c   :  { %v2812_v36 = vsel %vm86_vm0, %v2808_v51, 0.0 }
0x207d   :  { %2813 = vadd.xlane.f32.xlu1 %v2812_v36 }
0x2108   :  { %v2811_v32 = vpop.xlane.xlu0 %2810 }
0x2109   :  { %v2815_v59 = vmul.f32 0.03125, %v2811_v32 }
0x210a   :  { %v2814_v49 = vpop.xlane.xlu1 %2813 }
0x210b   :  { %v2817_v43 = vadd.f32 1e-05, %v2815_v59  ;;  %v2816_v62 = vmul.f32 0.03125, %v2814_v49 }
0x210d   :  { %4919 = vrsqrt.f32 %v2817_v43  ;;  %v2818_v63 = vadd.f32 1e-05, %v2816_v62 }
0x210f   :  { %4921 = vrsqrt.f32 %v2818_v63 }
0x2117   :  { %v4920_v0 = vpop.eup %4919 }
0x2118   :  { %v2821_v3 = vmul.f32 %v4920_v0, %v2805_v55 }
0x2119   :  { %v4922_v5 = vpop.eup %4921 }
0x211a   :  { %v2829_v6 = vmul.f32 %v4156_v2, %v2821_v3  ;;  %v2822_v8 = vmul.f32 %v4922_v5, %v2806_v57 }
0x211c   :  { %v2830_v10 = vmul.f32 %v4156_v2, %v2822_v8  ;;  %v2837_v12 = vadd.f32 %v4157_v9, %v2829_v6 }
0x211e   :  { %v2838_v13 = vadd.f32 %v4157_v9, %v2830_v10 }
0x2120   :  { %v2843_v14 = vpack.c.bf16 %v2838_v13, %v2837_v12 }
0x2122   :  { %4630 = vmatmul.mubr.msk.bf16.vlgmr.msra.gmra.mrb[68].mxu1 %vm86_vm0, %v2843_v14 }
0x2123   :  { %4635 = vmatprep.mubr.msk.bf16.mxu1 %vm4982_vm1, %v4981_v15  ;;  %4634 = vmatpush3.bf16.msra.mxu1 %v4820_v16 }
0x2124   :  { %4647 = vmatprep.subr.bf16.mxu1 %v4981_v15 }
0x21f5   :  { %v2900_v20 = vpop.f32.mrb[68].mxu1 }
0x21f6   :  { %v4631_v21 = vpop.f32.mrb[69].mxu1  ;;  %v2901_v23 = vadd.f32 %v4158_v18, %v2900_v20 }
0x21f7   :  { %v2903_v22 = vpop.f32.mrb[70].mxu1 }
0x21f8   :  { %v2904_v24 = vadd.f32 %v4158_v18, %v2903_v22  ;;  %v4632_v25 = vpop.f32.mrb[71].mxu1 }
0x21fa   :  { %v2909_v1 = vpack.c.bf16 %v2904_v24, %v2901_v23 }
0x21fc   :  { %4636 = vmatmul.mubr.msk.bf16.vlgmr.msra.gmra.mrb[72].mxu1 %vm217_vm2, %v2909_v1 }
0x21fd   :  { %4649 = vmatprep.mubr.msk.bf16.mxu1 %vm4982_vm1, %v4981_v15 }
0x22cf   :  { %v2960_v30 = vpop.f32.mrb[72].mxu1 }
0x22d0   :  { %v4637_v33 = vpop.f32.mrb[73].mxu1  ;;  %v5736_v37 = vadd.f32 %v4162_v29, %v2960_v30 }
0x22d1   :  { %v2963_v35 = vpop.f32.mrb[74].mxu1 }
0x22d2   :  { %v5738_v38 = vadd.f32 %v4162_v29, %v2963_v35  ;;  %v4638_v39 = vpop.f32.mrb[75].mxu1 }
0x22d4   :  { %v2972_v40 = vpack.c.bf16 %v5738_v38, %v5736_v37 }
0x22d6   :  { %4644 = vmatmul.mubr.msk.bf16.vlgmr.msra.gmra.mrb[80].mxu0 %vm86_vm0, %v2972_v40 }
0x22d7   :  { %4655 = vmatprep.mubr.msk.bf16.mxu0 %vm4982_vm1, %v4981_v15 }
0x23a9   :  { %v3030_v42 = vpop.f32.mrb[80].mxu0 }
0x23aa   :  { %v3031_v44 = vadd.f32 %v4170_v41, %v3030_v42  ;;  %v4645_v45 = vpop.f32.mrb[81].mxu0 }
0x23ab   :  { %v3033_v46 = vpop.f32.mrb[82].mxu0 }
0x23ac   :  { %v3045_v19 = vpack.c.bf16 %v3031_v44, %v3031_v44  ;;  %v3034_v47 = vadd.f32 %v4170_v41, %v3033_v46  ;;  %v4646_v48 = vpop.f32.mrb[83].mxu0 }
0x23ae   :  { %v4776_v11 = vpack.i.bf16 %v3034_v47, %v3031_v44  ;;  %3050 = vrot.lane.b32.xlu1 %v3045_v19, %s5999_s5  ;;  %v5749_v17 = vpack.c.bf16 %v3034_v47, %v3034_v47 }
0x23b0   :  { %4777 = vrot.lane.b32.xlu0 %v4776_v11, %s6000_s16 }
0x23b2   :  { %3099 = vrot.lane.b32.xlu1 %v5749_v17, %s5999_s5 }
0x2420   :  { %v3051_v58 = vpop.permute.xlu1 %3050 }
0x2421   :  { %v3056_v28 = vsel %vm217_vm2, %v3051_v58, 0 }
0x2422   :  { %4648 = vmatpush3.bf16.xpose.msra.mxu1 %v3056_v28  ;;  %v4778_v50 = vpop.permute.xlu0 %4777 }
0x2423   :  { %v4780_v54 = vunpack.i.h.bf16 %v4778_v50  ;;  %v4779_v55 = vunpack.i.l.bf16 %v4778_v50  ;;  %4659 = vmatprep.subr.bf16.mxu1 %v4981_v15 }
0x2424   :  { %v3100_v56 = vpop.permute.xlu1 %3099 }
0x2425   :  { %v5756_v57 = vpack.c.bf16 %v4780_v54, %v4780_v54  ;;  %v5758_v60 = vpack.c.bf16 %v4779_v55, %v4779_v55  ;;  %v3105_v61 = vsel %vm217_vm2, %v3100_v56, 0 }
0x2426   :  { %4654 = vmatpush3.bf16.xpose.msra.mxu0 %v3105_v61 }
0x2427   :  { %3197 = vrot.lane.b32.xlu0 %v5756_v57, %s5999_s5  ;;  %3148 = vrot.lane.b32.xlu1 %v5758_v60, %s5999_s5 }
0x2428   :  { %4665 = vmatprep.subr.bf16.mxu0 %v4981_v15 }
0x2429   :  { %4650 = vmatmul.mubr.msk.bf16.vlgmr.msra.gmra.mrb[76].mxu1 %vm217_vm2, %v3045_v19 }
0x242a   :  { %4661 = vmatprep.mubr.msk.bf16.mxu1 %vm4982_vm1, %v4981_v15 }
0x242d   :  { %4656 = vmatmul.mubr.msk.bf16.vlgmr.msra.gmra.mrb[84].mxu0 %vm217_vm2, %v5749_v17 }
0x242e   :  { %4667 = vmatprep.mubr.msk.bf16.mxu0 %vm4982_vm1, %v4981_v15 }
0x2499   :  { %v3198_v51 = vpop.permute.xlu0 %3197  ;;  %v3149_v36 = vpop.permute.xlu1 %3148 }
0x249a   :  { %v3203_v52 = vsel %vm217_vm2, %v3198_v51, 0  ;;  %v3154_v31 = vsel %vm217_vm2, %v3149_v36, 0 }
0x249b   :  { %4660 = vmatpush3.bf16.xpose.msra.mxu1 %v3154_v31  ;;  %4666 = vmatpush3.bf16.xpose.msra.mxu0 %v3203_v52 }
0x249c   :  { %4671 = vmatprep.subr.bf16.mxu1 %v4981_v15  ;;  %4677 = vmatprep.subr.bf16.mxu0 %v4981_v15 }
0x24a2   :  { %4662 = vmatmul.mubr.msk.bf16.vlgmr.msra.gmra.mrb[80].mxu1 %vm217_vm2, %v5758_v60  ;;  %4668 = vmatmul.mubr.msk.bf16.vlgmr.msra.gmra.mrb[88].mxu0 %vm217_vm2, %v5756_v57 }
0x24a3   :  { %4673 = vmatprep.mubr.msk.bf16.mxu1 %vm4982_vm1, %v4981_v15  ;;  %4679 = vmatprep.mubr.msk.bf16.mxu0 %vm4982_vm1, %v4981_v15 }
0x24fc   :  { %v3092_v32 = vpop.f32.mrb[76].mxu1 }
0x24fd   :  { %v3245_v59 = vmul.f32 0.25, %v3092_v32  ;;  %v4651_v49 = vpop.f32.mrb[77].mxu1 }
0x24fe   :  { %v3095_v43 = vpop.f32.mrb[78].mxu1 }
0x24ff   :  { %v4652_v62 = vpop.f32.mrb[79].mxu1  ;;  %v3249_v63 = vadd.f32 %v5573_v53, %v3245_v59 }
0x2500   :  { %v3141_v0 = vpop.f32.mrb[84].mxu0 }
0x2501   :  { %v3246_v2 = vmul.f32 0.25, %v3141_v0  ;;  %v4657_v3 = vpop.f32.mrb[85].mxu0  ;;  %v3253_v5 = vsel %vm443_vm3, %v3249_v63, -inf }
0x2502   :  { %3254 = vmax.xlane.f32.xlu1 %v3253_v5  ;;  %v3144_v6 = vpop.f32.mrb[86].mxu0 }
0x2503   :  { %v4658_v8 = vpop.f32.mrb[87].mxu0  ;;  %v3250_v9 = vadd.f32 %v5580_v34, %v3246_v2 }
0x2505   :  { %v3256_v10 = vsel %vm443_vm3, %v3250_v9, -inf }
0x2506   :  { %3257 = vmax.xlane.f32.xlu0 %v3256_v10  ;;  %v4823_v10 = vld [vmem:[%s5995_s8 + $0x30] sm:$0xff]  }
0x2513   :  { %3301 = vrot.lane.b32.xlu1 %v3045_v19, %s6001_s7 }
0x2575   :  { %v3190_v12 = vpop.f32.mrb[80].mxu1  ;;  %v3239_v13 = vpop.f32.mrb[88].mxu0 }
0x2576   :  { %v3247_v14 = vmul.f32 0.25, %v3190_v12  ;;  %v3248_v16 = vmul.f32 0.25, %v3239_v13  ;;  %v4663_v53 = vpop.f32.mrb[81].mxu1  ;;  %v4669_v18 = vpop.f32.mrb[89].mxu0 }
0x2577   :  { %v3193_v20 = vpop.f32.mrb[82].mxu1  ;;  %v3242_v21 = vpop.f32.mrb[90].mxu0 }
0x2578   :  { %v4664_v22 = vpop.f32.mrb[83].mxu1  ;;  %v4670_v23 = vpop.f32.mrb[91].mxu0  ;;  %v3251_v24 = vadd.f32 %v5588_v4, %v3247_v14  ;;  %v3252_v34 = vadd.f32 %v5595_v7, %v3248_v16  ;;  %v4824_v14 = vld [vmem:[%s5995_s8 + $0x38] sm:$0xff]  }
0x257a   :  { %v3259_v25 = vsel %vm443_vm3, %v3251_v24, -inf  ;;  %v3262_v1 = vsel %vm443_vm3, %v3252_v34, -inf }
0x257b   :  { %3260 = vmax.xlane.f32.xlu0 %v3259_v25 }
0x257f   :  { %3263 = vmax.xlane.f32.xlu0 %v3262_v1 }
0x258f   :  { %v3255_v26 = vpop.xlane.xlu1 %3254 }
0x2590   :  { %v3265_v27 = vsub.f32 %v3249_v63, %v3255_v26 }
0x2592   :  { %v3269_v29 = vmul.f32 1.442695, %v3265_v27 }
0x2593   :  { %v3302_v30 = vpop.permute.xlu1 %3301  ;;  %v3258_v33 = vpop.xlane.xlu0 %3257 }
0x2594   :  { %4923 = vpow2.f32 %v3269_v29  ;;  %v3307_v35 = vsel %vm497_vm4, %v3302_v30, 0  ;;  %v3266_v39 = vsub.f32 %v3250_v9, %v3258_v33 }
0x2595   :  { %4672 = vmatpush3.bf16.msra.mxu1 %v3307_v35 }
0x2596   :  { %v3271_v40 = vmul.f32 1.442695, %v3266_v39  ;;  %4683 = vmatprep.subr.bf16.mxu1 %v4981_v15 }
0x2598   :  { %4925 = vpow2.f32 %v3271_v40 }
0x259e   :  { %v4924_v4 = vpop.eup %4923 }
0x259f   :  { %v3277_v7 = vsel %vm443_vm3, %v4924_v4, 0.0 }
0x25a0   :  { %3278 = vadd.xlane.f32.xlu1 %v3277_v7 }
0x25a2   :  { %v4926_v41 = vpop.eup %4925 }
0x25a3   :  { %v3280_v42 = vsel %vm443_vm3, %v4926_v41, 0.0 }
0x25a4   :  { %3281 = vadd.xlane.f32.xlu0 %v3280_v42 }
0x2608   :  { %v3261_v44 = vpop.xlane.xlu0 %3260 }
0x2609   :  { %v3267_v45 = vsub.f32 %v3251_v24, %v3261_v44 }
0x260b   :  { %v3273_v46 = vmul.f32 1.442695, %v3267_v45 }
0x260c   :  { %v3264_v19 = vpop.xlane.xlu0 %3263 }
0x260d   :  { %4927 = vpow2.f32 %v3273_v46  ;;  %v3268_v47 = vsub.f32 %v3252_v34, %v3264_v19 }
0x260f   :  { %v3275_v48 = vmul.f32 1.442695, %v3268_v47 }
0x2611   :  { %4929 = vpow2.f32 %v3275_v48 }
0x2617   :  { %v4928_v11 = vpop.eup %4927 }
0x2618   :  { %v3283_v58 = vsel %vm443_vm3, %v4928_v11, 0.0 }
0x2619   :  { %3284 = vadd.xlane.f32.xlu1 %v3283_v58 }
0x261b   :  { %v4930_v28 = vpop.eup %4929 }
0x261c   :  { %v3286_v50 = vsel %vm443_vm3, %v4930_v28, 0.0 }
0x261d   :  { %3287 = vadd.xlane.f32.xlu0 %v3286_v50 }
0x262a   :  { %3397 = vrot.lane.b32.xlu1 %v5758_v60, %s6001_s7 }
0x262d   :  { %v3279_v54 = vpop.xlane.xlu1 %3278 }
0x262e   :  { %4931 = vrcp.f32 %v3279_v54  ;;  %3445 = vrot.lane.b32.xlu1 %v5756_v57, %s6001_s7 }
0x2631   :  { %v3282_v51 = vpop.xlane.xlu0 %3281 }
0x2632   :  { %4933 = vrcp.f32 %v3282_v51 }
0x2633   :  { %3349 = vrot.lane.b32.xlu0 %v5749_v17, %s6001_s7 }
0x2638   :  { %v4932_v55 = vpop.eup %4931 }
0x2639   :  { %v3293_v56 = vmul.f32 %v4932_v55, %v4924_v4  ;;  %v4187_v4 = vld [vmem:[%s5996_s2 + $0x3] ss:$0 sm:$0xff] }
0x263b   :  { %v3297_v61 = vpack.c.bf16 %v3293_v56, %v3293_v56 }
0x263c   :  { %v4934_v60 = vpop.eup %4933 }
0x263d   :  { %4674 = vmatmul.mubr.msk.bf16.vlgmr.msra.gmra.mrb[84].mxu1 %vm443_vm3, %v3297_v61  ;;  %v3294_v17 = vmul.f32 %v4934_v60, %v4926_v41  ;;  %v4826_v60 = vld [vmem:[%s5943_s10 + $0x38] sm:$0xff]  }
0x263e   :  { %4685 = vmatprep.mubr.msk.bf16.mxu1 %vm4982_vm1, %v4981_v15 }
0x263f   :  { %v3298_v62 = vpack.c.bf16 %v3294_v17, %v3294_v17 }
0x26a6   :  { %v3285_v36 = vpop.xlane.xlu1 %3284 }
0x26a7   :  { %4935 = vrcp.f32 %v3285_v36 }
0x26aa   :  { %v3398_v52 = vpop.permute.xlu1 %3397  ;;  %v3288_v31 = vpop.xlane.xlu0 %3287 }
0x26ab   :  { %v3403_v57 = vsel %vm497_vm4, %v3398_v52, 0  ;;  %4937 = vrcp.f32 %v3288_v31 }
0x26ac   :  { %4684 = vmatpush3.bf16.msra.mxu1 %v3403_v57 }
0x26ad   :  { %4695 = vmatprep.subr.bf16.mxu1 %v4981_v15 }
0x26ae   :  { %v3350_v32 = vpop.permute.xlu0 %3349  ;;  %v3446_v49 = vpop.permute.xlu1 %3445 }
0x26af   :  { %v3355_v59 = vsel %vm497_vm4, %v3350_v32, 0  ;;  %v3451_v0 = vsel %vm497_vm4, %v3446_v49, 0 }
0x26b0   :  { %4678 = vmatpush3.bf16.msra.mxu0 %v3355_v59 }
0x26b1   :  { %v4936_v43 = vpop.eup %4935  ;;  %4689 = vmatprep.subr.bf16.mxu0 %v4981_v15 }
0x26b2   :  { %v3295_v63 = vmul.f32 %v4936_v43, %v4928_v11 }
0x26b3   :  { %4680 = vmatmul.mubr.msk.bf16.vlgmr.msra.gmra.mrb[92].mxu0 %vm443_vm3, %v3298_v62  ;;  %v4193_v62 = vld [vmem:[%s5997_s6 + $0x3] ss:$0 sm:$0xff] }
0x26b4   :  { %4690 = vmatpush3.bf16.msra.mxu0 %v3451_v0  ;;  %v3299_v2 = vpack.c.bf16 %v3295_v63, %v3295_v63  ;;  %4691 = vmatprep.mubr.msk.bf16.mxu0 %vm4982_vm1, %v4981_v15 }
0x26b5   :  { %v4938_v3 = vpop.eup %4937  ;;  %4703 = vmatprep.subr.bf16.mxu0 %v4981_v15 }
0x26b6   :  { %v3296_v5 = vmul.f32 %v4938_v3, %v4930_v28  ;;  %4686 = vmatmul.mubr.msk.bf16.vlgmr.msra.gmra.mrb[88].mxu1 %vm443_vm3, %v3299_v2  ;;  %v4194_v3 = vld [vmem:[%s5998_s28 + $0x3] ss:$0 sm:$0xff] }
0x26b7   :  { %4699 = vmatprep.mubr.msk.bf16.mxu1 %vm4982_vm1, %v4981_v15  ;;  %4696 = vmatpush3.bf16.msra.mxu1 %v4823_v10  ;;  %v4827_v10 = vld [vmem:[%s5945_s12 + $0x60] sm:$0xff]  }
0x26b8   :  { %v3300_v6 = vpack.c.bf16 %v3296_v5, %v3296_v5  ;;  %4697 = vmatprep.subr.bf16.mxu1 %v4981_v15 }
0x26bb   :  { %4692 = vmatmul.mubr.msk.bf16.vlgmr.msra.gmra.mrb[96].mxu0 %vm443_vm3, %v3300_v6  ;;  %4698 = vmatpush3.bf16.msra.mxu1 %v4824_v14  ;;  %v4830_v14 = vld [vmem:[%s5945_s12 + $0x78] sm:$0xff]  }
0x26bc   :  { %4707 = vmatprep.mubr.msk.bf16.mxu0 %vm4982_vm1, %v4981_v15  ;;  %4711 = vmatprep.subr.bf16.mxu1 %v4981_v15 }
0x2710   :  { %v3343_v8 = vpop.f32.mrb[84].mxu1 }
0x2711   :  { %v4675_v9 = vpop.f32.mrb[85].mxu1 }
0x2712   :  { %v3346_v12 = vpop.f32.mrb[86].mxu1 }
0x2713   :  { %v4676_v13 = vpop.f32.mrb[87].mxu1  ;;  %v4828_v12 = vld [vmem:[%s5945_s12 + $0x68] sm:$0xff]  }
0x2714   :  { %v4829_v13 = vld [vmem:[%s5945_s12 + $0x70] sm:$0xff]  }
0x2786   :  { %v3391_v16 = vpop.f32.mrb[92].mxu0 }
0x2787   :  { %v4681_v53 = vpop.f32.mrb[93].mxu0 }
0x2788   :  { %v3394_v18 = vpop.f32.mrb[94].mxu0 }
0x2789   :  { %v4682_v20 = vpop.f32.mrb[95].mxu0  ;;  %v3439_v21 = vpop.f32.mrb[88].mxu1 }
0x278a   :  { %v4687_v22 = vpop.f32.mrb[89].mxu1 }
0x278b   :  { %v3442_v23 = vpop.f32.mrb[90].mxu1 }
0x278c   :  { %v4688_v24 = vpop.f32.mrb[91].mxu1 }
0x278e   :  { %v3487_v25 = vpop.f32.mrb[96].mxu0 }
0x278f   :  { %v4781_v34 = vpack.i.bf16 %v3487_v25, %v3439_v21  ;;  %v4693_v1 = vpop.f32.mrb[97].mxu0 }
0x2790   :  { %v3490_v26 = vpop.f32.mrb[98].mxu0 }
0x2791   :  { %4782 = vrot.lane.b32.xlu1 %v4781_v34, %s6002_s4  ;;  %v4694_v27 = vpop.f32.mrb[99].mxu0 }
0x2803   :  { %v4783_v29 = vpop.permute.xlu1 %4782 }
0x2804   :  { %v4785_v30 = vunpack.i.h.bf16 %v4783_v29  ;;  %v4784_v33 = vunpack.i.l.bf16 %v4783_v29 }
0x2806   :  { %v3502_v35 = vsel %vm217_vm2, %v3391_v16, %v4785_v30  ;;  %v3501_v39 = vsel %vm217_vm2, %v3343_v8, %v4784_v33  ;;  %v4200_v16 = vld [vmem:[%s5944_s11 + $0x3] ss:$0 sm:$0xff] }
0x2807   :  { %v3508_v40 = vpack.c.bf16 %v3502_v35, %v3501_v39 }
0x2809   :  { %4700 = vmatmul.mubr.msk.bf16.vlgmr.msra.gmra.mrb[92].mxu1 %vm86_vm0, %v3508_v40 }
0x280a   :  { %4719 = vmatprep.mubr.msk.bf16.mxu1 %vm4982_vm1, %v4981_v15  ;;  %4712 = vmatpush3.bf16.msra.mxu1 %v4827_v10  ;;  %v4222_v10 = vld [vmem:[%s5948_s15 + $0x3] ss:$0 sm:$0xff] }
0x280b   :  { %4713 = vmatprep.subr.bf16.mxu1 %v4981_v15 }
0x280e   :  { %4714 = vmatpush3.bf16.msra.mxu1 %v4828_v12 }
0x280f   :  { %4715 = vmatprep.subr.bf16.mxu1 %v4981_v15 }
0x2812   :  { %4716 = vmatpush3.bf16.msra.mxu1 %v4829_v13 }
0x2813   :  { %4717 = vmatprep.subr.bf16.mxu1 %v4981_v15 }
0x2816   :  { %4718 = vmatpush3.bf16.msra.mxu1 %v4830_v14 }
0x28dc   :  { %v3566_v7 = vpop.f32.mrb[92].mxu1 }
0x28dd   :  { %v3567_v41 = vadd.f32 %v4187_v4, %v3566_v7  ;;  %v4701_v42 = vpop.f32.mrb[93].mxu1 }
0x28de   :  { %v3569_v44 = vpop.f32.mrb[94].mxu1 }
0x28df   :  { %v3573_v45 = vadd.f32 %v3567_v41, %v5736_v37  ;;  %v3570_v46 = vadd.f32 %v4187_v4, %v3569_v44  ;;  %v4702_v19 = vpop.f32.mrb[95].mxu1 }
0x28e0   :  { %v4213_v19 = vld [vmem:[%s5946_s13 + $0x3] ss:$0 sm:$0xff] }
0x28e1   :  { %v3574_v47 = vadd.f32 %v3570_v46, %v5738_v38  ;;  %v3579_v48 = vsel %vm86_vm0, %v3573_v45, 0.0  ;;  %v4825_v38 = vld [vmem:[%s5943_s10 + $0x30] sm:$0xff]  }
0x28e2   :  { %3580 = vadd.xlane.f32.xlu0 %v3579_v48  ;;  %4704 = vmatpush3.bf16.msra.mxu0 %v4825_v38 }
0x28e3   :  { %v3582_v11 = vsel %vm86_vm0, %v3574_v47, 0.0  ;;  %4705 = vmatprep.subr.bf16.mxu0 %v4981_v15 }
0x28e4   :  { %3583 = vadd.xlane.f32.xlu1 %v3582_v11 }
0x28e6   :  { %4706 = vmatpush3.bf16.msra.mxu0 %v4826_v60 }
0x28e7   :  { %4723 = vmatprep.subr.bf16.mxu0 %v4981_v15 }
0x296f   :  { %v3581_v58 = vpop.xlane.xlu0 %3580 }
0x2970   :  { %v3585_v28 = vmul.f32 0.03125, %v3581_v58 }
0x2971   :  { %v3584_v50 = vpop.xlane.xlu1 %3583 }
0x2972   :  { %v3587_v54 = vsub.f32 %v3573_v45, %v3585_v28  ;;  %v3586_v55 = vmul.f32 0.03125, %v3584_v50 }
0x2974   :  { %v3588_v56 = vsub.f32 %v3574_v47, %v3586_v55  ;;  %v3589_v61 = vmul.f32 %v3587_v54, %v3587_v54 }
0x2976   :  { %v3591_v51 = vsel %vm86_vm0, %v3589_v61, 0.0  ;;  %v3590_v37 = vmul.f32 %v3588_v56, %v3588_v56 }
0x2977   :  { %3592 = vadd.xlane.f32.xlu0 %v3591_v51 }
0x2978   :  { %v3594_v36 = vsel %vm86_vm0, %v3590_v37, 0.0 }
0x297b   :  { %3595 = vadd.xlane.f32.xlu0 %v3594_v36 }
0x2a04   :  { %v3593_v52 = vpop.xlane.xlu0 %3592 }
0x2a05   :  { %v3597_v31 = vmul.f32 0.03125, %v3593_v52 }
0x2a07   :  { %v3599_v57 = vadd.f32 1e-05, %v3597_v31 }
0x2a08   :  { %v3596_v17 = vpop.xlane.xlu0 %3595 }
0x2a09   :  { %4939 = vrsqrt.f32 %v3599_v57  ;;  %v3598_v32 = vmul.f32 0.03125, %v3596_v17 }
0x2a0b   :  { %v3600_v59 = vadd.f32 1e-05, %v3598_v32 }
0x2a0d   :  { %4941 = vrsqrt.f32 %v3600_v59  ;;  %v4831_v59 = vld [vmem:[%s5954_s21] sm:$0xff]  }
0x2a13   :  { %v4940_v49 = vpop.eup %4939 }
0x2a14   :  { %v3603_v43 = vmul.f32 %v4940_v49, %v3587_v54  ;;  %v4832_v49 = vld [vmem:[%s5954_s21 + $0x8] sm:$0xff]  }
0x2a16   :  { %v3611_v0 = vmul.f32 %v4193_v62, %v3603_v43 }
0x2a17   :  { %v4942_v63 = vpop.eup %4941 }
0x2a18   :  { %v3604_v2 = vmul.f32 %v4942_v63, %v3588_v56  ;;  %v3619_v6 = vadd.f32 %v4194_v3, %v3611_v0 }
0x2a1a   :  { %v3612_v5 = vmul.f32 %v4193_v62, %v3604_v2 }
0x2a1c   :  { %v3620_v8 = vadd.f32 %v4194_v3, %v3612_v5 }
0x2a1e   :  { %v3626_v9 = vpack.c.bf16 %v3620_v8, %v3619_v6 }
0x2a20   :  { %4708 = vmatmul.mubr.msk.bf16.vlgmr.msra.gmra.mrb[100].mxu0 %vm86_vm0, %v3626_v9 }
0x2a21   :  { %4727 = vmatprep.mubr.msk.bf16.mxu0 %vm4982_vm1, %v4981_v15  ;;  %4724 = vmatpush3.bf16.msra.mxu0 %v4831_v59 }
0x2a22   :  { %4725 = vmatprep.subr.bf16.mxu0 %v4981_v15 }
0x2a25   :  { %4726 = vmatpush3.bf16.msra.mxu0 %v4832_v49 }
0x2a26   :  { %4731 = vmatprep.subr.bf16.mxu0 %v4981_v15 }
0x2af3   :  { %v3684_v53 = vpop.f32.mrb[100].mxu0 }
0x2af4   :  { %v3685_v18 = vadd.f32 %v4200_v16, %v3684_v53  ;;  %v4709_v20 = vpop.f32.mrb[101].mxu0 }
0x2af5   :  { %v3687_v21 = vpop.f32.mrb[102].mxu0 }
0x2af6   :  { %v3693_v22 = vmul.f32 0.044715, %v3685_v18  ;;  %v3688_v23 = vadd.f32 %v4200_v16, %v3687_v21  ;;  %v4710_v24 = vpop.f32.mrb[103].mxu0  ;;  %v3691_v7 = vmul.f32 0.5, %v3685_v18 }
0x2af8   :  { %v3695_v25 = vmul.f32 %v3693_v22, %v3685_v18  ;;  %v3694_v34 = vmul.f32 0.044715, %v3688_v23  ;;  %v3692_v41 = vmul.f32 0.5, %v3688_v23 }
0x2afa   :  { %v3697_v1 = vmul.f32 %v3695_v25, %v3685_v18  ;;  %v3696_v26 = vmul.f32 %v3694_v34, %v3688_v23  ;;  %v4833_v34 = vld [vmem:[%s5956_s23] sm:$0xff]  }
0x2afc   :  { %v3699_v27 = vadd.f32 %v3697_v1, %v3685_v18  ;;  %v3698_v29 = vmul.f32 %v3696_v26, %v3688_v23  ;;  %v4834_v1 = vld [vmem:[%s5956_s23 + $0x8] sm:$0xff]   ;;  %v4223_v26 = vld [vmem:[%s6003_s3] ss:$0 sm:$0xff]  ;;  %s4987_s23 = smov [#allocation2]  }
0x2afd   :  { %s3995_s19 = sshll.u32 %s4987_s23, 4  ;;  %s3996_s19 = int_to_ptr.vmem [resolvable:$true] %s3995_s19 }
0x2afe   :  { %v3701_v30 = vmul.f32 0.7978846, %v3699_v27  ;;  %v3700_v33 = vadd.f32 %v3698_v29, %v3688_v23  ;;  %s4957_s29 = scalar_lea.vmem %s3996_s19, 32  ;;  %p4962_p1 = scmp.lt.s32.totalorder %s3996_s19, %s3996_s19 }
0x2aff   :  { %p4958_p0 = scmp.ne.s32.totalorder %s3996_s19, %s4957_s29  ;;  %p4963_p2 = scmp.lt.s32.totalorder %s4957_s29, %s4957_s29 }
0x2b00   :  { %4943 = vtanh.f32 %v3701_v30  ;;  %v3702_v35 = vmul.f32 0.7978846, %v3700_v33 }
0x2b01   :  { %p4964_p3 = por %p4963_p2, %p4962_p1 }
0x2b02   :  { %4945 = vtanh.f32 %v3702_v35 }
0x2b03   :  { %p4965_p4 = pnand %p4964_p3, %p4958_p0 }
0x2b0a   :  { %v4944_v39 = vpop.eup %4943 }
0x2b0b   :  { %v3705_v40 = vadd.f32 1.0, %v4944_v39 }
0x2b0c   :  { %v4946_v4 = vpop.eup %4945 }
0x2b0d   :  { %v3706_v42 = vadd.f32 1.0, %v4946_v4  ;;  %v3707_v44 = vmul.f32 %v3705_v40, %v3691_v7 }
0x2b0f   :  { %v3708_v45 = vmul.f32 %v3706_v42, %v3692_v41 }
0x2b11   :  { %v3718_v46 = vpack.c.bf16 %v3708_v45, %v3707_v44 }
0x2b13   :  { %4720 = vmatmul.mubr.msk.bf16.vlgmr.msra.gmra.mrb[96].mxu1 %vm935_vm5, %v3718_v46 }
0x2be6   :  { %v3788_v47 = vpop.f32.mrb[96].mxu1 }
0x2be7   :  { %v3789_v48 = vadd.f32 %v4213_v19, %v3788_v47  ;;  %v4721_v11 = vpop.f32.mrb[97].mxu1 }
0x2be8   :  { %v3791_v58 = vpop.f32.mrb[98].mxu1 }
0x2be9   :  { %v3795_v28 = vadd.f32 %v3789_v48, %v3619_v6  ;;  %v3792_v50 = vadd.f32 %v4213_v19, %v3791_v58  ;;  %v4722_v54 = vpop.f32.mrb[99].mxu1  ;;  %v4221_v6 = vld [vmem:[%s5947_s14 + $0x3] ss:$0 sm:$0xff] }
0x2beb   :  { %v3796_v55 = vadd.f32 %v3792_v50, %v3620_v8  ;;  %v3801_v56 = vsel %vm86_vm0, %v3795_v28, 0.0 }
0x2bec   :  { %3802 = vadd.xlane.f32.xlu1 %v3801_v56 }
0x2bed   :  { %v3804_v61 = vsel %vm86_vm0, %v3796_v55, 0.0 }
0x2bee   :  { %3805 = vadd.xlane.f32.xlu0 %v3804_v61 }
0x2c79   :  { %v3803_v51 = vpop.xlane.xlu1 %3802 }
0x2c7a   :  { %v3807_v37 = vmul.f32 0.03125, %v3803_v51 }
0x2c7b   :  { %v3806_v36 = vpop.xlane.xlu0 %3805 }
0x2c7c   :  { %v3809_v38 = vsub.f32 %v3795_v28, %v3807_v37  ;;  %v3808_v60 = vmul.f32 0.03125, %v3806_v36 }
0x2c7e   :  { %v3810_v52 = vsub.f32 %v3796_v55, %v3808_v60  ;;  %v3811_v31 = vmul.f32 %v3809_v38, %v3809_v38 }
0x2c80   :  { %v3813_v57 = vsel %vm86_vm0, %v3811_v31, 0.0  ;;  %v3812_v17 = vmul.f32 %v3810_v52, %v3810_v52 }
0x2c81   :  { %3814 = vadd.xlane.f32.xlu1 %v3813_v57 }
0x2c82   :  { %v3816_v32 = vsel %vm86_vm0, %v3812_v17, 0.0 }
0x2c83   :  { %3817 = vadd.xlane.f32.xlu0 %v3816_v32 }
0x2d0e   :  { %v3815_v43 = vpop.xlane.xlu1 %3814 }
0x2d0f   :  { %v3819_v62 = vmul.f32 0.03125, %v3815_v43 }
0x2d10   :  { %v3818_v63 = vpop.xlane.xlu0 %3817 }
0x2d11   :  { %v3821_v0 = vadd.f32 1e-05, %v3819_v62  ;;  %v3820_v2 = vmul.f32 0.03125, %v3818_v63 }
0x2d13   :  { %4947 = vrsqrt.f32 %v3821_v0  ;;  %v3822_v3 = vadd.f32 1e-05, %v3820_v2 }
0x2d15   :  { %4949 = vrsqrt.f32 %v3822_v3 }
0x2d1d   :  { %v4948_v5 = vpop.eup %4947 }
0x2d1e   :  { %v3825_v8 = vmul.f32 %v4948_v5, %v3809_v38 }
0x2d1f   :  { %v4950_v9 = vpop.eup %4949 }
0x2d20   :  { %v3833_v12 = vmul.f32 %v4221_v6, %v3825_v8  ;;  %v3826_v13 = vmul.f32 %v4950_v9, %v3810_v52 }
0x2d22   :  { %v3841_v14 = vadd.f32 %v4222_v10, %v3833_v12  ;;  %v3834_v16 = vmul.f32 %v4221_v6, %v3826_v13 }
0x2d24   :  { %v3842_v53 = vadd.f32 %v4222_v10, %v3834_v16  ;;  %v3847_v18 = vpack.c.bf16 %v3841_v14, %v3841_v14 }
0x2d26   :  { %v3848_v20 = vpack.c.bf16 %v3842_v53, %v3842_v53  ;;  %v3858_v22 = vunpack.c.l.b16 %v3847_v18 }
0x2d28   :  { %v3859_v21 = vunpack.c.l.b16 %v3848_v20 }
0x2d2a   :  { %v3860_v23 = vrot.slane %v3859_v21, 7 }
0x2d2c   :  { %v3862_v24 = vsel %vm3861_vm6, %v3860_v23, %v3858_v22 }
0x2d2d   :  { %v3863_v25 = vpack.c.b16 %v3862_v24, %v3862_v24 }
0x2d2f   :  { %4728 = vmatmul.mubr.msk.bf16.vlgmr.msra.gmra.mrb[104].mxu0 %vm86_vm0, %v3863_v25 }
0x2d30   :  { %4735 = vmatprep.mubr.msk.bf16.mxu0 %vm4982_vm1, %v4981_v15  ;;  %4732 = vmatpush3.bf16.msra.mxu0 %v4833_v34 }
0x2d31   :  { %4733 = vmatprep.subr.bf16.mxu0 %v4981_v15  ;;  %v4227_v15 = vld [vmem:[%s6004_s27] ss:$0 sm:$0xff] }
0x2d34   :  { %4734 = vmatpush3.bf16.msra.mxu0 %v4834_v1 }
0x2e02   :  { %v3913_v27 = vpop.f32.mrb[104].mxu0 }
0x2e03   :  { %v3914_v29 = vadd.f32 %v4223_v26, %v3913_v27  ;;  %v4729_v30 = vpop.f32.mrb[105].mxu0 }
0x2e04   :  { %v3916_v33 = vpop.f32.mrb[106].mxu0 }
0x2e05   :  { %4951 = vtanh.f32 %v3914_v29  ;;  %v4730_v35 = vpop.f32.mrb[107].mxu0 }
0x2e0f   :  { %v4952_v39 = vpop.eup %4951 }
0x2e10   :  { %v3924_v40 = vpack.c.bf16 %v4952_v39, %v4952_v39 }
0x2e12   :  { %4736 = vmatmul.mubr.msk.bf16.vlgmr.msra.gmra.mrb[108].mxu0 %vm86_vm0, %v3924_v40 }
0x2ee5   :  { %v3981_v4 = vpop.f32.mrb[108].mxu0 }
0x2ee6   :  { %v3982_v7 = vadd.f32 %v4227_v15, %v3981_v4  ;;  %v4737_v41 = vpop.f32.mrb[109].mxu0 }
0x2ee7   :  { %v3984_v42 = vpop.f32.mrb[110].mxu0 }
0x2ee8   :  { %v4738_v44 = vpop.f32.mrb[111].mxu0  ;;  %3988 = vst.msk [vmem:[#allocation2] sm:$0x3] %vm3987_vm7, %v3982_v7 }
0x2ee9   :  { %4968 = shalt.err (!%p4965_p4)
}
0x2eea   :  { %s6005_s28 = sld [smem:[#allocation17_spill]] }
0x2ef0   :  { %s4969_s26 = scalar_lea.hbm %s6005_s28, 32 }
0x2ef1   :  { %p4970_p5 = scmp.ne.s32.totalorder %s6005_s28, %s4969_s26  ;;  %p4973_p6 = scmp.lt.u32.totalorder %s4969_s26, %s6005_s28 }
0x2ef3   :  { %p4975_p7 = pnand %p4973_p6, %p4970_p5 }
0x2ef5   :  { %4978 = shalt.err (!%p4975_p7)
}
0x2ef6   :  { %3998 = dma.vmem_to_hbm [thread:$0]  %s3996_s19, 32, %s6005_s28, [#allocation3]  }
0x2ef7   :  { %4979 = dma.done.wait [#allocation3], 32  }
0x2ef8   :  { %4980 = vsyncadd [#allocation3], 4294967264 }
0x2ef9   :  { %4002 = vsyncpa [#allocation3], 1 }

</bundles_post_ra>
